<compile_context>
chip_gen: v6e
topology: v6e:2x2x1
jax: 0.10.0
libtpu: 0.0.40
codegen_flags: <defaults>
</compile_context>

<pallas_src>
import numpy as np
import jax
import jax.numpy as jnp
from jax.experimental import pallas as pl
from jax.experimental.pallas import tpu as pltpu

EPS = 1e-5
NEG_SLOPE = 0.2
LIN1 = 128   # layer-1 input lane width: W*Cin = 32*3 = 96, zero-padded to 128 lanes

_VMEM = pl.BlockSpec(memory_space=pltpu.MemorySpace.VMEM)


# ----------------------------------------------------------------------------
# Fused whole-network kernel (single invocation, no grid; footprint ~2.3 MiB VMEM)
# ----------------------------------------------------------------------------
def _disc_kernel(x1_ref,
                 wb1_ref, rs1_ref, pool1_ref, poolt1_ref, g1_ref, b1_ref,
                 wb2_ref, rs2_ref, pool2_ref, poolt2_ref, g2_ref, b2_ref,
                 wb3_ref, rs3_ref, pool3_ref, poolt3_ref, g3_ref, b3_ref,
                 wht_ref, dmask_ref, srow_ref, bo_ref,
                 o_ref,
                 x2_s, x3_s):
    """Activation layout: rows = (b, h) with a 1-row zero halo per image
    (flat row index b*(H+2) + 1 + h), lanes = w*C + c  (c minor).

    x1:    [B*(H0+2), 128]        haloed input slab (lanes 96..127 zero)
    wb*:   [3, Lin, Wout*Cout]    per-ky block-banded conv weight (kx/stride folded in)
    rs*:   [B*Ho, B*(Hi+2)-2]     0/1 stride-2 row selector (per-image aware)
    pool*: [Wo*Co, Co] / poolt*: [Co, Wo*Co]   0/1 channel pool / broadcast matrices
    g*/b*: [1, Wo*Co]             BN affine, already broadcast to the lane layout
    wht:   [W3*C3, H3]            head weight, lanes->rows of the h-index
    dmask: [B*H3, H3]             picks entry (b*H3+h, h)
    srow:  [B, B*H3]              per-image row combine
    bo:    [1, 1]                 head bias;   o: [B, 1] sigmoid output
    x2_s/x3_s: haloed VMEM scratch slabs for layer-2 / layer-3 inputs
    """
    B = o_ref.shape[0]

    def conv_bn_lrelu(src, wb_ref, rs_ref, pool_ref, poolt_ref, g_ref, b_ref):
        # --- conv: 3 row-shifted contiguous slices, one MXU matmul per ky tap ---
        R = src.shape[0] - 2
        s = jnp.dot(src[0:R, :], wb_ref[0], preferred_element_type=jnp.float32)
        s = s + jnp.dot(src[1:R + 1, :], wb_ref[1], preferred_element_type=jnp.float32)
        s = s + jnp.dot(src[2:R + 2, :], wb_ref[2], preferred_element_type=jnp.float32)
        # stride-2 row subsample + halo/cross-image row drop (tiny 0/1 matmul)
        out = jnp.dot(rs_ref[...], s, preferred_element_type=jnp.float32)   # [B*Ho, Wo*Co]

        # --- BatchNorm (training-mode batch stats, biased var, two-pass) ---------
        inv_n = 1.0 / (out.shape[0] * (out.shape[1] // pool_ref.shape[1]))  # 1/(B*Ho*Wo)
        colsum = jnp.sum(out, axis=0, keepdims=True)                        # [1, Wo*Co]
        mean = jnp.dot(jnp.dot(colsum, pool_ref[...]) * inv_n, poolt_ref[...])
        cent = out - mean
        var = jnp.dot(jnp.dot(jnp.sum(cent * cent, axis=0, keepdims=True),
                              pool_ref[...]) * inv_n, poolt_ref[...])
        y = cent * jax.lax.rsqrt(var + EPS) * g_ref[...] + b_ref[...]
        return jnp.maximum(y, NEG_SLOPE * y)                                # LeakyReLU(0.2)

    # ---- block 1: conv(3 -> 16), 32x32 -> 16x16 ------------------------------
    y1 = conv_bn_lrelu(x1_ref, wb1_ref, rs1_ref, pool1_ref, poolt1_ref, g1_ref, b1_ref)
    H1 = y1.shape[0] // B
    x2_s[...] = jnp.zeros_like(x2_s)                       # zero halos once
    for b in range(B):                                     # static slice writes
        x2_s[b * (H1 + 2) + 1: b * (H1 + 2) + 1 + H1, :] = y1[b * H1:(b + 1) * H1, :]

    # ---- block 2: conv(16 -> 32), 16x16 -> 8x8 --------------------------------
    y2 = conv_bn_lrelu(x2_s, wb2_ref, rs2_ref, pool2_ref, poolt2_ref, g2_ref, b2_ref)
    H2 = y2.shape[0] // B
    x3_s[...] = jnp.zeros_like(x3_s)
    for b in range(B):
        x3_s[b * (H2 + 2) + 1: b * (H2 + 2) + 1 + H2, :] = y2[b * H2:(b + 1) * H2, :]

    # ---- block 3: conv(32 -> 64), 8x8 -> 4x4 ----------------------------------
    y3 = conv_bn_lrelu(x3_s, wb3_ref, rs3_ref, pool3_ref, poolt3_ref, g3_ref, b3_ref)

    # ---- head: Linear(hidden*4*4 -> 1) + Sigmoid (no flatten transpose) -------
    g = jnp.dot(y3, wht_ref[...], preferred_element_type=jnp.float32)      # [B*H3, H3]
    row_tot = jnp.sum(g * dmask_ref[...], axis=1, keepdims=True)           # [B*H3, 1]
    logit = jnp.dot(srow_ref[...], row_tot,
                    preferred_element_type=jnp.float32) + bo_ref[...]      # [B, 1]
    e = jnp.exp(-jnp.abs(logit))                                           # stable sigmoid
    o_ref[...] = jnp.where(logit >= 0.0, 1.0 / (1.0 + e), e / (1.0 + e))


# ----------------------------------------------------------------------------
# Wrapper: tiny layout prep (transpose + halo pad, ~34 KiB) + single pallas_call
# ----------------------------------------------------------------------------
def discriminator_forward(x_nchw, kp):
    B, C, H, W = x_nchw.shape
    H1, H2 = H // 2, H // 4
    x = jnp.transpose(x_nchw, (0, 2, 3, 1)).astype(jnp.float32).reshape(B, H, W * C)
    x1 = jnp.zeros((B, H + 2, LIN1), jnp.float32).at[:, 1:H + 1, :W * C].set(x)
    x1 = x1.reshape(B * (H + 2), LIN1)

    lo1 = kp["wb1"].shape[2]    # layer-1 output / layer-2 input lane width (256)
    lo2 = kp["wb2"].shape[2]    # layer-2 output / layer-3 input lane width (256)

    return pl.pallas_call(
        _disc_kernel,
        out_shape=jax.ShapeDtypeStruct((B, 1), jnp.float32),
        in_specs=[_VMEM] * 23,
        out_specs=_VMEM,
        scratch_shapes=[pltpu.VMEM((B * (H1 + 2), lo1), jnp.float32),
                        pltpu.VMEM((B * (H2 + 2), lo2), jnp.float32)],
    )(x1,
      kp["wb1"], kp["rs1"], kp["pool1"], kp["poolt1"], kp["g1"], kp["b1"],
      kp["wb2"], kp["rs2"], kp["pool2"], kp["poolt2"], kp["g2"], kp["b2"],
      kp["wb3"], kp["rs3"], kp["pool3"], kp["poolt3"], kp["g3"], kp["b3"],
      kp["wht"], kp["dmask"], kp["srow"], kp["b_out"])


# ----------------------------------------------------------------------------
# Host-side parameter construction / one-time kernel-layout packing
# ----------------------------------------------------------------------------
def make_params(key, channel_dim=3, hidden_dim=64):
    """Logical (PyTorch-equivalent) params: HWIO conv weights (bias=False), BN affine, head."""
    c1, c2, c3 = hidden_dim // 4, hidden_dim // 2, hidden_dim
    ks = jax.random.split(key, 5)
    return {
        "conv1": 0.02 * jax.random.normal(ks[0], (3, 3, channel_dim, c1), jnp.float32),
        "conv2": 0.02 * jax.random.normal(ks[1], (3, 3, c1, c2), jnp.float32),
        "conv3": 0.02 * jax.random.normal(ks[2], (3, 3, c2, c3), jnp.float32),
        "g1": jnp.ones((c1,), jnp.float32), "b1": jnp.zeros((c1,), jnp.float32),
        "g2": jnp.ones((c2,), jnp.float32), "b2": jnp.zeros((c2,), jnp.float32),
        "g3": jnp.ones((c3,), jnp.float32), "b3": jnp.zeros((c3,), jnp.float32),
        "w_out": 0.02 * jax.random.normal(ks[3], (1, hidden_dim * 4 * 4), jnp.float32),
        "b_out": 0.02 * jax.random.normal(ks[4], (1,), jnp.float32),
    }


def _build_wbig(w_hwio, Wi, Wo, lin, lout):
    """Per-ky block-banded weight [3, lin, lout]: folds kx taps, stride-2 cols, W padding."""
    w = np.asarray(w_hwio)
    _, _, Ci, Co = w.shape
    out = np.zeros((3, lin, lout), np.float32)
    for ky in range(3):
        for wo in range(Wo):
            for kx in range(3):
                wi = 2 * wo + kx - 1
                if wi < 0 or wi >= Wi:
                    continue                       # zero padding in W
                out[ky, wi * Ci:(wi + 1) * Ci, wo * Co:(wo + 1) * Co] = w[ky, kx]
    return jnp.asarray(out)


def _build_rowsel(B, Hi, Ho):
    """0/1 [B*Ho, B*(Hi+2)-2]: picks row b*(Hi+2)+2*ho (stride-2 rows, skips halos)."""
    rs = np.zeros((B * Ho, B * (Hi + 2) - 2), np.float32)
    for b in range(B):
        for ho in range(Ho):
            rs[b * Ho + ho, b * (Hi + 2) + 2 * ho] = 1.0
    return jnp.asarray(rs)


def _build_pool(Wo, Co):
    """0/1 [Wo*Co, Co]: sums lanes belonging to the same channel."""
    p = np.zeros((Wo * Co, Co), np.float32)
    for w in range(Wo):
        p[w * Co:(w + 1) * Co, :] = np.eye(Co, dtype=np.float32)
    return jnp.asarray(p)


def _lane_vec(v, Wo):
    """Per-channel vector -> per-lane [1, Wo*Co] in the (w, c) lane layout."""
    return jnp.asarray(np.tile(np.asarray(v), Wo).reshape(1, -1))


def build_kernel_params(params, B, H=32, W=32, hidden_dim=64):
    c1, c2, c3 = hidden_dim // 4, hidden_dim // 2, hidden_dim
    cin = params["conv1"].shape[2]
    assert W * cin <= LIN1
    H1, W1 = H // 2, W // 2
    H2, W2 = H // 4, W // 4
    H3, W3 = H // 8, W // 8

    pool1, pool2, pool3 = _build_pool(W1, c1), _build_pool(W2, c2), _build_pool(W3, c3)

    # Head weight re-indexed to the kernel's (rows=h, lanes=w*c3+c) activation layout;
    # matches PyTorch's NCHW flatten (flat index = c*H3*W3 + h*W3 + w).
    w_out = np.asarray(params["w_out"]).reshape(c3, H3, W3)
    wht = np.zeros((W3 * c3, H3), np.float32)
    for h in range(H3):
        for w in range(W3):
            wht[w * c3:(w + 1) * c3, h] = w_out[:, h, w]
    dmask = np.zeros((B * H3, H3), np.float32)
    srow = np.zeros((B, B * H3), np.float32)
    for b in range(B):
        for h in range(H3):
            dmask[b * H3 + h, h] = 1.0
        srow[b, b * H3:(b + 1) * H3] = 1.0

    return {
        "wb1": _build_wbig(params["conv1"], W, W1, LIN1, W1 * c1),
        "rs1": _build_rowsel(B, H, H1),
        "pool1": pool1, "poolt1": pool1.T,
        "g1": _lane_vec(params["g1"], W1), "b1": _lane_vec(params["b1"], W1),
        "wb2": _build_wbig(params["conv2"], W1, W2, W1 * c1, W2 * c2),
        "rs2": _build_rowsel(B, H1, H2),
        "pool2": pool2, "poolt2": pool2.T,
        "g2": _lane_vec(params["g2"], W2), "b2": _lane_vec(params["b2"], W2),
        "wb3": _build_wbig(params["conv3"], W2, W3, W2 * c2, W3 * c3),
        "rs3": _build_rowsel(B, H2, H3),
        "pool3": pool3, "poolt3": pool3.T,
        "g3": _lane_vec(params["g3"], W3), "b3": _lane_vec(params["b3"], W3),
        "wht": jnp.asarray(wht), "dmask": jnp.asarray(dmask), "srow": jnp.asarray(srow),
        "b_out": params["b_out"].reshape(1, 1),
    }


# ----------------------------------------------------------------------------
# Pure-JAX reference (lax.conv) to validate the Pallas path
# ----------------------------------------------------------------------------
def reference_forward(x_nchw, params):
    x = jnp.transpose(x_nchw, (0, 2, 3, 1)).astype(jnp.float32)
    for i, w in enumerate([params["conv1"], params["conv2"], params["conv3"]], start=1):
        y = jax.lax.conv_general_dilated(
            x, w, window_strides=(2, 2), padding=((1, 1), (1, 1)),
            dimension_numbers=("NHWC", "HWIO", "NHWC"))
        mean = jnp.mean(y, axis=(0, 1, 2), keepdims=True)
        var = jnp.mean(jnp.square(y - mean), axis=(0, 1, 2), keepdims=True)
        y = (y - mean) * jax.lax.rsqrt(var + EPS)
        y = y * params[f"g{i}"].reshape(1, 1, 1, -1) + params[f"b{i}"].reshape(1, 1, 1, -1)
        x = jnp.maximum(y, NEG_SLOPE * y)
    B = x.shape[0]
    x_flat = jnp.transpose(x, (0, 3, 1, 2)).reshape(B, -1)    # PyTorch NCHW flatten
    logits = x_flat @ params["w_out"].T + params["b_out"]
    return jax.nn.sigmoid(logits)


if __name__ == "__main__":
    key = jax.random.PRNGKey(0)
    k_x, k_p = jax.random.split(key)
    # 32x32 input so three stride-2 convs give 4x4, matching Linear(hidden*4*4, 1)
    B = 2
    x = jax.random.normal(k_x, (B, 3, 32, 32), jnp.float32)    # NCHW, like PyTorch
    params = make_params(k_p, channel_dim=3, hidden_dim=64)
    kparams = build_kernel_params(params, B=B, H=32, W=32, hidden_dim=64)

    fwd = jax.jit(discriminator_forward)
    out = jax.block_until_ready(fwd(x, kparams))
    ref = jax.block_until_ready(reference_forward(x, params))

    assert out.shape == (B, 1), out.shape
    assert jnp.allclose(out, ref, atol=2e-4, rtol=2e-4), (out, ref)
    # TODO(synk): BatchNorm2d running-stats update / eval-mode forward is not modeled.
    print("KERNEL_OK")
</pallas_src>

<mosaic_0001>
module attributes {stable_mosaic.version = 11 : i64} {
  func.func @_disc_kernel(%arg0: memref<68x128xf32, #tpu.memory_space<vmem>>, %arg1: memref<3x128x256xf32, #tpu.memory_space<vmem>>, %arg2: memref<32x66xf32, #tpu.memory_space<vmem>>, %arg3: memref<256x16xf32, #tpu.memory_space<vmem>>, %arg4: memref<16x256xf32, #tpu.memory_space<vmem>>, %arg5: memref<1x256xf32, #tpu.memory_space<vmem>>, %arg6: memref<1x256xf32, #tpu.memory_space<vmem>>, %arg7: memref<3x256x256xf32, #tpu.memory_space<vmem>>, %arg8: memref<16x34xf32, #tpu.memory_space<vmem>>, %arg9: memref<256x32xf32, #tpu.memory_space<vmem>>, %arg10: memref<32x256xf32, #tpu.memory_space<vmem>>, %arg11: memref<1x256xf32, #tpu.memory_space<vmem>>, %arg12: memref<1x256xf32, #tpu.memory_space<vmem>>, %arg13: memref<3x256x256xf32, #tpu.memory_space<vmem>>, %arg14: memref<8x18xf32, #tpu.memory_space<vmem>>, %arg15: memref<256x64xf32, #tpu.memory_space<vmem>>, %arg16: memref<64x256xf32, #tpu.memory_space<vmem>>, %arg17: memref<1x256xf32, #tpu.memory_space<vmem>>, %arg18: memref<1x256xf32, #tpu.memory_space<vmem>>, %arg19: memref<256x4xf32, #tpu.memory_space<vmem>>, %arg20: memref<8x4xf32, #tpu.memory_space<vmem>>, %arg21: memref<2x8xf32, #tpu.memory_space<vmem>>, %arg22: memref<1x1xf32, #tpu.memory_space<vmem>>, %arg23: memref<2x1xf32, #tpu.memory_space<vmem>>, %arg24: memref<36x256xf32, #tpu.memory_space<vmem>>, %arg25: memref<20x256xf32, #tpu.memory_space<vmem>>) attributes {dimension_semantics = [], scalar_prefetch = 0 : i64, scratch_operands = 2 : i64, tpu.core_type = #tpu.core_type<tc>} {
    %c0 = arith.constant 0 : index
    %c0_0 = arith.constant 0 : index
    %0 = vector.load %arg0[%c0, %c0_0] : memref<68x128xf32, #tpu.memory_space<vmem>>, vector<66x128xf32>
    %c0_1 = arith.constant 0 : index
    %c0_2 = arith.constant 0 : index
    %c0_3 = arith.constant 0 : index
    %1 = vector.load %arg1[%c0_1, %c0_2, %c0_3] : memref<3x128x256xf32, #tpu.memory_space<vmem>>, vector<1x128x256xf32>
    %2 = vector.shape_cast %1 : vector<1x128x256xf32> to vector<128x256xf32>
    %cst = arith.constant dense<0.000000e+00> : vector<66x256xf32>
    %3 = tpu.matmul %0, %2, %cst {dimension_numbers = #tpu.dot_dimension_numbers<[1], [0], [0], [1], [0, 0, 1, 1], [], []>} : vector<66x128xf32>, vector<128x256xf32>, vector<66x256xf32> -> vector<66x256xf32>
    %c1 = arith.constant 1 : index
    %c0_4 = arith.constant 0 : index
    %4 = vector.load %arg0[%c1, %c0_4] : memref<68x128xf32, #tpu.memory_space<vmem>>, vector<66x128xf32>
    %c1_5 = arith.constant 1 : index
    %c0_6 = arith.constant 0 : index
    %c0_7 = arith.constant 0 : index
    %5 = vector.load %arg1[%c1_5, %c0_6, %c0_7] : memref<3x128x256xf32, #tpu.memory_space<vmem>>, vector<1x128x256xf32>
    %6 = vector.shape_cast %5 : vector<1x128x256xf32> to vector<128x256xf32>
    %cst_8 = arith.constant dense<0.000000e+00> : vector<66x256xf32>
    %7 = tpu.matmul %4, %6, %cst_8 {dimension_numbers = #tpu.dot_dimension_numbers<[1], [0], [0], [1], [0, 0, 1, 1], [], []>} : vector<66x128xf32>, vector<128x256xf32>, vector<66x256xf32> -> vector<66x256xf32>
    %8 = arith.addf %3, %7 : vector<66x256xf32>
    %c2 = arith.constant 2 : index
    %c0_9 = arith.constant 0 : index
    %9 = vector.load %arg0[%c2, %c0_9] : memref<68x128xf32, #tpu.memory_space<vmem>>, vector<66x128xf32>
    %c2_10 = arith.constant 2 : index
    %c0_11 = arith.constant 0 : index
    %c0_12 = arith.constant 0 : index
    %10 = vector.load %arg1[%c2_10, %c0_11, %c0_12] : memref<3x128x256xf32, #tpu.memory_space<vmem>>, vector<1x128x256xf32>
    %11 = vector.shape_cast %10 : vector<1x128x256xf32> to vector<128x256xf32>
    %cst_13 = arith.constant dense<0.000000e+00> : vector<66x256xf32>
    %12 = tpu.matmul %9, %11, %cst_13 {dimension_numbers = #tpu.dot_dimension_numbers<[1], [0], [0], [1], [0, 0, 1, 1], [], []>} : vector<66x128xf32>, vector<128x256xf32>, vector<66x256xf32> -> vector<66x256xf32>
    %13 = arith.addf %8, %12 : vector<66x256xf32>
    %c0_14 = arith.constant 0 : index
    %c0_15 = arith.constant 0 : index
    %14 = vector.load %arg2[%c0_14, %c0_15] : memref<32x66xf32, #tpu.memory_space<vmem>>, vector<32x66xf32>
    %cst_16 = arith.constant dense<0.000000e+00> : vector<32x256xf32>
    %15 = tpu.matmul %14, %13, %cst_16 {dimension_numbers = #tpu.dot_dimension_numbers<[1], [0], [0], [1], [0, 0, 1, 1], [], []>} : vector<32x66xf32>, vector<66x256xf32>, vector<32x256xf32> -> vector<32x256xf32>
    %cst_17 = arith.constant dense<0.000000e+00> : vector<256xf32>
    %16 = vector.multi_reduction <add>, %15, %cst_17 [0] : vector<32x256xf32> to vector<256xf32>
    %17 = vector.shape_cast %16 : vector<256xf32> to vector<1x256xf32>
    %c0_18 = arith.constant 0 : index
    %c0_19 = arith.constant 0 : index
    %18 = vector.load %arg3[%c0_18, %c0_19] : memref<256x16xf32, #tpu.memory_space<vmem>>, vector<256x16xf32>
    %cst_20 = arith.constant dense<0.000000e+00> : vector<1x16xf32>
    %19 = tpu.matmul %17, %18, %cst_20 {dimension_numbers = #tpu.dot_dimension_numbers<[1], [0], [0], [1], [0, 0, 1, 1], [], []>} : vector<1x256xf32>, vector<256x16xf32>, vector<1x16xf32> -> vector<1x16xf32>
    %cst_21 = arith.constant 0.001953125 : f32
    %20 = vector.broadcast %cst_21 : f32 to vector<1x16xf32>
    %21 = arith.mulf %19, %20 : vector<1x16xf32>
    %c0_22 = arith.constant 0 : index
    %c0_23 = arith.constant 0 : index
    %22 = vector.load %arg4[%c0_22, %c0_23] : memref<16x256xf32, #tpu.memory_space<vmem>>, vector<16x256xf32>
    %cst_24 = arith.constant dense<0.000000e+00> : vector<1x256xf32>
    %23 = tpu.matmul %21, %22, %cst_24 {dimension_numbers = #tpu.dot_dimension_numbers<[1], [0], [0], [1], [0, 0, 1, 1], [], []>} : vector<1x16xf32>, vector<16x256xf32>, vector<1x256xf32> -> vector<1x256xf32>
    %24 = vector.broadcast %23 : vector<1x256xf32> to vector<32x256xf32>
    %25 = arith.subf %15, %24 : vector<32x256xf32>
    %26 = arith.mulf %25, %25 : vector<32x256xf32>
    %cst_25 = arith.constant dense<0.000000e+00> : vector<256xf32>
    %27 = vector.multi_reduction <add>, %26, %cst_25 [0] : vector<32x256xf32> to vector<256xf32>
    %28 = vector.shape_cast %27 : vector<256xf32> to vector<1x256xf32>
    %c0_26 = arith.constant 0 : index
    %c0_27 = arith.constant 0 : index
    %29 = vector.load %arg3[%c0_26, %c0_27] : memref<256x16xf32, #tpu.memory_space<vmem>>, vector<256x16xf32>
    %cst_28 = arith.constant dense<0.000000e+00> : vector<1x16xf32>
    %30 = tpu.matmul %28, %29, %cst_28 {dimension_numbers = #tpu.dot_dimension_numbers<[1], [0], [0], [1], [0, 0, 1, 1], [], []>} : vector<1x256xf32>, vector<256x16xf32>, vector<1x16xf32> -> vector<1x16xf32>
    %cst_29 = arith.constant 0.001953125 : f32
    %31 = vector.broadcast %cst_29 : f32 to vector<1x16xf32>
    %32 = arith.mulf %30, %31 : vector<1x16xf32>
    %c0_30 = arith.constant 0 : index
    %c0_31 = arith.constant 0 : index
    %33 = vector.load %arg4[%c0_30, %c0_31] : memref<16x256xf32, #tpu.memory_space<vmem>>, vector<16x256xf32>
    %cst_32 = arith.constant dense<0.000000e+00> : vector<1x256xf32>
    %34 = tpu.matmul %32, %33, %cst_32 {dimension_numbers = #tpu.dot_dimension_numbers<[1], [0], [0], [1], [0, 0, 1, 1], [], []>} : vector<1x16xf32>, vector<16x256xf32>, vector<1x256xf32> -> vector<1x256xf32>
    %cst_33 = arith.constant 9.99999974E-6 : f32
    %35 = vector.broadcast %cst_33 : f32 to vector<1x256xf32>
    %36 = arith.addf %34, %35 : vector<1x256xf32>
    %37 = math.rsqrt %36 : vector<1x256xf32>
    %38 = vector.broadcast %37 : vector<1x256xf32> to vector<32x256xf32>
    %39 = arith.mulf %25, %38 : vector<32x256xf32>
    %c0_34 = arith.constant 0 : index
    %c0_35 = arith.constant 0 : index
    %40 = vector.load %arg5[%c0_34, %c0_35] : memref<1x256xf32, #tpu.memory_space<vmem>>, vector<1x256xf32>
    %41 = vector.broadcast %40 : vector<1x256xf32> to vector<32x256xf32>
    %42 = arith.mulf %39, %41 : vector<32x256xf32>
    %c0_36 = arith.constant 0 : index
    %c0_37 = arith.constant 0 : index
    %43 = vector.load %arg6[%c0_36, %c0_37] : memref<1x256xf32, #tpu.memory_space<vmem>>, vector<1x256xf32>
    %44 = vector.broadcast %43 : vector<1x256xf32> to vector<32x256xf32>
    %45 = arith.addf %42, %44 : vector<32x256xf32>
    %cst_38 = arith.constant 2.000000e-01 : f32
    %46 = vector.broadcast %cst_38 : f32 to vector<32x256xf32>
    %47 = arith.mulf %46, %45 : vector<32x256xf32>
    %48 = arith.maximumf %45, %47 : vector<32x256xf32>
    %cst_39 = arith.constant 0.000000e+00 : f32
    %49 = vector.broadcast %cst_39 : f32 to vector<36x256xf32>
    %c0_40 = arith.constant 0 : index
    %c0_41 = arith.constant 0 : index
    %50 = vector.load %arg24[%c0_40, %c0_41] : memref<36x256xf32, #tpu.memory_space<vmem>>, vector<36x256xf32>
    tpu.vector_store %arg24[%c0_40, %c0_41], %49 {strides = array<i32>} : memref<36x256xf32, #tpu.memory_space<vmem>>, vector<36x256xf32>,
    %51 = vector.extract_strided_slice %48 {offsets = [0, 0], sizes = [16, 256], strides = [1, 1]} : vector<32x256xf32> to vector<16x256xf32>
    %c1_42 = arith.constant 1 : index
    %c0_43 = arith.constant 0 : index
    %52 = vector.load %arg24[%c1_42, %c0_43] : memref<36x256xf32, #tpu.memory_space<vmem>>, vector<16x256xf32>
    tpu.vector_store %arg24[%c1_42, %c0_43], %51 {strides = array<i32>} : memref<36x256xf32, #tpu.memory_space<vmem>>, vector<16x256xf32>,
    %53 = vector.extract_strided_slice %48 {offsets = [16, 0], sizes = [16, 256], strides = [1, 1]} : vector<32x256xf32> to vector<16x256xf32>
    %c19 = arith.constant 19 : index
    %c0_44 = arith.constant 0 : index
    %54 = vector.load %arg24[%c19, %c0_44] : memref<36x256xf32, #tpu.memory_space<vmem>>, vector<16x256xf32>
    tpu.vector_store %arg24[%c19, %c0_44], %53 {strides = array<i32>} : memref<36x256xf32, #tpu.memory_space<vmem>>, vector<16x256xf32>,
    %c0_45 = arith.constant 0 : index
    %c0_46 = arith.constant 0 : index
    %55 = vector.load %arg24[%c0_45, %c0_46] : memref<36x256xf32, #tpu.memory_space<vmem>>, vector<34x256xf32>
    %c0_47 = arith.constant 0 : index
    %c0_48 = arith.constant 0 : index
    %c0_49 = arith.constant 0 : index
    %56 = vector.load %arg7[%c0_47, %c0_48, %c0_49] : memref<3x256x256xf32, #tpu.memory_space<vmem>>, vector<1x256x256xf32>
    %57 = vector.shape_cast %56 : vector<1x256x256xf32> to vector<256x256xf32>
    %cst_50 = arith.constant dense<0.000000e+00> : vector<34x256xf32>
    %58 = tpu.matmul %55, %57, %cst_50 {dimension_numbers = #tpu.dot_dimension_numbers<[1], [0], [0], [1], [0, 0, 1, 1], [], []>} : vector<34x256xf32>, vector<256x256xf32>, vector<34x256xf32> -> vector<34x256xf32>
    %c1_51 = arith.constant 1 : index
    %c0_52 = arith.constant 0 : index
    %59 = vector.load %arg24[%c1_51, %c0_52] : memref<36x256xf32, #tpu.memory_space<vmem>>, vector<34x256xf32>
    %c1_53 = arith.constant 1 : index
    %c0_54 = arith.constant 0 : index
    %c0_55 = arith.constant 0 : index
    %60 = vector.load %arg7[%c1_53, %c0_54, %c0_55] : memref<3x256x256xf32, #tpu.memory_space<vmem>>, vector<1x256x256xf32>
    %61 = vector.shape_cast %60 : vector<1x256x256xf32> to vector<256x256xf32>
    %cst_56 = arith.constant dense<0.000000e+00> : vector<34x256xf32>
    %62 = tpu.matmul %59, %61, %cst_56 {dimension_numbers = #tpu.dot_dimension_numbers<[1], [0], [0], [1], [0, 0, 1, 1], [], []>} : vector<34x256xf32>, vector<256x256xf32>, vector<34x256xf32> -> vector<34x256xf32>
    %63 = arith.addf %58, %62 : vector<34x256xf32>
    %c2_57 = arith.constant 2 : index
    %c0_58 = arith.constant 0 : index
    %64 = vector.load %arg24[%c2_57, %c0_58] : memref<36x256xf32, #tpu.memory_space<vmem>>, vector<34x256xf32>
    %c2_59 = arith.constant 2 : index
    %c0_60 = arith.constant 0 : index
    %c0_61 = arith.constant 0 : index
    %65 = vector.load %arg7[%c2_59, %c0_60, %c0_61] : memref<3x256x256xf32, #tpu.memory_space<vmem>>, vector<1x256x256xf32>
    %66 = vector.shape_cast %65 : vector<1x256x256xf32> to vector<256x256xf32>
    %cst_62 = arith.constant dense<0.000000e+00> : vector<34x256xf32>
    %67 = tpu.matmul %64, %66, %cst_62 {dimension_numbers = #tpu.dot_dimension_numbers<[1], [0], [0], [1], [0, 0, 1, 1], [], []>} : vector<34x256xf32>, vector<256x256xf32>, vector<34x256xf32> -> vector<34x256xf32>
    %68 = arith.addf %63, %67 : vector<34x256xf32>
    %c0_63 = arith.constant 0 : index
    %c0_64 = arith.constant 0 : index
    %69 = vector.load %arg8[%c0_63, %c0_64] : memref<16x34xf32, #tpu.memory_space<vmem>>, vector<16x34xf32>
    %cst_65 = arith.constant dense<0.000000e+00> : vector<16x256xf32>
    %70 = tpu.matmul %69, %68, %cst_65 {dimension_numbers = #tpu.dot_dimension_numbers<[1], [0], [0], [1], [0, 0, 1, 1], [], []>} : vector<16x34xf32>, vector<34x256xf32>, vector<16x256xf32> -> vector<16x256xf32>
    %cst_66 = arith.constant dense<0.000000e+00> : vector<256xf32>
    %71 = vector.multi_reduction <add>, %70, %cst_66 [0] : vector<16x256xf32> to vector<256xf32>
    %72 = vector.shape_cast %71 : vector<256xf32> to vector<1x256xf32>
    %c0_67 = arith.constant 0 : index
    %c0_68 = arith.constant 0 : index
    %73 = vector.load %arg9[%c0_67, %c0_68] : memref<256x32xf32, #tpu.memory_space<vmem>>, vector<256x32xf32>
    %cst_69 = arith.constant dense<0.000000e+00> : vector<1x32xf32>
    %74 = tpu.matmul %72, %73, %cst_69 {dimension_numbers = #tpu.dot_dimension_numbers<[1], [0], [0], [1], [0, 0, 1, 1], [], []>} : vector<1x256xf32>, vector<256x32xf32>, vector<1x32xf32> -> vector<1x32xf32>
    %cst_70 = arith.constant 7.812500e-03 : f32
    %75 = vector.broadcast %cst_70 : f32 to vector<1x32xf32>
    %76 = arith.mulf %74, %75 : vector<1x32xf32>
    %c0_71 = arith.constant 0 : index
    %c0_72 = arith.constant 0 : index
    %77 = vector.load %arg10[%c0_71, %c0_72] : memref<32x256xf32, #tpu.memory_space<vmem>>, vector<32x256xf32>
    %cst_73 = arith.constant dense<0.000000e+00> : vector<1x256xf32>
    %78 = tpu.matmul %76, %77, %cst_73 {dimension_numbers = #tpu.dot_dimension_numbers<[1], [0], [0], [1], [0, 0, 1, 1], [], []>} : vector<1x32xf32>, vector<32x256xf32>, vector<1x256xf32> -> vector<1x256xf32>
    %79 = vector.broadcast %78 : vector<1x256xf32> to vector<16x256xf32>
    %80 = arith.subf %70, %79 : vector<16x256xf32>
    %81 = arith.mulf %80, %80 : vector<16x256xf32>
    %cst_74 = arith.constant dense<0.000000e+00> : vector<256xf32>
    %82 = vector.multi_reduction <add>, %81, %cst_74 [0] : vector<16x256xf32> to vector<256xf32>
    %83 = vector.shape_cast %82 : vector<256xf32> to vector<1x256xf32>
    %c0_75 = arith.constant 0 : index
    %c0_76 = arith.constant 0 : index
    %84 = vector.load %arg9[%c0_75, %c0_76] : memref<256x32xf32, #tpu.memory_space<vmem>>, vector<256x32xf32>
    %cst_77 = arith.constant dense<0.000000e+00> : vector<1x32xf32>
    %85 = tpu.matmul %83, %84, %cst_77 {dimension_numbers = #tpu.dot_dimension_numbers<[1], [0], [0], [1], [0, 0, 1, 1], [], []>} : vector<1x256xf32>, vector<256x32xf32>, vector<1x32xf32> -> vector<1x32xf32>
    %cst_78 = arith.constant 7.812500e-03 : f32
    %86 = vector.broadcast %cst_78 : f32 to vector<1x32xf32>
    %87 = arith.mulf %85, %86 : vector<1x32xf32>
    %c0_79 = arith.constant 0 : index
    %c0_80 = arith.constant 0 : index
    %88 = vector.load %arg10[%c0_79, %c0_80] : memref<32x256xf32, #tpu.memory_space<vmem>>, vector<32x256xf32>
    %cst_81 = arith.constant dense<0.000000e+00> : vector<1x256xf32>
    %89 = tpu.matmul %87, %88, %cst_81 {dimension_numbers = #tpu.dot_dimension_numbers<[1], [0], [0], [1], [0, 0, 1, 1], [], []>} : vector<1x32xf32>, vector<32x256xf32>, vector<1x256xf32> -> vector<1x256xf32>
    %cst_82 = arith.constant 9.99999974E-6 : f32
    %90 = vector.broadcast %cst_82 : f32 to vector<1x256xf32>
    %91 = arith.addf %89, %90 : vector<1x256xf32>
    %92 = math.rsqrt %91 : vector<1x256xf32>
    %93 = vector.broadcast %92 : vector<1x256xf32> to vector<16x256xf32>
    %94 = arith.mulf %80, %93 : vector<16x256xf32>
    %c0_83 = arith.constant 0 : index
    %c0_84 = arith.constant 0 : index
    %95 = vector.load %arg11[%c0_83, %c0_84] : memref<1x256xf32, #tpu.memory_space<vmem>>, vector<1x256xf32>
    %96 = vector.broadcast %95 : vector<1x256xf32> to vector<16x256xf32>
    %97 = arith.mulf %94, %96 : vector<16x256xf32>
    %c0_85 = arith.constant 0 : index
    %c0_86 = arith.constant 0 : index
    %98 = vector.load %arg12[%c0_85, %c0_86] : memref<1x256xf32, #tpu.memory_space<vmem>>, vector<1x256xf32>
    %99 = vector.broadcast %98 : vector<1x256xf32> to vector<16x256xf32>
    %100 = arith.addf %97, %99 : vector<16x256xf32>
    %cst_87 = arith.constant 2.000000e-01 : f32
    %101 = vector.broadcast %cst_87 : f32 to vector<16x256xf32>
    %102 = arith.mulf %101, %100 : vector<16x256xf32>
    %103 = arith.maximumf %100, %102 : vector<16x256xf32>
    %cst_88 = arith.constant 0.000000e+00 : f32
    %104 = vector.broadcast %cst_88 : f32 to vector<20x256xf32>
    %c0_89 = arith.constant 0 : index
    %c0_90 = arith.constant 0 : index
    %105 = vector.load %arg25[%c0_89, %c0_90] : memref<20x256xf32, #tpu.memory_space<vmem>>, vector<20x256xf32>
    tpu.vector_store %arg25[%c0_89, %c0_90], %104 {strides = array<i32>} : memref<20x256xf32, #tpu.memory_space<vmem>>, vector<20x256xf32>,
    %106 = vector.extract_strided_slice %103 {offsets = [0, 0], sizes = [8, 256], strides = [1, 1]} : vector<16x256xf32> to vector<8x256xf32>
    %c1_91 = arith.constant 1 : index
    %c0_92 = arith.constant 0 : index
    %107 = vector.load %arg25[%c1_91, %c0_92] : memref<20x256xf32, #tpu.memory_space<vmem>>, vector<8x256xf32>
    tpu.vector_store %arg25[%c1_91, %c0_92], %106 {strides = array<i32>} : memref<20x256xf32, #tpu.memory_space<vmem>>, vector<8x256xf32>,
    %108 = vector.extract_strided_slice %103 {offsets = [8, 0], sizes = [8, 256], strides = [1, 1]} : vector<16x256xf32> to vector<8x256xf32>
    %c11 = arith.constant 11 : index
    %c0_93 = arith.constant 0 : index
    %109 = vector.load %arg25[%c11, %c0_93] : memref<20x256xf32, #tpu.memory_space<vmem>>, vector<8x256xf32>
    tpu.vector_store %arg25[%c11, %c0_93], %108 {strides = array<i32>} : memref<20x256xf32, #tpu.memory_space<vmem>>, vector<8x256xf32>,
    %c0_94 = arith.constant 0 : index
    %c0_95 = arith.constant 0 : index
    %110 = vector.load %arg25[%c0_94, %c0_95] : memref<20x256xf32, #tpu.memory_space<vmem>>, vector<18x256xf32>
    %c0_96 = arith.constant 0 : index
    %c0_97 = arith.constant 0 : index
    %c0_98 = arith.constant 0 : index
    %111 = vector.load %arg13[%c0_96, %c0_97, %c0_98] : memref<3x256x256xf32, #tpu.memory_space<vmem>>, vector<1x256x256xf32>
    %112 = vector.shape_cast %111 : vector<1x256x256xf32> to vector<256x256xf32>
    %cst_99 = arith.constant dense<0.000000e+00> : vector<18x256xf32>
    %113 = tpu.matmul %110, %112, %cst_99 {dimension_numbers = #tpu.dot_dimension_numbers<[1], [0], [0], [1], [0, 0, 1, 1], [], []>} : vector<18x256xf32>, vector<256x256xf32>, vector<18x256xf32> -> vector<18x256xf32>
    %c1_100 = arith.constant 1 : index
    %c0_101 = arith.constant 0 : index
    %114 = vector.load %arg25[%c1_100, %c0_101] : memref<20x256xf32, #tpu.memory_space<vmem>>, vector<18x256xf32>
    %c1_102 = arith.constant 1 : index
    %c0_103 = arith.constant 0 : index
    %c0_104 = arith.constant 0 : index
    %115 = vector.load %arg13[%c1_102, %c0_103, %c0_104] : memref<3x256x256xf32, #tpu.memory_space<vmem>>, vector<1x256x256xf32>
    %116 = vector.shape_cast %115 : vector<1x256x256xf32> to vector<256x256xf32>
    %cst_105 = arith.constant dense<0.000000e+00> : vector<18x256xf32>
    %117 = tpu.matmul %114, %116, %cst_105 {dimension_numbers = #tpu.dot_dimension_numbers<[1], [0], [0], [1], [0, 0, 1, 1], [], []>} : vector<18x256xf32>, vector<256x256xf32>, vector<18x256xf32> -> vector<18x256xf32>
    %118 = arith.addf %113, %117 : vector<18x256xf32>
    %c2_106 = arith.constant 2 : index
    %c0_107 = arith.constant 0 : index
    %119 = vector.load %arg25[%c2_106, %c0_107] : memref<20x256xf32, #tpu.memory_space<vmem>>, vector<18x256xf32>
    %c2_108 = arith.constant 2 : index
    %c0_109 = arith.constant 0 : index
    %c0_110 = arith.constant 0 : index
    %120 = vector.load %arg13[%c2_108, %c0_109, %c0_110] : memref<3x256x256xf32, #tpu.memory_space<vmem>>, vector<1x256x256xf32>
    %121 = vector.shape_cast %120 : vector<1x256x256xf32> to vector<256x256xf32>
    %cst_111 = arith.constant dense<0.000000e+00> : vector<18x256xf32>
    %122 = tpu.matmul %119, %121, %cst_111 {dimension_numbers = #tpu.dot_dimension_numbers<[1], [0], [0], [1], [0, 0, 1, 1], [], []>} : vector<18x256xf32>, vector<256x256xf32>, vector<18x256xf32> -> vector<18x256xf32>
    %123 = arith.addf %118, %122 : vector<18x256xf32>
    %c0_112 = arith.constant 0 : index
    %c0_113 = arith.constant 0 : index
    %124 = vector.load %arg14[%c0_112, %c0_113] : memref<8x18xf32, #tpu.memory_space<vmem>>, vector<8x18xf32>
    %cst_114 = arith.constant dense<0.000000e+00> : vector<8x256xf32>
    %125 = tpu.matmul %124, %123, %cst_114 {dimension_numbers = #tpu.dot_dimension_numbers<[1], [0], [0], [1], [0, 0, 1, 1], [], []>} : vector<8x18xf32>, vector<18x256xf32>, vector<8x256xf32> -> vector<8x256xf32>
    %cst_115 = arith.constant dense<0.000000e+00> : vector<256xf32>
    %126 = vector.multi_reduction <add>, %125, %cst_115 [0] : vector<8x256xf32> to vector<256xf32>
    %127 = vector.shape_cast %126 : vector<256xf32> to vector<1x256xf32>
    %c0_116 = arith.constant 0 : index
    %c0_117 = arith.constant 0 : index
    %128 = vector.load %arg15[%c0_116, %c0_117] : memref<256x64xf32, #tpu.memory_space<vmem>>, vector<256x64xf32>
    %cst_118 = arith.constant dense<0.000000e+00> : vector<1x64xf32>
    %129 = tpu.matmul %127, %128, %cst_118 {dimension_numbers = #tpu.dot_dimension_numbers<[1], [0], [0], [1], [0, 0, 1, 1], [], []>} : vector<1x256xf32>, vector<256x64xf32>, vector<1x64xf32> -> vector<1x64xf32>
    %cst_119 = arith.constant 3.125000e-02 : f32
    %130 = vector.broadcast %cst_119 : f32 to vector<1x64xf32>
    %131 = arith.mulf %129, %130 : vector<1x64xf32>
    %c0_120 = arith.constant 0 : index
    %c0_121 = arith.constant 0 : index
    %132 = vector.load %arg16[%c0_120, %c0_121] : memref<64x256xf32, #tpu.memory_space<vmem>>, vector<64x256xf32>
    %cst_122 = arith.constant dense<0.000000e+00> : vector<1x256xf32>
    %133 = tpu.matmul %131, %132, %cst_122 {dimension_numbers = #tpu.dot_dimension_numbers<[1], [0], [0], [1], [0, 0, 1, 1], [], []>} : vector<1x64xf32>, vector<64x256xf32>, vector<1x256xf32> -> vector<1x256xf32>
    %134 = vector.broadcast %133 : vector<1x256xf32> to vector<8x256xf32>
    %135 = arith.subf %125, %134 : vector<8x256xf32>
    %136 = arith.mulf %135, %135 : vector<8x256xf32>
    %cst_123 = arith.constant dense<0.000000e+00> : vector<256xf32>
    %137 = vector.multi_reduction <add>, %136, %cst_123 [0] : vector<8x256xf32> to vector<256xf32>
    %138 = vector.shape_cast %137 : vector<256xf32> to vector<1x256xf32>
    %c0_124 = arith.constant 0 : index
    %c0_125 = arith.constant 0 : index
    %139 = vector.load %arg15[%c0_124, %c0_125] : memref<256x64xf32, #tpu.memory_space<vmem>>, vector<256x64xf32>
    %cst_126 = arith.constant dense<0.000000e+00> : vector<1x64xf32>
    %140 = tpu.matmul %138, %139, %cst_126 {dimension_numbers = #tpu.dot_dimension_numbers<[1], [0], [0], [1], [0, 0, 1, 1], [], []>} : vector<1x256xf32>, vector<256x64xf32>, vector<1x64xf32> -> vector<1x64xf32>
    %cst_127 = arith.constant 3.125000e-02 : f32
    %141 = vector.broadcast %cst_127 : f32 to vector<1x64xf32>
    %142 = arith.mulf %140, %141 : vector<1x64xf32>
    %c0_128 = arith.constant 0 : index
    %c0_129 = arith.constant 0 : index
    %143 = vector.load %arg16[%c0_128, %c0_129] : memref<64x256xf32, #tpu.memory_space<vmem>>, vector<64x256xf32>
    %cst_130 = arith.constant dense<0.000000e+00> : vector<1x256xf32>
    %144 = tpu.matmul %142, %143, %cst_130 {dimension_numbers = #tpu.dot_dimension_numbers<[1], [0], [0], [1], [0, 0, 1, 1], [], []>} : vector<1x64xf32>, vector<64x256xf32>, vector<1x256xf32> -> vector<1x256xf32>
    %cst_131 = arith.constant 9.99999974E-6 : f32
    %145 = vector.broadcast %cst_131 : f32 to vector<1x256xf32>
    %146 = arith.addf %144, %145 : vector<1x256xf32>
    %147 = math.rsqrt %146 : vector<1x256xf32>
    %148 = vector.broadcast %147 : vector<1x256xf32> to vector<8x256xf32>
    %149 = arith.mulf %135, %148 : vector<8x256xf32>
    %c0_132 = arith.constant 0 : index
    %c0_133 = arith.constant 0 : index
    %150 = vector.load %arg17[%c0_132, %c0_133] : memref<1x256xf32, #tpu.memory_space<vmem>>, vector<1x256xf32>
    %151 = vector.broadcast %150 : vector<1x256xf32> to vector<8x256xf32>
    %152 = arith.mulf %149, %151 : vector<8x256xf32>
    %c0_134 = arith.constant 0 : index
    %c0_135 = arith.constant 0 : index
    %153 = vector.load %arg18[%c0_134, %c0_135] : memref<1x256xf32, #tpu.memory_space<vmem>>, vector<1x256xf32>
    %154 = vector.broadcast %153 : vector<1x256xf32> to vector<8x256xf32>
    %155 = arith.addf %152, %154 : vector<8x256xf32>
    %cst_136 = arith.constant 2.000000e-01 : f32
    %156 = vector.broadcast %cst_136 : f32 to vector<8x256xf32>
    %157 = arith.mulf %156, %155 : vector<8x256xf32>
    %158 = arith.maximumf %155, %157 : vector<8x256xf32>
    %c0_137 = arith.constant 0 : index
    %c0_138 = arith.constant 0 : index
    %159 = vector.load %arg19[%c0_137, %c0_138] : memref<256x4xf32, #tpu.memory_space<vmem>>, vector<256x4xf32>
    %cst_139 = arith.constant dense<0.000000e+00> : vector<8x4xf32>
    %160 = tpu.matmul %158, %159, %cst_139 {dimension_numbers = #tpu.dot_dimension_numbers<[1], [0], [0], [1], [0, 0, 1, 1], [], []>} : vector<8x256xf32>, vector<256x4xf32>, vector<8x4xf32> -> vector<8x4xf32>
    %c0_140 = arith.constant 0 : index
    %c0_141 = arith.constant 0 : index
    %161 = vector.load %arg20[%c0_140, %c0_141] : memref<8x4xf32, #tpu.memory_space<vmem>>, vector<8x4xf32>
    %162 = arith.mulf %160, %161 : vector<8x4xf32>
    %cst_142 = arith.constant dense<0.000000e+00> : vector<8xf32>
    %163 = vector.multi_reduction <add>, %162, %cst_142 [1] : vector<8x4xf32> to vector<8xf32>
    %164 = vector.shape_cast %163 : vector<8xf32> to vector<8x1xf32>
    %c0_143 = arith.constant 0 : index
    %c0_144 = arith.constant 0 : index
    %165 = vector.load %arg21[%c0_143, %c0_144] : memref<2x8xf32, #tpu.memory_space<vmem>>, vector<2x8xf32>
    %cst_145 = arith.constant dense<0.000000e+00> : vector<2x1xf32>
    %166 = tpu.matmul %165, %164, %cst_145 {dimension_numbers = #tpu.dot_dimension_numbers<[1], [0], [0], [1], [0, 0, 1, 1], [], []>} : vector<2x8xf32>, vector<8x1xf32>, vector<2x1xf32> -> vector<2x1xf32>
    %c0_146 = arith.constant 0 : index
    %c0_147 = arith.constant 0 : index
    %167 = vector.load %arg22[%c0_146, %c0_147] : memref<1x1xf32, #tpu.memory_space<vmem>>, vector<1x1xf32>
    %168 = vector.broadcast %167 : vector<1x1xf32> to vector<2x1xf32>
    %169 = arith.addf %166, %168 : vector<2x1xf32>
    %170 = math.absf %169 : vector<2x1xf32>
    %cst_148 = arith.constant 0.000000e+00 : f32
    %171 = vector.broadcast %cst_148 : f32 to vector<2x1xf32>
    %172 = arith.subf %171, %170 : vector<2x1xf32>
    %173 = math.exp %172 : vector<2x1xf32>
    %cst_149 = arith.constant 0.000000e+00 : f32
    %174 = vector.broadcast %cst_149 : f32 to vector<2x1xf32>
    %175 = arith.cmpf oge, %169, %174 : vector<2x1xf32>
    %cst_150 = arith.constant 1.000000e+00 : f32
    %176 = vector.broadcast %cst_150 : f32 to vector<2x1xf32>
    %177 = arith.addf %176, %173 : vector<2x1xf32>
    %cst_151 = arith.constant 1.000000e+00 : f32
    %178 = vector.broadcast %cst_151 : f32 to vector<2x1xf32>
    %179 = arith.divf %178, %177 : vector<2x1xf32>
    %cst_152 = arith.constant 1.000000e+00 : f32
    %180 = vector.broadcast %cst_152 : f32 to vector<2x1xf32>
    %181 = arith.addf %180, %173 : vector<2x1xf32>
    %182 = arith.divf %173, %181 : vector<2x1xf32>
    %183 = arith.select %175, %179, %182 : vector<2x1xi1>, vector<2x1xf32>
    %c0_153 = arith.constant 0 : index
    %c0_154 = arith.constant 0 : index
    %184 = vector.load %arg23[%c0_153, %c0_154] : memref<2x1xf32, #tpu.memory_space<vmem>>, vector<2x1xf32>
    tpu.vector_store %arg23[%c0_153, %c0_154], %183 {strides = array<i32>} : memref<2x1xf32, #tpu.memory_space<vmem>>, vector<2x1xf32>,
    return
  }
}

</mosaic_0001>

<bundles_post_ra>
// kernel: discriminator_forward.1
= control target key start
LH: loop header
LB: loop body
LE: loop exit
PB: predicated region body
PF: predicated region fallthrough
CT: control target
= control target key end

     0   :  { %s5847_s0 = inlined_call_operand.vmem [shape: f32[68,128], index: 0, kind: input, shape index: {}]   ;;  %s5848_s1 = inlined_call_operand.hbm [shape: f32[3,128,256], index: 1, kind: input, shape index: {}]   ;;  %s5849_s2 = inlined_call_operand.vmem [shape: f32[32,66], index: 2, kind: input, shape index: {}]   ;;  %s5850_s3 = inlined_call_operand.vmem [shape: f32[256,16], index: 3, kind: input, shape index: {}]   ;;  %s5851_s4 = inlined_call_operand.vmem [shape: f32[16,256], index: 4, kind: input, shape index: {}]   ;;  %s5852_s5 = inlined_call_operand.vmem [shape: f32[1,256], index: 5, kind: input, shape index: {}]   ;;  %s5853_s6 = inlined_call_operand.vmem [shape: f32[1,256], index: 6, kind: input, shape index: {}]   ;;  %s5854_s7 = inlined_call_operand.vmem [shape: f32[3,256,256], index: 7, kind: input, shape index: {}]   ;;  %s5855_s8 = inlined_call_operand.vmem [shape: f32[16,34], index: 8, kind: input, shape index: {}]   ;;  %s5856_s9 = inlined_call_operand.vmem [shape: f32[256,32], index: 9, kind: input, shape index: {}]   ;;  %s5857_s10 = inlined_call_operand.vmem [shape: f32[32,256], index: 10, kind: input, shape index: {}]   ;;  %s5858_s11 = inlined_call_operand.vmem [shape: f32[1,256], index: 11, kind: input, shape index: {}]   ;;  %s5859_s12 = inlined_call_operand.vmem [shape: f32[1,256], index: 12, kind: input, shape index: {}]   ;;  %s5860_s13 = inlined_call_operand.hbm [shape: f32[3,256,256], index: 13, kind: input, shape index: {}]   ;;  %s5861_s14 = inlined_call_operand.vmem [shape: f32[8,18], index: 14, kind: input, shape index: {}]   ;;  %s5862_s15 = inlined_call_operand.vmem [shape: f32[256,64], index: 15, kind: input, shape index: {}]   ;;  %s5863_s16 = inlined_call_operand.vmem [shape: f32[64,256], index: 16, kind: input, shape index: {}]   ;;  %s5864_s17 = inlined_call_operand.vmem [shape: f32[1,256], index: 17, kind: input, shape index: {}]   ;;  %s5865_s18 = inlined_call_operand.vmem [shape: f32[1,256], index: 18, kind: input, shape index: {}]   ;;  %s5866_s19 = inlined_call_operand.vmem [shape: f32[256,4], index: 19, kind: input, shape index: {}]   ;;  %s5867_s20 = inlined_call_operand.vmem [shape: f32[8,4], index: 20, kind: input, shape index: {}]   ;;  %s5868_s21 = inlined_call_operand.vmem [shape: f32[2,8], index: 21, kind: input, shape index: {}]   ;;  %s5869_s22 = inlined_call_operand.<no memory space> [shape: f32[1,1], index: 22, kind: input, shape index: {}]   ;;  %s5870_s23 = inlined_call_operand.vmem [shape: f32[2,1], index: 23, kind: output, shape index: {}]  }
   0x1   :  { %5880 = sst [smem:[#allocation16_spill]] %s5847_s0  ;;  %v28_v0 = vstv %s5869_s22 }
   0x2   :  { %5881 = sst [smem:[#allocation17_spill]] %s5848_s1  ;;  %29 = vst [vmem:[#allocation4] sm:$0x1] %v28_v0 }
   0x3   :  { %5882 = sst [smem:[#allocation18_spill]] %s5849_s2 }
   0x4   :  { %5883 = sst [smem:[#allocation19_spill]] %s5850_s3 }
   0x5   :  { %5884 = sst [smem:[#allocation20_spill]] %s5851_s4 }
   0x6   :  { %5885 = sst [smem:[#allocation21_spill]] %s5852_s5 }
   0x7   :  { %5886 = sst [smem:[#allocation22_spill]] %s5853_s6 }
   0x8   :  { %5887 = sst [smem:[#allocation23_spill]] %s5854_s7 }
   0x9   :  { %30 = vsyncpa [#allocation6], 0 }
   0xa   :  { %31 = vsyncpa [#allocation8], 0  ;;  %s4043_s24 = smov [#allocation5]  }
   0xb   :  { %s39_s25 = sshll.u32 %s4043_s24, 4  ;;  %s40_s25 = int_to_ptr.vmem [resolvable:$true] %s39_s25 }
   0xc   :  { %s4007_s5 = scalar_lea.vmem %s40_s25, 12288  ;;  %p4012_p1 = scmp.lt.s32.totalorder %s40_s25, %s40_s25 }
   0xd   :  { %p4008_p0 = scmp.ne.s32.totalorder %s40_s25, %s4007_s5  ;;  %p4013_p2 = scmp.lt.s32.totalorder %s4007_s5, %s4007_s5 }
   0xf   :  { %p4014_p3 = por %p4013_p2, %p4012_p1 }
  0x11   :  { %p4015_p4 = pnand %p4014_p3, %p4008_p0 }
  0x13   :  { %4018 = shalt.err (!%p4015_p4)
}
  0x14   :  { %s4044_s1 = smov 256   ;;  %s4045_s26 = smov 16  }
  0x15   :  { %s5888_s27 = sld [smem:[#allocation17_spill]]  ;;  %s4046_s22 = smov [#allocation7]  }
  0x16   :  { %s73_s7 = sshll.u32 %s4046_s22, 4  ;;  %s74_s7 = int_to_ptr.vmem [resolvable:$true] %s73_s7 }
  0x17   :  { %s4027_s28 = scalar_lea.vmem %s74_s7, 24576  ;;  %p4032_p6 = scmp.lt.s32.totalorder %s74_s7, %s74_s7 }
  0x18   :  { %p4028_p5 = scmp.ne.s32.totalorder %s74_s7, %s4027_s28  ;;  %p4033_p7 = scmp.lt.s32.totalorder %s4027_s28, %s4027_s28 }
  0x1a   :  { %p4034_p8 = por %p4033_p7, %p4032_p6 }
  0x1b   :  { %45 = dma.hbm_to_vmem [thread:$0]  %s5888_s27, 12288, %s40_s25, [#allocation6], %s4044_s1, %s4044_s1, %s4045_s26  }
  0x1c   :  { %p4035_p9 = pnand %p4034_p8, %p4028_p5 }
  0x1e   :  { %4038 = shalt.err (!%p4035_p9)
}
  0x1f   :  { %79 = dma.hbm_to_vmem [thread:$0]  %s5860_s13, 24576, %s74_s7, [#allocation8], %s4044_s1, %s4044_s1, %s4045_s26  }
  0x20   :  { %4039 = dma.done.wait [#allocation6], 12288  }
  0x21   :  { %4040 = vsyncadd [#allocation6], 4294955008 }
  0x22   :  { %4041 = dma.done.wait [#allocation8], 24576  }
  0x23   :  { %4042 = vsyncadd [#allocation8], 4294942720  ;;  %v5876_v1 = vmov 0.0   ;;  %v186_v2 = vld [vmem:[#allocation5 + $0x1f8] sm:$0xff]  ;;  %v185_v4 = vld [vmem:[#allocation5 + $0x1f0] sm:$0xff]  ;;  %s5889_s4 = sld [smem:[#allocation16_spill]] }
  0x24   :  { %251 = vmatprep.mubr.f32.mxu0 %v5876_v1  ;;  %1178 = vst [vmem:[#allocation2 + $0x30] sm:$0xff] %v5876_v1  ;;  %1179 = vst [vmem:[#allocation2] sm:$0xff] %v5876_v1  ;;  %370 = vmatprep.mubr.f32.mxu1 %v5876_v1  ;;  %v144_v3 = vld [vmem:[#allocation5 + $0xf8] sm:$0xff]  ;;  %v143_v5 = vld [vmem:[#allocation5 + $0xf0] sm:$0xff]  ;;  %s5890_s2 = sld [smem:[#allocation19_spill]]  ;;  %vm621_vm0 = vcmask 1041408  }
  0x25   :  { %1182 = vst [vmem:[#allocation2 + $0x48] sm:$0xff] %v5876_v1  ;;  %1183 = vst [vmem:[#allocation2 + $0x28] sm:$0xff] %v5876_v1  ;;  %187 = vmatprep.subr.mxu0 %v186_v2  ;;  %306 = vmatprep.subr.mxu1 %v144_v3  ;;  %v184_v6 = vld [vmem:[#allocation5 + $0x1e8] sm:$0xff]  ;;  %v183_v8 = vld [vmem:[#allocation5 + $0x1e0] sm:$0xff]  ;;  %s5899_s7 = sld [smem:[#allocation18_spill]]  ;;  %vm608_vm1 = vcmask 539648  }
  0x26   :  { %1186 = vst [vmem:[#allocation2 + $0x40] sm:$0xf] %v5876_v1  ;;  %1187 = vst [vmem:[#allocation2 + $0x38] sm:$0xf] %v5876_v1  ;;  %v142_v7 = vld [vmem:[#allocation5 + $0xe8] sm:$0xff]  ;;  %188 = vmatpush1.msra.mxu0 %v185_v4  ;;  %307 = vmatpush1.msra.mxu1 %v143_v5  ;;  %v141_v9 = vld [vmem:[#allocation5 + $0xe0] sm:$0xff] }
  0x27   :  { %2334 = vst [vmem:[#allocation3 + $0x8] sm:$0xff] %v5876_v1  ;;  %2335 = vst [vmem:[#allocation3 + $0x10] sm:$0xff] %v5876_v1  ;;  %v182_v10 = vld [vmem:[#allocation5 + $0x1d8] sm:$0xff]  ;;  %189 = vmatprep.subr.mxu0 %v184_v6  ;;  %308 = vmatprep.subr.mxu1 %v142_v7  ;;  %v181_v12 = vld [vmem:[#allocation5 + $0x1d0] sm:$0xff]  ;;  %s5903_s13 = sld [smem:[#allocation20_spill]]  ;;  %vm842_vm2 = vcmask 130048  }
  0x28   :  { %2336 = vst [vmem:[#allocation3] sm:$0xff] %v5876_v1  ;;  %2337 = vst [vmem:[#allocation3 + $0x18] sm:$0xff] %v5876_v1  ;;  %v140_v11 = vld [vmem:[#allocation5 + $0xd8] sm:$0xff]  ;;  %v139_v13 = vld [vmem:[#allocation5 + $0xd0] sm:$0xff]  ;;  %190 = vmatpush1.msra.mxu0 %v183_v8  ;;  %309 = vmatpush1.msra.mxu1 %v141_v9  ;;  %s5904_s27 = sld [smem:[#allocation23_spill]]  ;;  %vm1192_vm3 = vcmask 1040384  }
  0x29   :  { %2338 = vst [vmem:[#allocation3 + $0x28] sm:$0xf] %v5876_v1  ;;  %2339 = vst [vmem:[#allocation3 + $0x20] sm:$0xf] %v5876_v1  ;;  %v180_v14 = vld [vmem:[#allocation5 + $0x1c8] sm:$0xff]  ;;  %191 = vmatprep.subr.mxu0 %v182_v10  ;;  %310 = vmatprep.subr.mxu1 %v140_v11  ;;  %v179_v16 = vld [vmem:[#allocation5 + $0x1c0] sm:$0xff] }
  0x2a   :  { %v138_v15 = vld [vmem:[#allocation5 + $0xc8] sm:$0xff]  ;;  %v137_v17 = vld [vmem:[#allocation5 + $0xc0] sm:$0xff]  ;;  %192 = vmatpush1.msra.mxu0 %v181_v12  ;;  %311 = vmatpush1.msra.mxu1 %v139_v13  ;;  %v178_v18 = vld [vmem:[#allocation5 + $0x1b8] sm:$0xff]  ;;  %vm1215_vm4 = vcmask 1042432   ;;  %vm1679_vm5 = vcmask 1045504   ;;  %vm1387_vm6 = vcmask 1046528  }
  0x2b   :  { %v136_v19 = vld [vmem:[#allocation5 + $0xb8] sm:$0xff]  ;;  %193 = vmatprep.subr.mxu0 %v180_v14  ;;  %312 = vmatprep.subr.mxu1 %v138_v15  ;;  %v177_v20 = vld [vmem:[#allocation5 + $0x1b0] sm:$0xff]  ;;  %v176_v22 = vld [vmem:[#allocation5 + $0x1a8] sm:$0xff]  ;;  %vm1815_vm7 = vcmask 277504   ;;  %vm2030_vm8 = vcmask 261120   ;;  %vm2866_vm9 = vcmask 146432  }
  0x2c   :  { %v135_v21 = vld [vmem:[#allocation5 + $0xb0] sm:$0xff]  ;;  %194 = vmatpush1.msra.mxu0 %v179_v16  ;;  %313 = vmatpush1.msra.mxu1 %v137_v17  ;;  %v134_v23 = vld [vmem:[#allocation5 + $0xa8] sm:$0xff]  ;;  %v175_v24 = vld [vmem:[#allocation5 + $0x1a0] sm:$0xff]  ;;  %vm3078_vm10 = vcmask 523264   ;;  %vm3470_vm11 = vcmask 31744   ;;  %vm4048_vm12 = vmmov 0  }
  0x2d   :  { %195 = vmatprep.subr.mxu0 %v178_v18  ;;  %314 = vmatprep.subr.mxu1 %v136_v19  ;;  %v133_v25 = vld [vmem:[#allocation5 + $0xa0] sm:$0xff]  ;;  %v174_v26 = vld [vmem:[#allocation5 + $0x198] sm:$0xff]  ;;  %v173_v28 = vld [vmem:[#allocation5 + $0x190] sm:$0xff]  ;;  %vm3482_vm13 = vcmask 64512   ;;  %vm3566_vm14 = vcmask 1024  }
  0x2e   :  { %196 = vmatpush1.msra.mxu0 %v177_v20  ;;  %315 = vmatpush1.msra.mxu1 %v135_v21  ;;  %v132_v27 = vld [vmem:[#allocation5 + $0x98] sm:$0xff]  ;;  %v131_v29 = vld [vmem:[#allocation5 + $0x90] sm:$0xff]  ;;  %v172_v30 = vld [vmem:[#allocation5 + $0x188] sm:$0xff] }
  0x2f   :  { %197 = vmatprep.subr.mxu0 %v176_v22  ;;  %316 = vmatprep.subr.mxu1 %v134_v23  ;;  %v130_v31 = vld [vmem:[#allocation5 + $0x88] sm:$0xff]  ;;  %v171_v32 = vld [vmem:[#allocation5 + $0x180] sm:$0xff]  ;;  %v170_v34 = vld [vmem:[#allocation5 + $0x178] sm:$0xff] }
  0x30   :  { %198 = vmatpush1.msra.mxu0 %v175_v24  ;;  %317 = vmatpush1.msra.mxu1 %v133_v25  ;;  %v129_v33 = vld [vmem:[#allocation5 + $0x80] sm:$0xff]  ;;  %v128_v35 = vld [vmem:[#allocation5 + $0x78] sm:$0xff]  ;;  %v169_v36 = vld [vmem:[#allocation5 + $0x170] sm:$0xff] }
  0x31   :  { %199 = vmatprep.subr.mxu0 %v174_v26  ;;  %318 = vmatprep.subr.mxu1 %v132_v27  ;;  %v127_v37 = vld [vmem:[#allocation5 + $0x70] sm:$0xff]  ;;  %v168_v38 = vld [vmem:[#allocation5 + $0x168] sm:$0xff]  ;;  %v167_v40 = vld [vmem:[#allocation5 + $0x160] sm:$0xff] }
  0x32   :  { %200 = vmatpush1.msra.mxu0 %v173_v28  ;;  %319 = vmatpush1.msra.mxu1 %v131_v29  ;;  %v126_v39 = vld [vmem:[#allocation5 + $0x68] sm:$0xff]  ;;  %v125_v41 = vld [vmem:[#allocation5 + $0x60] sm:$0xff]  ;;  %v166_v42 = vld [vmem:[#allocation5 + $0x158] sm:$0xff] }
  0x33   :  { %201 = vmatprep.subr.mxu0 %v172_v30  ;;  %320 = vmatprep.subr.mxu1 %v130_v31  ;;  %v124_v43 = vld [vmem:[#allocation5 + $0x58] sm:$0xff]  ;;  %v165_v44 = vld [vmem:[#allocation5 + $0x150] sm:$0xff]  ;;  %v164_v46 = vld [vmem:[#allocation5 + $0x148] sm:$0xff] }
  0x34   :  { %202 = vmatpush1.msra.mxu0 %v171_v32  ;;  %321 = vmatpush1.msra.mxu1 %v129_v33  ;;  %v123_v45 = vld [vmem:[#allocation5 + $0x50] sm:$0xff]  ;;  %v122_v47 = vld [vmem:[#allocation5 + $0x48] sm:$0xff]  ;;  %v163_v48 = vld [vmem:[#allocation5 + $0x140] sm:$0xff] }
  0x35   :  { %203 = vmatprep.subr.mxu0 %v170_v34  ;;  %322 = vmatprep.subr.mxu1 %v128_v35  ;;  %v121_v49 = vld [vmem:[#allocation5 + $0x40] sm:$0xff]  ;;  %v162_v50 = vld [vmem:[#allocation5 + $0x138] sm:$0xff]  ;;  %v161_v52 = vld [vmem:[#allocation5 + $0x130] sm:$0xff] }
  0x36   :  { %204 = vmatpush1.msra.mxu0 %v169_v36  ;;  %323 = vmatpush1.msra.mxu1 %v127_v37  ;;  %v120_v51 = vld [vmem:[#allocation5 + $0x38] sm:$0xff]  ;;  %v119_v53 = vld [vmem:[#allocation5 + $0x30] sm:$0xff]  ;;  %v160_v54 = vld [vmem:[#allocation5 + $0x128] sm:$0xff] }
  0x37   :  { %205 = vmatprep.subr.mxu0 %v168_v38  ;;  %324 = vmatprep.subr.mxu1 %v126_v39  ;;  %v118_v55 = vld [vmem:[#allocation5 + $0x28] sm:$0xff]  ;;  %v159_v56 = vld [vmem:[#allocation5 + $0x120] sm:$0xff]  ;;  %v158_v58 = vld [vmem:[#allocation5 + $0x118] sm:$0xff] }
  0x38   :  { %206 = vmatpush1.msra.mxu0 %v167_v40  ;;  %325 = vmatpush1.msra.mxu1 %v125_v41  ;;  %v117_v57 = vld [vmem:[#allocation5 + $0x20] sm:$0xff]  ;;  %v116_v59 = vld [vmem:[#allocation5 + $0x18] sm:$0xff]  ;;  %v157_v60 = vld [vmem:[#allocation5 + $0x110] sm:$0xff] }
  0x39   :  { %207 = vmatprep.subr.mxu0 %v166_v42  ;;  %326 = vmatprep.subr.mxu1 %v124_v43  ;;  %v115_v61 = vld [vmem:[#allocation5 + $0x10] sm:$0xff]  ;;  %v156_v62 = vld [vmem:[#allocation5 + $0x108] sm:$0xff]  ;;  %v155_v0 = vld [vmem:[#allocation5 + $0x100] sm:$0xff] }
  0x3a   :  { %208 = vmatpush1.msra.mxu0 %v165_v44  ;;  %327 = vmatpush1.msra.mxu1 %v123_v45  ;;  %v114_v63 = vld [vmem:[#allocation5 + $0x8] sm:$0xff]  ;;  %v113_v2 = vld [vmem:[#allocation5] sm:$0xff]  ;;  %v466_v5 = vld [vmem:[#allocation5 + $0x2f8] sm:$0xff] }
  0x3b   :  { %209 = vmatprep.subr.mxu0 %v164_v46  ;;  %328 = vmatprep.subr.mxu1 %v122_v47  ;;  %v145_v3 = vld [vmem:[%s5889_s4 + $0x1] sm:$0xff]  ;;  %v465_v6 = vld [vmem:[#allocation5 + $0x2f0] sm:$0xff]  ;;  %v146_v7 = vld [vmem:[%s5889_s4 + $0x9] sm:$0xff] }
  0x3c   :  { %210 = vmatpush1.msra.mxu0 %v163_v48  ;;  %329 = vmatpush1.msra.mxu1 %v121_v49  ;;  %v104_v4 = vld [vmem:[%s5889_s4] sm:$0xff]  ;;  %v105_v8 = vld [vmem:[%s5889_s4 + $0x8] sm:$0xff]  ;;  %v147_v12 = vld [vmem:[%s5889_s4 + $0x11] sm:$0xff] }
  0x3d   :  { %211 = vmatprep.subr.mxu0 %v162_v50  ;;  %330 = vmatprep.subr.mxu1 %v120_v51  ;;  %v464_v9 = vld [vmem:[#allocation5 + $0x2e8] sm:$0xff]  ;;  %v463_v10 = vld [vmem:[#allocation5 + $0x2e0] sm:$0xff]  ;;  %v462_v11 = vld [vmem:[#allocation5 + $0x2d8] sm:$0xff] }
  0x3e   :  { %212 = vmatpush1.msra.mxu0 %v161_v52  ;;  %331 = vmatpush1.msra.mxu1 %v119_v53  ;;  %v106_v13 = vld [vmem:[%s5889_s4 + $0x10] sm:$0xff]  ;;  %v459_v16 = vld [vmem:[#allocation5 + $0x2c0] sm:$0xff]  ;;  %v148_v17 = vld [vmem:[%s5889_s4 + $0x19] sm:$0xff] }
  0x3f   :  { %213 = vmatprep.subr.mxu0 %v160_v54  ;;  %332 = vmatprep.subr.mxu1 %v118_v55  ;;  %v461_v14 = vld [vmem:[#allocation5 + $0x2d0] sm:$0xff]  ;;  %v460_v15 = vld [vmem:[#allocation5 + $0x2c8] sm:$0xff]  ;;  %v458_v19 = vld [vmem:[#allocation5 + $0x2b8] sm:$0xff] }
  0x40   :  { %214 = vmatpush1.msra.mxu0 %v159_v56  ;;  %333 = vmatpush1.msra.mxu1 %v117_v57  ;;  %v107_v18 = vld [vmem:[%s5889_s4 + $0x18] sm:$0xff]  ;;  %v456_v21 = vld [vmem:[#allocation5 + $0x2a8] sm:$0xff]  ;;  %v455_v22 = vld [vmem:[#allocation5 + $0x2a0] sm:$0xff] }
  0x41   :  { %215 = vmatprep.subr.mxu0 %v158_v58  ;;  %334 = vmatprep.subr.mxu1 %v116_v59  ;;  %v457_v20 = vld [vmem:[#allocation5 + $0x2b0] sm:$0xff]  ;;  %v108_v23 = vld [vmem:[%s5889_s4 + $0x20] sm:$0xff]  ;;  %v452_v27 = vld [vmem:[#allocation5 + $0x288] sm:$0xff] }
  0x42   :  { %216 = vmatpush1.msra.mxu0 %v157_v60  ;;  %335 = vmatpush1.msra.mxu1 %v115_v61  ;;  %v149_v24 = vld [vmem:[%s5889_s4 + $0x21] sm:$0xff]  ;;  %v454_v25 = vld [vmem:[#allocation5 + $0x298] sm:$0xff]  ;;  %v453_v26 = vld [vmem:[#allocation5 + $0x290] sm:$0xff] }
  0x43   :  { %217 = vmatprep.subr.mxu0 %v156_v62  ;;  %336 = vmatprep.subr.mxu1 %v114_v63  ;;  %v451_v28 = vld [vmem:[#allocation5 + $0x280] sm:$0xff]  ;;  %v150_v30 = vld [vmem:[%s5889_s4 + $0x29] sm:$0xff]  ;;  %v450_v31 = vld [vmem:[#allocation5 + $0x278] sm:$0xff] }
  0x44   :  { %218 = vmatpush1.msra.mxu0 %v155_v0  ;;  %337 = vmatpush1.msra.mxu1 %v113_v2  ;;  %v109_v29 = vld [vmem:[%s5889_s4 + $0x28] sm:$0xff]  ;;  %v449_v32 = vld [vmem:[#allocation5 + $0x270] sm:$0xff]  ;;  %v446_v37 = vld [vmem:[#allocation5 + $0x258] sm:$0xff] }
  0x45   :  { %252 = vmatmul.mubr.f32.vlgmr.msra.gmra.mxu0 %v145_v3  ;;  %371 = vmatmul.mubr.f32.vlgmr.msra.gmra.mxu1 %v104_v4  ;;  %v448_v33 = vld [vmem:[#allocation5 + $0x268] sm:$0xff]  ;;  %v447_v34 = vld [vmem:[#allocation5 + $0x260] sm:$0xff]  ;;  %v151_v36 = vld [vmem:[%s5889_s4 + $0x31] sm:$0xff] }
  0x46   :  { %257 = vmatprep.mubr.f32.mxu0 %v5876_v1  ;;  %376 = vmatprep.mubr.f32.mxu1 %v5876_v1  ;;  %v110_v35 = vld [vmem:[%s5889_s4 + $0x30] sm:$0xff]  ;;  %v443_v40 = vld [vmem:[#allocation5 + $0x240] sm:$0xff]  ;;  %v111_v41 = vld [vmem:[%s5889_s4 + $0x38] sm:$0xff] }
  0x47   :  { %467 = vmatprep.subr.mxu0 %v466_v5  ;;  %v445_v38 = vld [vmem:[#allocation5 + $0x250] sm:$0xff]  ;;  %v444_v39 = vld [vmem:[#allocation5 + $0x248] sm:$0xff]  ;;  %v152_v42 = vld [vmem:[%s5889_s4 + $0x39] sm:$0xff] }
  0x48   :  { %468 = vmatpush1.msra.mxu0 %v465_v6  ;;  %v442_v43 = vld [vmem:[#allocation5 + $0x238] sm:$0xff]  ;;  %v441_v44 = vld [vmem:[#allocation5 + $0x230] sm:$0xff]  ;;  %v440_v45 = vld [vmem:[#allocation5 + $0x228] sm:$0xff] }
  0x49   :  { %258 = vmatmul.mubr.f32.gmra.mxu0 %v146_v7  ;;  %377 = vmatmul.mubr.f32.gmra.mxu1 %v105_v8  ;;  %v439_v46 = vld [vmem:[#allocation5 + $0x220] sm:$0xff]  ;;  %v438_v49 = vld [vmem:[#allocation5 + $0x218] sm:$0xff]  ;;  %v437_v50 = vld [vmem:[#allocation5 + $0x210] sm:$0xff] }
  0x4a   :  { %469 = vmatprep.subr.mxu0 %v464_v9  ;;  %263 = vmatprep.mubr.f32.mxu0 %v5876_v1  ;;  %v112_v47 = vld [vmem:[%s5889_s4 + $0x40] sm:$0x3]  ;;  %v436_v51 = vld [vmem:[#allocation5 + $0x208] sm:$0xff]  ;;  %v427_v55 = vld [vmem:[%s5889_s4 + $0x12] sm:$0xff] }
  0x4b   :  { %382 = vmatprep.mubr.f32.mxu1 %v5876_v1  ;;  %470 = vmatpush1.msra.mxu0 %v463_v10  ;;  %v153_v48 = vld [vmem:[%s5889_s4 + $0x41] sm:$0x3]  ;;  %v426_v54 = vld [vmem:[%s5889_s4 + $0xa] sm:$0xff]  ;;  %v431_v59 = vld [vmem:[%s5889_s4 + $0x32] sm:$0xff] }
  0x4c   :  { %471 = vmatprep.subr.mxu0 %v462_v11  ;;  %v435_v52 = vld [vmem:[#allocation5 + $0x200] sm:$0xff]  ;;  %v430_v58 = vld [vmem:[%s5889_s4 + $0x2a] sm:$0xff]  ;;  %v4302_v62 = vld [vmem:[%s5890_s2 + $0xf8] sm:$0xff] }
  0x4d   :  { %264 = vmatmul.mubr.f32.gmra.mxu0 %v147_v12  ;;  %383 = vmatmul.mubr.f32.gmra.mxu1 %v106_v13  ;;  %v425_v53 = vld [vmem:[%s5889_s4 + $0x2] sm:$0xff]  ;;  %v428_v56 = vld [vmem:[%s5889_s4 + $0x1a] sm:$0xff]  ;;  %5891 = vst [vmem:[#allocation11_spill] sm:$0xff] %v4302_v62 }
  0x4e   :  { %472 = vmatpush1.msra.mxu0 %v461_v14  ;;  %269 = vmatprep.mubr.f32.mxu0 %v5876_v1  ;;  %v429_v57 = vld [vmem:[%s5889_s4 + $0x22] sm:$0xff]  ;;  %v432_v60 = vld [vmem:[%s5889_s4 + $0x3a] sm:$0xff] }
  0x4f   :  { %473 = vmatprep.subr.mxu0 %v460_v15  ;;  %388 = vmatprep.mubr.f32.mxu1 %v5876_v1  ;;  %v433_v61 = vld [vmem:[%s5889_s4 + $0x42] sm:$0x3]  ;;  %v4307_v63 = vld [vmem:[%s5890_s2 + $0x78] sm:$0xff] }
  0x50   :  { %474 = vmatpush1.msra.mxu0 %v459_v16  ;;  %5892 = vst [vmem:[#allocation12_spill] sm:$0xff] %v4307_v63 }
  0x51   :  { %270 = vmatmul.mubr.f32.gmra.mxu0 %v148_v17  ;;  %389 = vmatmul.mubr.f32.gmra.mxu1 %v107_v18 }
  0x52   :  { %475 = vmatprep.subr.mxu0 %v458_v19  ;;  %275 = vmatprep.mubr.f32.mxu0 %v5876_v1 }
  0x53   :  { %476 = vmatpush1.msra.mxu0 %v457_v20  ;;  %394 = vmatprep.mubr.f32.mxu1 %v5876_v1 }
  0x54   :  { %477 = vmatprep.subr.mxu0 %v456_v21 }
  0x55   :  { %478 = vmatpush1.msra.mxu0 %v455_v22  ;;  %395 = vmatmul.mubr.f32.gmra.mxu1 %v108_v23 }
  0x56   :  { %276 = vmatmul.mubr.f32.gmra.mxu0 %v149_v24  ;;  %479 = vmatprep.subr.mxu0 %v454_v25 }
  0x57   :  { %480 = vmatpush1.msra.mxu0 %v453_v26  ;;  %281 = vmatprep.mubr.f32.mxu0 %v5876_v1 }
  0x58   :  { %481 = vmatprep.subr.mxu0 %v452_v27  ;;  %400 = vmatprep.mubr.f32.mxu1 %v5876_v1 }
  0x59   :  { %482 = vmatpush1.msra.mxu0 %v451_v28  ;;  %401 = vmatmul.mubr.f32.gmra.mxu1 %v109_v29 }
  0x5a   :  { %282 = vmatmul.mubr.f32.gmra.mxu0 %v150_v30  ;;  %483 = vmatprep.subr.mxu0 %v450_v31 }
  0x5b   :  { %484 = vmatpush1.msra.mxu0 %v449_v32  ;;  %287 = vmatprep.mubr.f32.mxu0 %v5876_v1 }
  0x5c   :  { %485 = vmatprep.subr.mxu0 %v448_v33  ;;  %406 = vmatprep.mubr.f32.mxu1 %v5876_v1 }
  0x5d   :  { %486 = vmatpush1.msra.mxu0 %v447_v34  ;;  %407 = vmatmul.mubr.f32.gmra.mxu1 %v110_v35 }
  0x5e   :  { %288 = vmatmul.mubr.f32.gmra.mxu0 %v151_v36  ;;  %487 = vmatprep.subr.mxu0 %v446_v37 }
  0x5f   :  { %488 = vmatpush1.msra.mxu0 %v445_v38  ;;  %293 = vmatprep.mubr.f32.mxu0 %v5876_v1 }
  0x60   :  { %489 = vmatprep.subr.mxu0 %v444_v39  ;;  %412 = vmatprep.mubr.f32.mxu1 %v5876_v1 }
  0x61   :  { %490 = vmatpush1.msra.mxu0 %v443_v40  ;;  %413 = vmatmul.mubr.f32.gmra.mxu1 %v111_v41 }
  0x62   :  { %294 = vmatmul.mubr.f32.gmra.mxu0 %v152_v42  ;;  %491 = vmatprep.subr.mxu0 %v442_v43 }
  0x63   :  { %492 = vmatpush1.msra.mxu0 %v441_v44  ;;  %299 = vmatprep.mubr.f32.mxu0 %v5876_v1 }
  0x64   :  { %493 = vmatprep.subr.mxu0 %v440_v45  ;;  %418 = vmatprep.mubr.f32.mxu1 %v5876_v1 }
  0x65   :  { %494 = vmatpush1.msra.mxu0 %v439_v46  ;;  %419 = vmatmul.mubr.f32.gmra.mxu1 %v112_v47 }
  0x66   :  { %300 = vmatmul.mubr.f32.gmra.mxu0 %v153_v48  ;;  %495 = vmatprep.subr.mxu0 %v438_v49 }
  0x67   :  { %496 = vmatpush1.msra.mxu0 %v437_v50  ;;  %531 = vmatprep.mubr.f32.mxu0 %v5876_v1 }
  0x68   :  { %497 = vmatprep.subr.mxu0 %v436_v51  ;;  %692 = vmatprep.mubr.f32.mxu1 %v5876_v1 }
  0x69   :  { %498 = vmatpush1.msra.mxu0 %v435_v52 }
  0x6a   :  { %532 = vmatmul.mubr.f32.vlgmr.msra.gmra.mxu0 %v425_v53  ;;  %3723 = vmatprep.subr.mxu0 %v4302_v62 }
  0x6b   :  { %537 = vmatprep.mubr.f32.mxu0 %v5876_v1  ;;  %3724 = vmatpush3.msra.mxu0 %v4307_v63 }
  0x6e   :  { %538 = vmatmul.mubr.f32.gmra.mxu0 %v426_v54 }
  0x6f   :  { %543 = vmatprep.mubr.f32.mxu0 %v5876_v1 }
  0x72   :  { %544 = vmatmul.mubr.f32.gmra.mxu0 %v427_v55 }
  0x73   :  { %549 = vmatprep.mubr.f32.mxu0 %v5876_v1 }
  0x76   :  { %550 = vmatmul.mubr.f32.gmra.mxu0 %v428_v56 }
  0x77   :  { %555 = vmatprep.mubr.f32.mxu0 %v5876_v1 }
  0x7a   :  { %556 = vmatmul.mubr.f32.gmra.mxu0 %v429_v57 }
  0x7b   :  { %561 = vmatprep.mubr.f32.mxu0 %v5876_v1 }
  0x7e   :  { %562 = vmatmul.mubr.f32.gmra.mxu0 %v430_v58 }
  0x7f   :  { %567 = vmatprep.mubr.f32.mxu0 %v5876_v1 }
  0x82   :  { %568 = vmatmul.mubr.f32.gmra.mxu0 %v431_v59 }
  0x83   :  { %573 = vmatprep.mubr.f32.mxu0 %v5876_v1 }
  0x86   :  { %574 = vmatmul.mubr.f32.gmra.mxu0 %v432_v60 }
  0x87   :  { %579 = vmatprep.mubr.f32.mxu0 %v5876_v1 }
  0x8a   :  { %580 = vmatmul.mubr.f32.gmra.mxu0 %v433_v61 }
 0x105   :  { %v4311_v0 = vpop.f32.mrf.mxu0  ;;  %v4313_v2 = vpop.f32.mrf.mxu1 }
 0x107   :  { %v4315_v3 = vpop.f32.mrf.mxu0  ;;  %v4317_v4 = vpop.f32.mrf.mxu1 }
 0x109   :  { %v4319_v5 = vpop.f32.mrf.mxu0  ;;  %v4323_v7 = vpop.f32.mrf.mxu1 }
 0x10b   :  { %v4321_v6 = vpop.f32.mrf.mxu0  ;;  %v4329_v10 = vpop.f32.mrf.mxu1 }
 0x10d   :  { %v4325_v8 = vpop.f32.mrf.mxu0  ;;  %v4335_v13 = vpop.f32.mrf.mxu1 }
 0x10f   :  { %v4327_v9 = vpop.f32.mrf.mxu0  ;;  %v4339_v15 = vpop.f32.mrf.mxu1 }
 0x111   :  { %v4331_v11 = vpop.f32.mrf.mxu0  ;;  %v4341_v18 = vpop.f32.mrf.mxu1 }
 0x113   :  { %v4333_v12 = vpop.f32.mrf.mxu0  ;;  %v392_v21 = vpop.f32.mrf.mxu1 }
 0x115   :  { %v396_v24 = vpop.f32.mrf.mxu1 }
 0x116   :  { %v4337_v14 = vpop.f32.mrf.mxu0 }
 0x117   :  { %v398_v27 = vpop.f32.mrf.mxu1 }
 0x118   :  { %v279_v16 = vpop.f32.mrf.mxu0 }
 0x119   :  { %v402_v30 = vpop.f32.mrf.mxu1 }
 0x11a   :  { %v283_v17 = vpop.f32.mrf.mxu0 }
 0x11b   :  { %v404_v33 = vpop.f32.mrf.mxu1 }
 0x11c   :  { %v285_v19 = vpop.f32.mrf.mxu0 }
 0x11d   :  { %v408_v36 = vpop.f32.mrf.mxu1 }
 0x11e   :  { %v289_v20 = vpop.f32.mrf.mxu0 }
 0x11f   :  { %v410_v39 = vpop.f32.mrf.mxu1  ;;  %v409_v63 = vadd.f32 %v408_v36, %v289_v20  ;;  %v391_v20 = vadd.f32 %v4341_v18, %v4331_v11  ;;  %v379_v11 = vadd.f32 %v4323_v7, %v4319_v5  ;;  %v604_v5 = vld [vmem:[%s5899_s7] sm:$0xff]  ;;  %v606_v7 = vld [vmem:[%s5899_s7 + $0x10] sm:$0xff]  ;;  %v746_v36 = vld [vmem:[%s5890_s2 + $0x58] sm:$0xff] }
 0x120   :  { %v291_v22 = vpop.f32.mrf.mxu0 }
 0x121   :  { %v414_v42 = vpop.f32.mrf.mxu1  ;;  %v411_v61 = vadd.f32 %v410_v39, %v291_v22  ;;  %v393_v22 = vadd.f32 %v392_v21, %v4333_v12  ;;  %v381_v12 = vadd.f32 %v4329_v10, %v4321_v6 }
 0x122   :  { %v295_v23 = vpop.f32.mrf.mxu0 }
 0x123   :  { %v416_v45 = vpop.f32.mrf.mxu1  ;;  %v415_v59 = vadd.f32 %v414_v42, %v295_v23  ;;  %v397_v23 = vadd.f32 %v396_v24, %v4337_v14  ;;  %v759_v42 = vld [vmem:[%s5890_s2 + $0xc0] sm:$0xff] }
 0x124   :  { %v297_v25 = vpop.f32.mrf.mxu0 }
 0x125   :  { %v420_v48 = vpop.f32.mrf.mxu1  ;;  %v417_v57 = vadd.f32 %v416_v45, %v297_v25  ;;  %v742_v45 = vld [vmem:[%s5890_s2 + $0x38] sm:$0xff] }
 0x126   :  { %v301_v26 = vpop.f32.mrf.mxu0 }
 0x127   :  { %v422_v51 = vpop.f32.mrf.mxu1  ;;  %v421_v55 = vadd.f32 %v420_v48, %v301_v26  ;;  %v399_v26 = vadd.f32 %v398_v27, %v279_v16  ;;  %v607_v27 = vld [vmem:[%s5899_s7 + $0x18] sm:$0xff] }
 0x128   :  { %v303_v28 = vpop.f32.mrf.mxu0 }
 0x129   :  { %v423_v54 = vadd.f32 %v422_v51, %v303_v28  ;;  %v755_v51 = vld [vmem:[%s5890_s2 + $0xa0] sm:$0xff] }
 0x12a   :  { %v4343_v29 = vpop.f32.mrf.mxu0 }
 0x12b   :  { %5893 = vst [vmem:[#allocation13_spill] sm:$0xff] %v4343_v29  ;;  %v405_v29 = vadd.f32 %v404_v33, %v285_v19  ;;  %v763_v33 = vld [vmem:[%s5890_s2 + $0xe0] sm:$0xff] }
 0x12c   :  { %v4345_v31 = vpop.f32.mrf.mxu0 }
 0x12d   :  { %5894 = vst [vmem:[#allocation14_spill] sm:$0xff] %v4345_v31 }
 0x12e   :  { %v4347_v32 = vpop.f32.mrf.mxu0 }
 0x12f   :  { %5895 = vst [vmem:[#allocation15_spill] sm:$0xff] %v4347_v32  ;;  %v403_v32 = vadd.f32 %v402_v30, %v283_v17  ;;  %v749_v30 = vld [vmem:[%s5890_s2 + $0x70] sm:$0xff] }
 0x130   :  { %v4349_v34 = vpop.f32.mrf.mxu0 }
 0x132   :  { %v545_v35 = vpop.f32.mrf.mxu0  ;;  %v5898_v21 = vld [vmem:[#allocation13_spill] sm:$0xff] }
 0x134   :  { %v547_v37 = vpop.f32.mrf.mxu0  ;;  %v5897_v6 = vld [vmem:[#allocation14_spill] sm:$0xff] }
 0x136   :  { %v551_v38 = vpop.f32.mrf.mxu0 }
 0x137   :  { %v592_v14 = vadd.f32 %v551_v38, %v391_v20  ;;  %v745_v38 = vld [vmem:[%s5890_s2 + $0x50] sm:$0xff] }
 0x138   :  { %v553_v40 = vpop.f32.mrf.mxu0 }
 0x13a   :  { %v557_v41 = vpop.f32.mrf.mxu0 }
 0x13b   :  { %v594_v19 = vadd.f32 %v557_v41, %v397_v23  ;;  %v744_v41 = vld [vmem:[%s5890_s2 + $0x48] sm:$0xff] }
 0x13c   :  { %v559_v43 = vpop.f32.mrf.mxu0 }
 0x13d   :  { %v595_v39 = vadd.f32 %v559_v43, %v399_v26  ;;  %v743_v43 = vld [vmem:[%s5890_s2 + $0x40] sm:$0xff] }
 0x13e   :  { %v563_v44 = vpop.f32.mrf.mxu0 }
 0x13f   :  { %v596_v25 = vadd.f32 %v563_v44, %v403_v32  ;;  %v748_v32 = vld [vmem:[%s5890_s2 + $0x68] sm:$0xff]  ;;  %v758_v44 = vld [vmem:[%s5890_s2 + $0xb8] sm:$0xff] }
 0x140   :  { %v565_v46 = vpop.f32.mrf.mxu0 }
 0x141   :  { %v597_v48 = vadd.f32 %v565_v46, %v405_v29  ;;  %v765_v29 = vld [vmem:[%s5890_s2 + $0xf0] sm:$0xff] }
 0x142   :  { %v569_v47 = vpop.f32.mrf.mxu0  ;;  %3725 = vmatprep.subr.mxu0 %v765_v29  ;;  %v757_v46 = vld [vmem:[%s5890_s2 + $0xb0] sm:$0xff] }
 0x143   :  { %v598_v28 = vadd.f32 %v569_v47, %v409_v63  ;;  %v385_v63 = vadd.f32 %v4335_v13, %v4325_v8  ;;  %v373_v8 = vadd.f32 %v4313_v2, %v4311_v0  ;;  %v5896_v13 = vld [vmem:[#allocation15_spill] sm:$0xff]  ;;  %v5901_v0 = vmov 0.0   ;;  %3726 = vmatpush3.msra.mxu0 %v749_v30  ;;  %v741_v47 = vld [vmem:[%s5890_s2 + $0x30] sm:$0xff] }
 0x144   :  { %v571_v49 = vpop.f32.mrf.mxu0  ;;  %v588_v18 = vadd.f32 %v5896_v13, %v379_v11  ;;  %v605_v2 = vld [vmem:[%s5899_s7 + $0x8] sm:$0xff]  ;;  %s5905_s7 = sld [smem:[#allocation21_spill]] }
 0x145   :  { %v599_v31 = vadd.f32 %v571_v49, %v411_v61  ;;  %v590_v17 = vadd.f32 %v545_v35, %v385_v63  ;;  %v586_v24 = vadd.f32 %v5898_v21, %v373_v8  ;;  %v762_v35 = vld [vmem:[%s5890_s2 + $0xd8] sm:$0xff]  ;;  %v756_v49 = vld [vmem:[%s5890_s2 + $0xa8] sm:$0xff] }
 0x146   :  { %v575_v50 = vpop.f32.mrf.mxu0 }
 0x147   :  { %v600_v62 = vadd.f32 %v575_v50, %v415_v59  ;;  %v740_v50 = vld [vmem:[%s5890_s2 + $0x28] sm:$0xff]  ;;  %v751_v59 = vld [vmem:[%s5890_s2 + $0x80] sm:$0xff] }
 0x148   :  { %v577_v52 = vpop.f32.mrf.mxu0 }
 0x149   :  { %v601_v1 = vadd.f32 %v577_v52, %v417_v57  ;;  %v739_v52 = vld [vmem:[%s5890_s2 + $0x20] sm:$0xff]  ;;  %v752_v57 = vld [vmem:[%s5890_s2 + $0x88] sm:$0xff] }
 0x14a   :  { %v581_v53 = vpop.f32.mrf.mxu0 }
 0x14b   :  { %v602_v60 = vadd.f32 %v581_v53, %v421_v55  ;;  %v754_v53 = vld [vmem:[%s5890_s2 + $0x98] sm:$0xff]  ;;  %v753_v55 = vld [vmem:[%s5890_s2 + $0x90] sm:$0xff] }
 0x14c   :  { %v583_v56 = vpop.f32.mrf.mxu0 }
 0x14d   :  { %v603_v58 = vadd.f32 %v583_v56, %v423_v54  ;;  %v738_v54 = vld [vmem:[%s5890_s2 + $0x18] sm:$0xff]  ;;  %v737_v56 = vld [vmem:[%s5890_s2 + $0x10] sm:$0xff] }
 0x14f   :  { %3574 = vmatprep.subr.msk.mxu1 %vm621_vm0, %v603_v58  ;;  %v736_v58 = vld [vmem:[%s5890_s2 + $0x8] sm:$0xff] }
 0x150   :  { %3575 = vmatpush1.msk.msra.mxu1 %vm621_vm0, %v602_v60  ;;  %v735_v60 = vld [vmem:[%s5890_s2] sm:$0xff] }
 0x151   :  { %644 = vmatprep.subr.mxu1 %v601_v1  ;;  %v387_v1 = vadd.f32 %v4339_v15, %v4327_v9  ;;  %v375_v9 = vadd.f32 %v4317_v4, %v4315_v3  ;;  %v589_v15 = vadd.f32 %v4349_v34, %v381_v12  ;;  %v5900_v3 = vld [vmem:[#allocation11_spill] sm:$0xff]  ;;  %v5902_v4 = vld [vmem:[#allocation12_spill] sm:$0xff] }
 0x152   :  { %645 = vmatpush1.msra.mxu1 %v600_v62  ;;  %v593_v62 = vadd.f32 %v553_v40, %v393_v22  ;;  %v747_v34 = vld [vmem:[%s5890_s2 + $0x60] sm:$0xff]  ;;  %v760_v40 = vld [vmem:[%s5890_s2 + $0xc8] sm:$0xff] }
 0x153   :  { %646 = vmatprep.subr.mxu1 %v599_v31  ;;  %v591_v16 = vadd.f32 %v547_v37, %v387_v1  ;;  %v587_v10 = vadd.f32 %v5897_v6, %v375_v9  ;;  %v764_v31 = vld [vmem:[%s5890_s2 + $0xe8] sm:$0xff]  ;;  %v761_v37 = vld [vmem:[%s5890_s2 + $0xd0] sm:$0xff]  ;;  %s5906_s2 = sld [smem:[#allocation22_spill]] }
 0x154   :  { %647 = vmatpush1.msra.mxu1 %v598_v28  ;;  %3727 = vmatprep.subr.mxu0 %v764_v31 }
 0x155   :  { %648 = vmatprep.subr.mxu1 %v597_v48  ;;  %3728 = vmatpush3.msra.mxu0 %v748_v32 }
 0x156   :  { %649 = vmatpush1.msra.mxu1 %v596_v25  ;;  %3729 = vmatprep.subr.mxu0 %v763_v33 }
 0x157   :  { %650 = vmatprep.subr.mxu1 %v595_v39  ;;  %3730 = vmatpush3.msra.mxu0 %v747_v34 }
 0x158   :  { %651 = vmatpush1.msra.mxu1 %v594_v19  ;;  %3731 = vmatprep.subr.mxu0 %v762_v35 }
 0x159   :  { %652 = vmatprep.subr.mxu1 %v593_v62  ;;  %3732 = vmatpush3.msra.mxu0 %v746_v36 }
 0x15a   :  { %653 = vmatpush1.msra.mxu1 %v592_v14  ;;  %3733 = vmatprep.subr.mxu0 %v761_v37 }
 0x15b   :  { %654 = vmatprep.subr.mxu1 %v591_v16  ;;  %3734 = vmatpush3.msra.mxu0 %v745_v38 }
 0x15c   :  { %655 = vmatpush1.msra.mxu1 %v590_v17  ;;  %3735 = vmatprep.subr.mxu0 %v760_v40 }
 0x15d   :  { %656 = vmatprep.subr.mxu1 %v589_v15  ;;  %3736 = vmatpush3.msra.mxu0 %v744_v41 }
 0x15e   :  { %657 = vmatpush1.msra.mxu1 %v588_v18  ;;  %3737 = vmatprep.subr.mxu0 %v759_v42 }
 0x15f   :  { %658 = vmatprep.subr.mxu1 %v587_v10  ;;  %3738 = vmatpush3.msra.mxu0 %v743_v43 }
 0x160   :  { %659 = vmatpush1.msra.mxu1 %v586_v24  ;;  %3739 = vmatprep.subr.mxu0 %v758_v44  ;;  %v4480_v24 = vld [vmem:[#allocation2 + $0x30] sm:$0xff] }
 0x161   :  { %3576 = vmatmul.mubr.msk.f32.vlgmr.msra.gmra.mxu1 %vm608_vm1, %v604_v5  ;;  %3758 = vmatprep.subr.mxu1 %v5900_v3  ;;  %v841_v5 = vld [vmem:[%s5903_s13 + $0x18] sm:$0xff]  ;;  %v840_v3 = vld [vmem:[%s5903_s13 + $0x10] sm:$0xff] }
 0x162   :  { %698 = vmatprep.mubr.f32.mxu1 %v5901_v0  ;;  %3759 = vmatpush3.msra.mxu1 %v5902_v4 }
 0x163   :  { %3760 = vmatprep.subr.mxu1 %v765_v29  ;;  %3740 = vmatpush3.msra.mxu0 %v742_v45 }
 0x164   :  { %3761 = vmatpush3.msra.mxu1 %v749_v30  ;;  %3741 = vmatprep.subr.mxu0 %v757_v46  ;;  %v917_v30 = vlaneseq }
 0x165   :  { %3577 = vmatmul.mubr.msk.f32.gmra.mxu1 %vm608_vm1, %v605_v2  ;;  %3762 = vmatprep.subr.mxu1 %v764_v31  ;;  %v838_v2 = vld [vmem:[%s5903_s13] sm:$0xff] }
 0x166   :  { %704 = vmatprep.mubr.f32.mxu1 %v5901_v0  ;;  %3763 = vmatpush3.msra.mxu1 %v748_v32  ;;  %v4496_v31 = vshrl.u32 %v917_v30, 7 }
 0x167   :  { %3764 = vmatprep.subr.mxu1 %v763_v33  ;;  %3742 = vmatpush3.msra.mxu0 %v741_v47 }
 0x168   :  { %3765 = vmatpush3.msra.mxu1 %v747_v34  ;;  %3743 = vmatprep.subr.mxu0 %v756_v49  ;;  %v4499_v32 = vsub.s32 0, %v4496_v31 }
 0x169   :  { %3578 = vmatmul.mubr.msk.f32.gmra.mxu1 %vm608_vm1, %v606_v7  ;;  %3766 = vmatprep.subr.mxu1 %v762_v35 }
 0x16a   :  { %710 = vmatprep.mubr.f32.mxu1 %v5901_v0  ;;  %3767 = vmatpush3.msra.mxu1 %v746_v36  ;;  %v839_v0 = vld [vmem:[%s5903_s13 + $0x8] sm:$0xff] }
 0x16b   :  { %3768 = vmatprep.subr.mxu1 %v761_v37  ;;  %3744 = vmatpush3.msra.mxu0 %v740_v50 }
 0x16c   :  { %3769 = vmatpush3.msra.mxu1 %v745_v38  ;;  %3745 = vmatprep.subr.mxu0 %v755_v51 }
 0x16d   :  { %3579 = vmatmul.mubr.msk.f32.gmra.mxu1 %vm608_vm1, %v607_v27  ;;  %3770 = vmatprep.subr.mxu1 %v760_v40 }
 0x16e   :  { %3771 = vmatpush3.msra.mxu1 %v744_v41  ;;  %3746 = vmatpush3.msra.mxu0 %v739_v52 }
 0x16f   :  { %3772 = vmatprep.subr.mxu1 %v759_v42  ;;  %3747 = vmatprep.subr.mxu0 %v754_v53 }
 0x170   :  { %3773 = vmatpush3.msra.mxu1 %v743_v43  ;;  %3748 = vmatpush3.msra.mxu0 %v738_v54 }
 0x171   :  { %3774 = vmatprep.subr.mxu1 %v758_v44  ;;  %3749 = vmatprep.subr.mxu0 %v753_v55 }
 0x172   :  { %3775 = vmatpush3.msra.mxu1 %v742_v45  ;;  %3750 = vmatpush3.msra.mxu0 %v737_v56 }
 0x173   :  { %3776 = vmatprep.subr.mxu1 %v757_v46  ;;  %3751 = vmatprep.subr.mxu0 %v752_v57 }
 0x174   :  { %3777 = vmatpush3.msra.mxu1 %v741_v47  ;;  %3752 = vmatpush3.msra.mxu0 %v736_v58 }
 0x175   :  { %3778 = vmatprep.subr.mxu1 %v756_v49  ;;  %3753 = vmatprep.subr.mxu0 %v751_v59 }
 0x176   :  { %3779 = vmatpush3.msra.mxu1 %v740_v50  ;;  %3754 = vmatpush3.msra.mxu0 %v735_v60 }
 0x177   :  { %3780 = vmatprep.subr.mxu1 %v755_v51  ;;  %874 = vmatprep.subr.mxu0 %v841_v5 }
 0x178   :  { %3781 = vmatpush3.msra.mxu1 %v739_v52 }
 0x179   :  { %3782 = vmatprep.subr.mxu1 %v754_v53 }
 0x17a   :  { %3783 = vmatpush3.msra.mxu1 %v738_v54 }
 0x17b   :  { %3784 = vmatprep.subr.mxu1 %v753_v55 }
 0x17c   :  { %3785 = vmatpush3.msra.mxu1 %v737_v56 }
 0x17d   :  { %3786 = vmatprep.subr.mxu1 %v752_v57 }
 0x17e   :  { %3787 = vmatpush3.msra.mxu1 %v736_v58 }
 0x17f   :  { %3788 = vmatprep.subr.mxu1 %v751_v59 }
 0x180   :  { %3789 = vmatpush3.msra.mxu1 %v735_v60 }
 0x181   :  { %1061 = vmatprep.subr.mxu1 %v841_v5  ;;  %v3600_v5 = vld [vmem:[%s5904_s27 + $0x290] sm:$0xff] }
 0x221   :  { %v694_v61 = vpop.f32.mrf.mxu1 }
 0x223   :  { %v696_v28 = vpop.f32.mrf.mxu1 }
 0x225   :  { %v700_v26 = vpop.f32.mrf.mxu1 }
 0x226   :  { %v717_v25 = vadd.f32 %v700_v26, %v694_v61 }
 0x227   :  { %v702_v48 = vpop.f32.mrf.mxu1 }
 0x228   :  { %v726_v39 = vadd.f32 %v702_v48, %v696_v28 }
 0x229   :  { %v706_v23 = vpop.f32.mrf.mxu1 }
 0x22a   :  { %v718_v20 = vadd.f32 %v717_v25, %v706_v23 }
 0x22b   :  { %v708_v22 = vpop.f32.mrf.mxu1 }
 0x22c   :  { %v727_v1 = vadd.f32 %v726_v39, %v708_v22 }
 0x22d   :  { %v712_v19 = vpop.f32.mrf.mxu1 }
 0x22e   :  { %v719_v62 = vadd.f32 %v718_v20, %v712_v19 }
 0x22f   :  { %v714_v63 = vpop.f32.mrf.mxu1 }
 0x230   :  { %v720_v14 = vrot.slane %v719_v62, 4  ;;  %v728_v12 = vadd.f32 %v727_v1, %v714_v63 }
 0x232   :  { %v721_v16 = vadd.f32 %v720_v14, %v719_v62  ;;  %v729_v11 = vrot.slane %v728_v12, 4  ;;  %v3613_v14 = vld [vmem:[%s5904_s27 + $0x2f8] sm:$0xff] }
 0x234   :  { %v722_v17 = vrot.slane %v721_v16, 2  ;;  %v730_v9 = vadd.f32 %v729_v11, %v728_v12  ;;  %v3612_v12 = vld [vmem:[%s5904_s27 + $0x2f0] sm:$0xff]  ;;  %v3610_v11 = vld [vmem:[%s5904_s27 + $0x2e0] sm:$0xff] }
 0x236   :  { %v723_v15 = vadd.f32 %v722_v17, %v721_v16  ;;  %v731_v8 = vrot.slane %v730_v9, 2  ;;  %v3611_v16 = vld [vmem:[%s5904_s27 + $0x2e8] sm:$0xff]  ;;  %v3609_v17 = vld [vmem:[%s5904_s27 + $0x2d8] sm:$0xff] }
 0x238   :  { %v732_v13 = vadd.f32 %v731_v8, %v730_v9  ;;  %v724_v18 = vrot.slane %v723_v15, 1  ;;  %v3608_v9 = vld [vmem:[%s5904_s27 + $0x2d0] sm:$0xff]  ;;  %v3606_v8 = vld [vmem:[%s5904_s27 + $0x2c0] sm:$0xff] }
 0x23a   :  { %v733_v6 = vrot.slane %v732_v13, 1  ;;  %v725_v21 = vadd.f32 %v724_v18, %v723_v15  ;;  %v3607_v15 = vld [vmem:[%s5904_s27 + $0x2c8] sm:$0xff]  ;;  %v3604_v18 = vld [vmem:[%s5904_s27 + $0x2b0] sm:$0xff] }
 0x23c   :  { %v734_v10 = vadd.f32 %v733_v6, %v732_v13  ;;  %v3605_v13 = vld [vmem:[%s5904_s27 + $0x2b8] sm:$0xff]  ;;  %v3603_v6 = vld [vmem:[%s5904_s27 + $0x2a8] sm:$0xff] }
 0x23e   :  { %831 = vmatprep.mubr.f32.mxu0 %v734_v10  ;;  %v3602_v10 = vld [vmem:[%s5904_s27 + $0x2a0] sm:$0xff] }
 0x23f   :  { %832 = vmatmul.mubr.f32.vlgmr.msra.gmra.mxu0 %v725_v21  ;;  %v3601_v21 = vld [vmem:[%s5904_s27 + $0x298] sm:$0xff] }
 0x240   :  { %910 = vmatprep.mubr.f32.mxu0 %v4480_v24  ;;  %875 = vmatpush1.msra.mxu0 %v840_v3 }
 0x241   :  { %876 = vmatprep.subr.mxu0 %v839_v0 }
 0x242   :  { %877 = vmatpush1.msra.mxu0 %v838_v2 }
 0x243   :  { %1416 = vmatprep.subr.mxu0 %v3613_v14  ;;  %v1249_v14 = vld [vmem:[%s5904_s27 + $0x28] sm:$0xff] }
 0x2ff   :  { %v3755_v4 = vpop.f32.mrf.mxu0 }
 0x301   :  { %v3756_v7 = vpop.f32.mrf.mxu0 }
 0x302   :  { %v3757_v27 = vadd.f32 %v3756_v7, %v3755_v4  ;;  %v3596_v4 = vld [vmem:[%s5904_s27 + $0x270] sm:$0xff]  ;;  %v3595_v7 = vld [vmem:[%s5904_s27 + $0x268] sm:$0xff] }
 0x304   :  { %v837_v29 = vmul.f32 0.001953125, %v3757_v27 }
 0x306   :  { %3580 = vmatmul.mubr.msk.f32.vlgmr.msra.gmra.mxu0 %vm842_vm2, %v837_v29 }
 0x307   :  { %1417 = vmatpush1.msra.mxu0 %v3612_v12  ;;  %v3589_v12 = vld [vmem:[%s5904_s27 + $0x238] sm:$0xff] }
 0x308   :  { %1418 = vmatprep.subr.mxu0 %v3611_v16  ;;  %v1248_v16 = vld [vmem:[%s5904_s27 + $0x20] sm:$0xff] }
 0x309   :  { %1419 = vmatpush1.msra.mxu0 %v3610_v11  ;;  %v3588_v11 = vld [vmem:[%s5904_s27 + $0x230] sm:$0xff] }
 0x30a   :  { %1420 = vmatprep.subr.mxu0 %v3609_v17  ;;  %v1247_v17 = vld [vmem:[%s5904_s27 + $0x18] sm:$0xff] }
 0x30b   :  { %1421 = vmatpush1.msra.mxu0 %v3608_v9  ;;  %v3587_v9 = vld [vmem:[%s5904_s27 + $0x228] sm:$0xff] }
 0x30c   :  { %1422 = vmatprep.subr.mxu0 %v3607_v15  ;;  %v1246_v15 = vld [vmem:[%s5904_s27 + $0x10] sm:$0xff] }
 0x30d   :  { %1423 = vmatpush1.msra.mxu0 %v3606_v8  ;;  %v3586_v8 = vld [vmem:[%s5904_s27 + $0x220] sm:$0xff] }
 0x30e   :  { %1424 = vmatprep.subr.mxu0 %v3605_v13  ;;  %v1245_v13 = vld [vmem:[%s5904_s27 + $0x8] sm:$0xff] }
 0x30f   :  { %1425 = vmatpush1.msra.mxu0 %v3604_v18  ;;  %v3585_v18 = vld [vmem:[%s5904_s27 + $0x218] sm:$0xff] }
 0x310   :  { %1426 = vmatprep.subr.mxu0 %v3603_v6  ;;  %v1244_v6 = vld [vmem:[%s5904_s27] sm:$0xff] }
 0x311   :  { %1427 = vmatpush1.msra.mxu0 %v3602_v10  ;;  %v3584_v10 = vld [vmem:[%s5904_s27 + $0x210] sm:$0xff] }
 0x312   :  { %1428 = vmatprep.subr.mxu0 %v3601_v21  ;;  %v1307_v21 = vld [vmem:[%s5904_s27 + $0x1f8] sm:$0xff] }
 0x313   :  { %1429 = vmatpush1.msra.mxu0 %v3600_v5  ;;  %v3583_v5 = vld [vmem:[%s5904_s27 + $0x208] sm:$0xff] }
 0x3c6   :  { %v912_v33 = vpop.f32.mrf.mxu0 }
 0x3c7   :  { %v920_v34 = vrot.slane %v912_v33, %v4499_v32 }
 0x3c8   :  { %v914_v35 = vpop.f32.mrf.mxu0 }
 0x3c9   :  { %v4502_v36 = vsub.f32 %v694_v61, %v920_v34  ;;  %v4504_v37 = vsub.f32 %v700_v26, %v920_v34  ;;  %v4506_v38 = vsub.f32 %v706_v23, %v920_v34  ;;  %v924_v40 = vrot.slane %v914_v35, %v4499_v32  ;;  %v1273_v35 = vld [vmem:[%s5904_s27 + $0xe8] sm:$0xff] }
 0x3ca   :  { %v4509_v41 = vsub.f32 %v712_v19, %v920_v34  ;;  %v1274_v34 = vld [vmem:[%s5904_s27 + $0xf0] sm:$0xff] }
 0x3cb   :  { %v933_v42 = vmul.f32 %v4502_v36, %v4502_v36  ;;  %v935_v43 = vmul.f32 %v4504_v37, %v4504_v37  ;;  %v4515_v44 = vsub.f32 %v696_v28, %v924_v40  ;;  %v4517_v45 = vsub.f32 %v702_v48, %v924_v40 }
 0x3cc   :  { %v4519_v46 = vsub.f32 %v708_v22, %v924_v40  ;;  %v937_v47 = vmul.f32 %v4506_v38, %v4506_v38  ;;  %v4523_v50 = vsub.f32 %v714_v63, %v924_v40  ;;  %v939_v53 = vmul.f32 %v4509_v41, %v4509_v41  ;;  %v1275_v63 = vld [vmem:[%s5904_s27 + $0xf8] sm:$0xff]  ;;  %v1272_v40 = vld [vmem:[%s5904_s27 + $0xe0] sm:$0xff] }
 0x3cd   :  { %v941_v49 = vadd.f32 %v935_v43, %v933_v42  ;;  %v934_v51 = vmul.f32 %v4515_v44, %v4515_v44  ;;  %v936_v52 = vmul.f32 %v4517_v45, %v4517_v45  ;;  %v1271_v42 = vld [vmem:[%s5904_s27 + $0xd8] sm:$0xff]  ;;  %v1270_v43 = vld [vmem:[%s5904_s27 + $0xd0] sm:$0xff] }
 0x3ce   :  { %v938_v55 = vmul.f32 %v4519_v46, %v4519_v46  ;;  %v940_v58 = vmul.f32 %v4523_v50, %v4523_v50 }
 0x3cf   :  { %v942_v54 = vadd.f32 %v941_v49, %v937_v47  ;;  %v950_v56 = vadd.f32 %v936_v52, %v934_v51  ;;  %v1269_v47 = vld [vmem:[%s5904_s27 + $0xc8] sm:$0xff]  ;;  %v1268_v49 = vld [vmem:[%s5904_s27 + $0xc0] sm:$0xff]  ;;  %v1267_v51 = vld [vmem:[%s5904_s27 + $0xb8] sm:$0xff] }
 0x3d0   :  { %v1266_v52 = vld [vmem:[%s5904_s27 + $0xb0] sm:$0xff] }
 0x3d1   :  { %v943_v57 = vadd.f32 %v942_v54, %v939_v53  ;;  %v951_v59 = vadd.f32 %v950_v56, %v938_v55  ;;  %v1265_v53 = vld [vmem:[%s5904_s27 + $0xa8] sm:$0xff]  ;;  %v1264_v54 = vld [vmem:[%s5904_s27 + $0xa0] sm:$0xff]  ;;  %v1263_v55 = vld [vmem:[%s5904_s27 + $0x98] sm:$0xff] }
 0x3d2   :  { %v1262_v56 = vld [vmem:[%s5904_s27 + $0x90] sm:$0xff] }
 0x3d3   :  { %v944_v60 = vrot.slane %v943_v57, 4  ;;  %v952_v61 = vadd.f32 %v951_v59, %v940_v58  ;;  %v1260_v58 = vld [vmem:[%s5904_s27 + $0x80] sm:$0xff]  ;;  %v1259_v59 = vld [vmem:[%s5904_s27 + $0x78] sm:$0xff] }
 0x3d5   :  { %v945_v28 = vadd.f32 %v944_v60, %v943_v57  ;;  %v953_v26 = vrot.slane %v952_v61, 4  ;;  %v1261_v57 = vld [vmem:[%s5904_s27 + $0x88] sm:$0xff]  ;;  %v1258_v60 = vld [vmem:[%s5904_s27 + $0x70] sm:$0xff] }
 0x3d7   :  { %v946_v48 = vrot.slane %v945_v28, 2  ;;  %v954_v23 = vadd.f32 %v953_v26, %v952_v61  ;;  %v1257_v61 = vld [vmem:[%s5904_s27 + $0x68] sm:$0xff]  ;;  %v1255_v26 = vld [vmem:[%s5904_s27 + $0x58] sm:$0xff] }
 0x3d9   :  { %v947_v25 = vadd.f32 %v946_v48, %v945_v28  ;;  %v955_v22 = vrot.slane %v954_v23, 2  ;;  %v1256_v28 = vld [vmem:[%s5904_s27 + $0x60] sm:$0xff]  ;;  %v1254_v48 = vld [vmem:[%s5904_s27 + $0x50] sm:$0xff] }
 0x3db   :  { %v956_v39 = vadd.f32 %v955_v22, %v954_v23  ;;  %v948_v20 = vrot.slane %v947_v25, 1  ;;  %v3594_v23 = vld [vmem:[%s5904_s27 + $0x260] sm:$0xff]  ;;  %v3593_v22 = vld [vmem:[%s5904_s27 + $0x258] sm:$0xff] }
 0x3dd   :  { %v957_v19 = vrot.slane %v956_v39, 1  ;;  %v949_v62 = vadd.f32 %v948_v20, %v947_v25  ;;  %v1253_v25 = vld [vmem:[%s5904_s27 + $0x48] sm:$0xff]  ;;  %v3592_v20 = vld [vmem:[%s5904_s27 + $0x250] sm:$0xff] }
 0x3df   :  { %v958_v1 = vadd.f32 %v957_v19, %v956_v39  ;;  %v1252_v39 = vld [vmem:[%s5904_s27 + $0x40] sm:$0xff]  ;;  %v1251_v19 = vld [vmem:[%s5904_s27 + $0x38] sm:$0xff] }
 0x3e1   :  { %1023 = vmatprep.mubr.f32.mxu1 %v958_v1  ;;  %v3591_v1 = vld [vmem:[%s5904_s27 + $0x248] sm:$0xff] }
 0x3e2   :  { %1024 = vmatmul.mubr.f32.vlgmr.msra.gmra.mxu1 %v949_v62  ;;  %v1250_v62 = vld [vmem:[%s5904_s27 + $0x30] sm:$0xff] }
 0x3e3   :  { %1062 = vmatpush1.msra.mxu1 %v840_v3  ;;  %1097 = vmatprep.mubr.f32.mxu1 %v4480_v24  ;;  %v3599_v3 = vld [vmem:[%s5904_s27 + $0x288] sm:$0xff] }
 0x3e4   :  { %1063 = vmatprep.subr.mxu1 %v839_v0  ;;  %1430 = vmatprep.subr.mxu0 %v3599_v3  ;;  %v3598_v0 = vld [vmem:[%s5904_s27 + $0x280] sm:$0xff]  ;;  %v1306_v3 = vld [vmem:[%s5904_s27 + $0x1f0] sm:$0xff] }
 0x3e5   :  { %1064 = vmatpush1.msra.mxu1 %v838_v2  ;;  %1431 = vmatpush1.msra.mxu0 %v3598_v0  ;;  %v3597_v2 = vld [vmem:[%s5904_s27 + $0x278] sm:$0xff]  ;;  %v3582_v0 = vld [vmem:[%s5904_s27 + $0x200] sm:$0xff] }
 0x3e6   :  { %1511 = vmatprep.subr.mxu1 %v1275_v63  ;;  %1432 = vmatprep.subr.mxu0 %v3597_v2  ;;  %v3590_v63 = vld [vmem:[%s5904_s27 + $0x240] sm:$0xff]  ;;  %v1305_v2 = vld [vmem:[%s5904_s27 + $0x1e8] sm:$0xff] }
 0x3e7   :  { %1433 = vmatpush1.msra.mxu0 %v3596_v4  ;;  %v3645_v4 = vld [vmem:[%s5904_s27 + $0x3f8] sm:$0xff] }
 0x3e8   :  { %1434 = vmatprep.subr.mxu0 %v3595_v7  ;;  %v1304_v7 = vld [vmem:[%s5904_s27 + $0x1e0] sm:$0xff] }
 0x3e9   :  { %1435 = vmatpush1.msra.mxu0 %v3594_v23  ;;  %v1291_v23 = vld [vmem:[%s5904_s27 + $0x178] sm:$0xff] }
 0x3ea   :  { %1436 = vmatprep.subr.mxu0 %v3593_v22  ;;  %v1290_v22 = vld [vmem:[%s5904_s27 + $0x170] sm:$0xff] }
 0x3eb   :  { %1437 = vmatpush1.msra.mxu0 %v3592_v20  ;;  %v1289_v20 = vld [vmem:[%s5904_s27 + $0x168] sm:$0xff] }
 0x3ec   :  { %1438 = vmatprep.subr.mxu0 %v3591_v1  ;;  %v1288_v1 = vld [vmem:[%s5904_s27 + $0x160] sm:$0xff] }
 0x3ed   :  { %1439 = vmatpush1.msra.mxu0 %v3590_v63  ;;  %v1287_v63 = vld [vmem:[%s5904_s27 + $0x158] sm:$0xff] }
 0x3ee   :  { %1440 = vmatprep.subr.mxu0 %v3589_v12  ;;  %v1286_v12 = vld [vmem:[%s5904_s27 + $0x150] sm:$0xff] }
 0x3ef   :  { %1441 = vmatpush1.msra.mxu0 %v3588_v11  ;;  %v1285_v11 = vld [vmem:[%s5904_s27 + $0x148] sm:$0xff] }
 0x3f0   :  { %1442 = vmatprep.subr.mxu0 %v3587_v9  ;;  %v1284_v9 = vld [vmem:[%s5904_s27 + $0x140] sm:$0xff] }
 0x3f1   :  { %1443 = vmatpush1.msra.mxu0 %v3586_v8  ;;  %v1283_v8 = vld [vmem:[%s5904_s27 + $0x138] sm:$0xff] }
 0x3f2   :  { %1444 = vmatprep.subr.mxu0 %v3585_v18  ;;  %v1282_v18 = vld [vmem:[%s5904_s27 + $0x130] sm:$0xff] }
 0x3f3   :  { %1445 = vmatpush1.msra.mxu0 %v3584_v10  ;;  %v1281_v10 = vld [vmem:[%s5904_s27 + $0x128] sm:$0xff] }
 0x3f4   :  { %1446 = vmatprep.subr.mxu0 %v3583_v5  ;;  %v1280_v5 = vld [vmem:[%s5904_s27 + $0x120] sm:$0xff] }
 0x3f5   :  { %1447 = vmatpush1.msra.mxu0 %v3582_v0  ;;  %v1279_v0 = vld [vmem:[%s5904_s27 + $0x118] sm:$0xff] }
 0x3f6   :  { %1448 = vmatprep.subr.mxu0 %v3645_v4  ;;  %v1278_v4 = vld [vmem:[%s5904_s27 + $0x110] sm:$0xff] }
 0x4a2   :  { %v3790_v27 = vpop.f32.mrf.mxu1 }
 0x4a4   :  { %v3791_v29 = vpop.f32.mrf.mxu1 }
 0x4a5   :  { %v3792_v30 = vadd.f32 %v3791_v29, %v3790_v27  ;;  %v3644_v27 = vld [vmem:[%s5904_s27 + $0x3f0] sm:$0xff]  ;;  %v1303_v29 = vld [vmem:[%s5904_s27 + $0x1d8] sm:$0xff] }
 0x4a6   :  { %1449 = vmatpush2.msra.mxu0 %v3644_v27  ;;  %v1277_v27 = vld [vmem:[%s5904_s27 + $0x108] sm:$0xff] }
 0x4a7   :  { %v1029_v33 = vmul.f32 0.001953125, %v3792_v30  ;;  %v3643_v30 = vld [vmem:[%s5904_s27 + $0x3e8] sm:$0xff] }
 0x4a8   :  { %1450 = vmatprep.subr.mxu0 %v3643_v30  ;;  %v1276_v30 = vld [vmem:[%s5904_s27 + $0x100] sm:$0xff] }
 0x4a9   :  { %3581 = vmatmul.mubr.msk.f32.vlgmr.msra.gmra.mxu1 %vm842_vm2, %v1029_v33  ;;  %v1302_v33 = vld [vmem:[%s5904_s27 + $0x1d0] sm:$0xff] }
 0x4aa   :  { %1512 = vmatpush1.msra.mxu1 %v1274_v34  ;;  %v3642_v34 = vld [vmem:[%s5904_s27 + $0x3e0] sm:$0xff] }
 0x4ab   :  { %1513 = vmatprep.subr.mxu1 %v1273_v35  ;;  %1451 = vmatpush2.msra.mxu0 %v3642_v34  ;;  %v1301_v35 = vld [vmem:[%s5904_s27 + $0x1c8] sm:$0xff] }
 0x4ac   :  { %1514 = vmatpush1.msra.mxu1 %v1272_v40  ;;  %v3641_v40 = vld [vmem:[%s5904_s27 + $0x3d8] sm:$0xff]  ;;  %v3615_v34 = vld [vmem:[%s5904_s27 + $0x308] sm:$0xff] }
 0x4ad   :  { %1515 = vmatprep.subr.mxu1 %v1271_v42  ;;  %1452 = vmatprep.subr.mxu0 %v3641_v40  ;;  %v1300_v42 = vld [vmem:[%s5904_s27 + $0x1c0] sm:$0xff]  ;;  %v3677_v40 = vld [vmem:[%s5904_s27 + $0x4f8] sm:$0xff] }
 0x4ae   :  { %1516 = vmatpush1.msra.mxu1 %v1270_v43  ;;  %v3640_v43 = vld [vmem:[%s5904_s27 + $0x3d0] sm:$0xff] }
 0x4af   :  { %1517 = vmatprep.subr.mxu1 %v1269_v47  ;;  %1453 = vmatpush2.msra.mxu0 %v3640_v43  ;;  %v1299_v47 = vld [vmem:[%s5904_s27 + $0x1b8] sm:$0xff] }
 0x4b0   :  { %1518 = vmatpush1.msra.mxu1 %v1268_v49  ;;  %v3639_v49 = vld [vmem:[%s5904_s27 + $0x3c8] sm:$0xff] }
 0x4b1   :  { %1519 = vmatprep.subr.mxu1 %v1267_v51  ;;  %1454 = vmatprep.subr.mxu0 %v3639_v49  ;;  %v1298_v51 = vld [vmem:[%s5904_s27 + $0x1b0] sm:$0xff] }
 0x4b2   :  { %1520 = vmatpush1.msra.mxu1 %v1266_v52  ;;  %v3638_v52 = vld [vmem:[%s5904_s27 + $0x3c0] sm:$0xff] }
 0x4b3   :  { %1521 = vmatprep.subr.mxu1 %v1265_v53  ;;  %1455 = vmatpush2.msra.mxu0 %v3638_v52  ;;  %v1297_v53 = vld [vmem:[%s5904_s27 + $0x1a8] sm:$0xff]  ;;  %v1142_v52 = vld [vmem:[%s5906_s2] sm:$0x3] }
 0x4b4   :  { %1522 = vmatpush1.msra.mxu1 %v1264_v54  ;;  %v3637_v54 = vld [vmem:[%s5904_s27 + $0x3b8] sm:$0xff] }
 0x4b5   :  { %1523 = vmatprep.subr.mxu1 %v1263_v55  ;;  %1456 = vmatprep.subr.mxu0 %v3637_v54  ;;  %v1296_v55 = vld [vmem:[%s5904_s27 + $0x1a0] sm:$0xff]  ;;  %v4931_v54 = vsub.s32 1, %v4496_v31 }
 0x4b6   :  { %1524 = vmatpush1.msra.mxu1 %v1262_v56  ;;  %v3636_v56 = vld [vmem:[%s5904_s27 + $0x3b0] sm:$0xff] }
 0x4b7   :  { %1525 = vmatprep.subr.mxu1 %v1261_v57  ;;  %1457 = vmatpush2.msra.mxu0 %v3636_v56  ;;  %v1295_v57 = vld [vmem:[%s5904_s27 + $0x198] sm:$0xff] }
 0x4b8   :  { %1526 = vmatpush1.msra.mxu1 %v1260_v58  ;;  %v3635_v58 = vld [vmem:[%s5904_s27 + $0x3a8] sm:$0xff] }
 0x4b9   :  { %1527 = vmatprep.subr.mxu1 %v1259_v59  ;;  %1458 = vmatprep.subr.mxu0 %v3635_v58  ;;  %v1294_v59 = vld [vmem:[%s5904_s27 + $0x190] sm:$0xff]  ;;  %v1147_v58 = vrot.slane %v1142_v52, %v4499_v32 }
 0x4ba   :  { %1528 = vmatpush1.msra.mxu1 %v1258_v60  ;;  %v3634_v60 = vld [vmem:[%s5904_s27 + $0x3a0] sm:$0xff] }
 0x4bb   :  { %1529 = vmatprep.subr.mxu1 %v1257_v61  ;;  %1459 = vmatpush2.msra.mxu0 %v3634_v60  ;;  %v1293_v61 = vld [vmem:[%s5904_s27 + $0x188] sm:$0xff] }
 0x4bc   :  { %1530 = vmatpush1.msra.mxu1 %v1256_v28  ;;  %v3633_v28 = vld [vmem:[%s5904_s27 + $0x398] sm:$0xff] }
 0x4bd   :  { %1531 = vmatprep.subr.mxu1 %v1255_v26  ;;  %1460 = vmatprep.subr.mxu0 %v3633_v28  ;;  %v1292_v26 = vld [vmem:[%s5904_s27 + $0x180] sm:$0xff] }
 0x4be   :  { %1532 = vmatpush1.msra.mxu1 %v1254_v48  ;;  %v3632_v48 = vld [vmem:[%s5904_s27 + $0x390] sm:$0xff] }
 0x4bf   :  { %1533 = vmatprep.subr.mxu1 %v1253_v25  ;;  %1461 = vmatpush2.msra.mxu0 %v3632_v48  ;;  %v3631_v25 = vld [vmem:[%s5904_s27 + $0x388] sm:$0xff]  ;;  %v1151_v48 = vrot.slane %v1142_v52, %v4931_v54 }
 0x4c0   :  { %1534 = vmatpush1.msra.mxu1 %v1252_v39  ;;  %1462 = vmatprep.subr.mxu0 %v3631_v25  ;;  %v3630_v39 = vld [vmem:[%s5904_s27 + $0x380] sm:$0xff] }
 0x4c1   :  { %1535 = vmatprep.subr.mxu1 %v1251_v19  ;;  %1463 = vmatpush2.msra.mxu0 %v3630_v39  ;;  %v3629_v19 = vld [vmem:[%s5904_s27 + $0x378] sm:$0xff] }
 0x4c2   :  { %1536 = vmatpush1.msra.mxu1 %v1250_v62  ;;  %1464 = vmatprep.subr.mxu0 %v3629_v19  ;;  %v3628_v62 = vld [vmem:[%s5904_s27 + $0x370] sm:$0xff] }
 0x4c3   :  { %1537 = vmatprep.subr.mxu1 %v1249_v14  ;;  %1465 = vmatpush2.msra.mxu0 %v3628_v62  ;;  %v3627_v14 = vld [vmem:[%s5904_s27 + $0x368] sm:$0xff] }
 0x4c4   :  { %1538 = vmatpush1.msra.mxu1 %v1248_v16  ;;  %1466 = vmatprep.subr.mxu0 %v3627_v14  ;;  %v3626_v16 = vld [vmem:[%s5904_s27 + $0x360] sm:$0xff] }
 0x4c5   :  { %1539 = vmatprep.subr.mxu1 %v1247_v17  ;;  %1467 = vmatpush2.msra.mxu0 %v3626_v16  ;;  %v3625_v17 = vld [vmem:[%s5904_s27 + $0x358] sm:$0xff] }
 0x4c6   :  { %1540 = vmatpush1.msra.mxu1 %v1246_v15  ;;  %1468 = vmatprep.subr.mxu0 %v3625_v17  ;;  %v3624_v15 = vld [vmem:[%s5904_s27 + $0x350] sm:$0xff] }
 0x4c7   :  { %1541 = vmatprep.subr.mxu1 %v1245_v13  ;;  %1469 = vmatpush2.msra.mxu0 %v3624_v15  ;;  %v3623_v13 = vld [vmem:[%s5904_s27 + $0x348] sm:$0xff] }
 0x4c8   :  { %1542 = vmatpush1.msra.mxu1 %v1244_v6  ;;  %1470 = vmatprep.subr.mxu0 %v3623_v13  ;;  %v3622_v6 = vld [vmem:[%s5904_s27 + $0x340] sm:$0xff] }
 0x4c9   :  { %1543 = vmatprep.subr.mxu1 %v1307_v21  ;;  %1471 = vmatpush2.msra.mxu0 %v3622_v6  ;;  %v3621_v21 = vld [vmem:[%s5904_s27 + $0x338] sm:$0xff] }
 0x4ca   :  { %1544 = vmatpush2.msra.mxu1 %v1306_v3  ;;  %v3620_v3 = vld [vmem:[%s5904_s27 + $0x330] sm:$0xff]  ;;  %1472 = vmatprep.subr.mxu0 %v3621_v21 }
 0x4cb   :  { %1545 = vmatprep.subr.mxu1 %v1305_v2  ;;  %v3619_v2 = vld [vmem:[%s5904_s27 + $0x328] sm:$0xff]  ;;  %1473 = vmatpush2.msra.mxu0 %v3620_v3 }
 0x4cc   :  { %1546 = vmatpush2.msra.mxu1 %v1304_v7  ;;  %v3618_v7 = vld [vmem:[%s5904_s27 + $0x320] sm:$0xff]  ;;  %1474 = vmatprep.subr.mxu0 %v3619_v2 }
 0x4cd   :  { %1547 = vmatprep.subr.mxu1 %v1303_v29  ;;  %v3617_v29 = vld [vmem:[%s5904_s27 + $0x318] sm:$0xff]  ;;  %1475 = vmatpush2.msra.mxu0 %v3618_v7 }
 0x4ce   :  { %1548 = vmatpush2.msra.mxu1 %v1302_v33  ;;  %1476 = vmatprep.subr.mxu0 %v3617_v29  ;;  %v3616_v33 = vld [vmem:[%s5904_s27 + $0x310] sm:$0xff] }
 0x4cf   :  { %1549 = vmatprep.subr.mxu1 %v1301_v35  ;;  %1477 = vmatpush2.msra.mxu0 %v3616_v33  ;;  %v3614_v35 = vld [vmem:[%s5904_s27 + $0x300] sm:$0xff] }
 0x4d0   :  { %1550 = vmatpush2.msra.mxu1 %v1300_v42  ;;  %1478 = vmatprep.subr.mxu0 %v3615_v34 }
 0x4d1   :  { %1551 = vmatprep.subr.mxu1 %v1299_v47  ;;  %1479 = vmatpush2.msra.mxu0 %v3614_v35 }
 0x4d2   :  { %1552 = vmatpush2.msra.mxu1 %v1298_v51  ;;  %1708 = vmatprep.subr.mxu0 %v3677_v40  ;;  %v1122_v51 = vld [vmem:[%s5905_s7] sm:$0x3] }
 0x4d3   :  { %1553 = vmatprep.subr.mxu1 %v1297_v53  ;;  %v1127_v56 = vrot.slane %v1122_v51, %v4499_v32  ;;  %v1131_v31 = vrot.slane %v1122_v51, %v4931_v54 }
 0x4d4   :  { %1554 = vmatpush2.msra.mxu1 %v1296_v55 }
 0x4d5   :  { %1555 = vmatprep.subr.mxu1 %v1295_v57 }
 0x4d6   :  { %1556 = vmatpush2.msra.mxu1 %v1294_v59 }
 0x4d7   :  { %1557 = vmatprep.subr.mxu1 %v1293_v61 }
 0x4d8   :  { %1558 = vmatpush2.msra.mxu1 %v1292_v26 }
 0x4d9   :  { %1559 = vmatprep.subr.mxu1 %v1291_v23 }
 0x4da   :  { %1560 = vmatpush2.msra.mxu1 %v1290_v22 }
 0x4db   :  { %1561 = vmatprep.subr.mxu1 %v1289_v20 }
 0x4dc   :  { %1562 = vmatpush2.msra.mxu1 %v1288_v1 }
 0x4dd   :  { %1563 = vmatprep.subr.mxu1 %v1287_v63 }
 0x4de   :  { %1564 = vmatpush2.msra.mxu1 %v1286_v12 }
 0x4df   :  { %1565 = vmatprep.subr.mxu1 %v1285_v11 }
 0x4e0   :  { %1566 = vmatpush2.msra.mxu1 %v1284_v9 }
 0x4e1   :  { %1567 = vmatprep.subr.mxu1 %v1283_v8 }
 0x4e2   :  { %1568 = vmatpush2.msra.mxu1 %v1282_v18 }
 0x4e3   :  { %1569 = vmatprep.subr.mxu1 %v1281_v10 }
 0x4e4   :  { %1570 = vmatpush2.msra.mxu1 %v1280_v5 }
 0x4e5   :  { %1571 = vmatprep.subr.mxu1 %v1279_v0 }
 0x4e6   :  { %1572 = vmatpush2.msra.mxu1 %v1278_v4 }
 0x4e7   :  { %1573 = vmatprep.subr.mxu1 %v1277_v27 }
 0x4e8   :  { %1574 = vmatpush2.msra.mxu1 %v1276_v30 }
 0x569   :  { %v1099_v42 = vpop.f32.mrf.mxu1 }
 0x56a   :  { %v1100_v43 = vadd.f32 1e-05, %v1099_v42 }
 0x56b   :  { %v1101_v47 = vpop.f32.mrf.mxu1 }
 0x56c   :  { %3981 = vrsqrt.f32 %v1100_v43  ;;  %v1102_v49 = vadd.f32 1e-05, %v1101_v47 }
 0x56e   :  { %3983 = vrsqrt.f32 %v1102_v49 }
 0x579   :  { %v3982_v53 = vpop.eup %3981 }
 0x57a   :  { %v1109_v55 = vrot.slane %v3982_v53, %v4499_v32 }
 0x57b   :  { %v3984_v57 = vpop.eup %3983 }
 0x57c   :  { %v1114_v59 = vmul.f32 %v1109_v55, %v4502_v36  ;;  %v1116_v60 = vmul.f32 %v1109_v55, %v4504_v37  ;;  %v1118_v61 = vmul.f32 %v1109_v55, %v4506_v38  ;;  %v1120_v28 = vmul.f32 %v1109_v55, %v4509_v41 }
 0x57d   :  { %v1113_v26 = vrot.slane %v3984_v57, %v4499_v32 }
 0x57e   :  { %v1134_v23 = vmul.f32 %v1127_v56, %v1114_v59  ;;  %v1136_v25 = vmul.f32 %v1127_v56, %v1116_v60  ;;  %v1138_v22 = vmul.f32 %v1127_v56, %v1118_v61  ;;  %v1140_v39 = vmul.f32 %v1127_v56, %v1120_v28 }
 0x57f   :  { %v1115_v36 = vmul.f32 %v1113_v26, %v4515_v44  ;;  %v1117_v37 = vmul.f32 %v1113_v26, %v4517_v45  ;;  %v1119_v38 = vmul.f32 %v1113_v26, %v4519_v46  ;;  %v1121_v41 = vmul.f32 %v1113_v26, %v4523_v50 }
 0x580   :  { %v1154_v20 = vadd.f32 %v1147_v58, %v1134_v23  ;;  %v1156_v19 = vadd.f32 %v1147_v58, %v1136_v25  ;;  %v1158_v1 = vadd.f32 %v1147_v58, %v1138_v22  ;;  %v1160_v62 = vadd.f32 %v1147_v58, %v1140_v39 }
 0x581   :  { %v1135_v63 = vmul.f32 %v1131_v31, %v1115_v36  ;;  %v1137_v14 = vmul.f32 %v1131_v31, %v1117_v37  ;;  %v1139_v12 = vmul.f32 %v1131_v31, %v1119_v38  ;;  %v1141_v16 = vmul.f32 %v1131_v31, %v1121_v41  ;;  %v3676_v38 = vld [vmem:[%s5904_s27 + $0x4f0] sm:$0xff] }
 0x582   :  { %v1162_v11 = vmul.f32 0.2, %v1154_v20  ;;  %v1164_v17 = vmul.f32 0.2, %v1156_v19  ;;  %v1166_v9 = vmul.f32 0.2, %v1158_v1 }
 0x583   :  { %v1168_v15 = vmul.f32 0.2, %v1160_v62  ;;  %v1155_v8 = vadd.f32 %v1151_v48, %v1135_v63  ;;  %v1157_v44 = vadd.f32 %v1151_v48, %v1137_v14  ;;  %v1159_v13 = vadd.f32 %v1151_v48, %v1139_v12  ;;  %v3674_v63 = vld [vmem:[%s5904_s27 + $0x4e0] sm:$0xff]  ;;  %v3673_v14 = vld [vmem:[%s5904_s27 + $0x4d8] sm:$0xff]  ;;  %v3672_v12 = vld [vmem:[%s5904_s27 + $0x4d0] sm:$0xff] }
 0x584   :  { %v1170_v45 = vmax.f32 %v1154_v20, %v1162_v11  ;;  %v1172_v18 = vmax.f32 %v1156_v19, %v1164_v17  ;;  %v1174_v46 = vmax.f32 %v1158_v1, %v1166_v9  ;;  %v1161_v6 = vadd.f32 %v1151_v48, %v1141_v16  ;;  %v3675_v19 = vld [vmem:[%s5904_s27 + $0x4e8] sm:$0xff] }
 0x585   :  { %v1176_v50 = vmax.f32 %v1160_v62, %v1168_v15  ;;  %v1163_v10 = vmul.f32 0.2, %v1155_v8  ;;  %v1165_v21 = vmul.f32 0.2, %v1157_v44  ;;  %v1167_v5 = vmul.f32 0.2, %v1159_v13 }
 0x586   :  { %v1193_v3 = vrot.slane %v1170_v45, 7  ;;  %v1195_v0 = vrot.slane %v1172_v18, 7  ;;  %v1216_v2 = vrot.slane %v1174_v46, 5  ;;  %v1169_v4 = vmul.f32 0.2, %v1161_v6  ;;  %v3671_v9 = vld [vmem:[%s5904_s27 + $0x4c8] sm:$0xff] }
 0x587   :  { %v1218_v7 = vrot.slane %v1176_v50, 5  ;;  %v1171_v27 = vmax.f32 %v1155_v8, %v1163_v10  ;;  %v1173_v29 = vmax.f32 %v1157_v44, %v1165_v21  ;;  %v1175_v30 = vmax.f32 %v1159_v13, %v1167_v5  ;;  %v3670_v8 = vld [vmem:[%s5904_s27 + $0x4c0] sm:$0xff]  ;;  %v3669_v44 = vld [vmem:[%s5904_s27 + $0x4b8] sm:$0xff]  ;;  %v3668_v46 = vld [vmem:[%s5904_s27 + $0x4b0] sm:$0xff] }
 0x588   :  { %v4948_v33 = vsel %vm1192_vm3, %v1193_v3, %v1195_v0  ;;  %1205 = vst [vmem:[#allocation2 + $0x30] sm:$0xfe] %v1193_v3  ;;  %1209 = vst [vmem:[#allocation2 + $0x48] sm:$0x1] %v1195_v0  ;;  %v1177_v34 = vmax.f32 %v1161_v6, %v1169_v4  ;;  %v3667_v50 = vld [vmem:[%s5904_s27 + $0x4a8] sm:$0xff]  ;;  %v3666_v3 = vld [vmem:[%s5904_s27 + $0x4a0] sm:$0xff] }
 0x589   :  { %1228 = vst [vmem:[#allocation2 + $0x48] sm:$0xf8] %v1216_v2  ;;  %v4951_v35 = vsel %vm1215_vm4, %v1216_v2, %v1218_v7  ;;  %1232 = vst [vmem:[#allocation2 + $0x40] sm:$0x7] %v1218_v7  ;;  %v1194_v40 = vrot.slane %v1171_v27, 7  ;;  %v1197_v42 = vrot.slane %v1173_v29, 7 }
 0x58a   :  { %v1217_v43 = vrot.slane %v1175_v30, 5  ;;  %v1220_v47 = vrot.slane %v1177_v34, 5  ;;  %v1681_v55 = vrot.slane %v4948_v33, 2  ;;  %v1690_v61 = vrot.slane %v4951_v35, 2  ;;  %v3665_v0 = vld [vmem:[%s5904_s27 + $0x498] sm:$0xff]  ;;  %v3664_v4 = vld [vmem:[%s5904_s27 + $0x490] sm:$0xff] }
 0x58b   :  { %v4954_v49 = vsel %vm1192_vm3, %v1194_v40, %v1197_v42  ;;  %1210 = vst [vmem:[#allocation2 + $0x28] sm:$0x1] %v1197_v42  ;;  %1206 = vst [vmem:[#allocation2] sm:$0xfe] %v1194_v40  ;;  %v1389_v48 = vrot.slane %v4948_v33, 1  ;;  %v1398_v13 = vrot.slane %v4951_v35, 1 }
 0x58c   :  { %1229 = vst [vmem:[#allocation2 + $0x28] sm:$0xf8] %v1217_v43  ;;  %v4957_v51 = vsel %vm1215_vm4, %v1217_v43, %v1220_v47  ;;  %1233 = vst [vmem:[#allocation2 + $0x38] sm:$0x7] %v1220_v47  ;;  %v1392_v26 = vrot.slane %v4954_v49, 1  ;;  %v3663_v27 = vld [vmem:[%s5904_s27 + $0x488] sm:$0xff] }
 0x58d   :  { %v1692_v39 = vrot.slane %v4957_v51, 2  ;;  %v1400_v11 = vrot.slane %v4957_v51, 1  ;;  %v3662_v30 = vld [vmem:[%s5904_s27 + $0x480] sm:$0xff]  ;;  %v3661_v40 = vld [vmem:[%s5904_s27 + $0x478] sm:$0xff]  ;;  %v1684_v42 = vrot.slane %v4954_v49, 2  ;;  %v3660_v43 = vld [vmem:[%s5904_s27 + $0x470] sm:$0xff] }
 0x58e   :  { %v3659_v47 = vld [vmem:[%s5904_s27 + $0x468] sm:$0xff] }
 0x58f   :  { %v1308_v52 = vld [vmem:[#allocation2 + $0x30] sm:$0xfe] }
 0x590   :  { %v1238_v53 = vld [vmem:[#allocation2 + $0x48] sm:$0xff]  ;;  %v1388_v59 = vrot.slane %v1308_v52, 1  ;;  %v1234_v28 = vld [vmem:[#allocation2 + $0x30] sm:$0xff]  ;;  %v1310_v18 = vld [vmem:[#allocation2 + $0x40] sm:$0x7] }
 0x591   :  { %v1686_v56 = vrot.slane %v1238_v53, 2  ;;  %v1394_v1 = vrot.slane %v1238_v53, 1  ;;  %v1402_v10 = vrot.slane %v1310_v18, 1  ;;  %v1242_v29 = vld [vmem:[#allocation2 + $0x40] sm:$0x3]  ;;  %v3693_v18 = vld [vmem:[%s5904_s27 + $0x578] sm:$0xff] }
 0x592   :  { %v1235_v57 = vld [vmem:[#allocation2] sm:$0xff]  ;;  %v1390_v41 = vsel %vm1387_vm6, %v1388_v59, %v1389_v48  ;;  %v3653_v59 = vld [vmem:[%s5904_s27 + $0x438] sm:$0xff] }
 0x593   :  { %v1309_v58 = vld [vmem:[#allocation2] sm:$0xfe]  ;;  %v4960_v60 = vld [vmem:[#allocation2 + $0x28] sm:$0xff]  ;;  %1575 = vmatprep.mubr.f32.mxu1 %v1235_v57  ;;  %v4968_v23 = vsel %vm1679_vm5, %v1681_v55, %v1686_v56  ;;  %v4976_v36 = vsel %vm1679_vm5, %v1686_v56, %v1690_v61  ;;  %v1395_v16 = vsel %vm1387_vm6, %v1389_v48, %v1394_v1  ;;  %v1311_v17 = vld [vmem:[#allocation2 + $0x38] sm:$0x7]  ;;  %v1399_v6 = vsel %vm1387_vm6, %v1394_v1, %v1398_v13 }
 0x594   :  { %v1391_v31 = vrot.slane %v1309_v58, 1  ;;  %1576 = vmatmul.mubr.f32.vlgmr.msra.gmra.mxu1 %v1234_v28  ;;  %v1396_v25 = vrot.slane %v4960_v60, 1  ;;  %v1688_v22 = vrot.slane %v4960_v60, 2  ;;  %v1404_v45 = vrot.slane %v1311_v17, 1  ;;  %v1243_v5 = vld [vmem:[#allocation2 + $0x38] sm:$0x3] }
 0x595   :  { %1581 = vmatprep.mubr.f32.mxu1 %v4954_v49  ;;  %v1607_v2 = vld [vmem:[#allocation2] sm:$0xfc]  ;;  %v1403_v7 = vsel %vm1387_vm6, %v1398_v13, %v1402_v10  ;;  %v3657_v56 = vld [vmem:[%s5904_s27 + $0x458] sm:$0xff]  ;;  %v3655_v57 = vld [vmem:[%s5904_s27 + $0x448] sm:$0xff] }
 0x596   :  { %v1393_v37 = vsel %vm1387_vm6, %v1391_v31, %v1392_v26  ;;  %v4989_v20 = vsel %vm1679_vm5, %v1688_v22, %v1692_v39  ;;  %v1397_v62 = vsel %vm1387_vm6, %v1392_v26, %v1396_v25  ;;  %v1401_v15 = vsel %vm1387_vm6, %v1396_v25, %v1400_v11  ;;  %v3654_v58 = vld [vmem:[%s5904_s27 + $0x440] sm:$0xff]  ;;  %v3652_v28 = vld [vmem:[%s5904_s27 + $0x430] sm:$0xff]  ;;  %v3651_v26 = vld [vmem:[%s5904_s27 + $0x428] sm:$0xff] }
 0x597   :  { %1480 = vmatprep.mubr.f32.mxu0 %v1393_v37  ;;  %v1405_v21 = vsel %vm1387_vm6, %v1400_v11, %v1404_v45  ;;  %v1683_v34 = vrot.slane %v1607_v2, 2  ;;  %v3650_v31 = vld [vmem:[%s5904_s27 + $0x420] sm:$0xff]  ;;  %v3649_v48 = vld [vmem:[%s5904_s27 + $0x418] sm:$0xff]  ;;  %v3648_v25 = vld [vmem:[%s5904_s27 + $0x410] sm:$0xff] }
 0x598   :  { %1481 = vmatmul.mubr.f32.vlgmr.msra.gmra.mxu0 %v1390_v41  ;;  %1582 = vmatmul.mubr.f32.gmra.mxu1 %v4948_v33  ;;  %v3647_v37 = vld [vmem:[%s5904_s27 + $0x408] sm:$0xff]  ;;  %v3709_v41 = vld [vmem:[%s5904_s27 + $0x5f8] sm:$0xff]  ;;  %v3700_v17 = vld [vmem:[%s5904_s27 + $0x5b0] sm:$0xff] }
 0x599   :  { %1709 = vmatpush1.msra.mxu0 %v3676_v38  ;;  %1486 = vmatprep.mubr.f32.mxu0 %v1397_v62  ;;  %v1685_v52 = vsel %vm1679_vm5, %v1683_v34, %v1684_v42  ;;  %v3646_v38 = vld [vmem:[%s5904_s27 + $0x400] sm:$0xff]  ;;  %v3707_v1 = vld [vmem:[%s5904_s27 + $0x5e8] sm:$0xff]  ;;  %v3701_v11 = vld [vmem:[%s5904_s27 + $0x5b8] sm:$0xff] }
 0x59a   :  { %1587 = vmatprep.mubr.f32.mxu1 %v4960_v60  ;;  %1710 = vmatprep.subr.mxu0 %v3675_v19  ;;  %v3708_v19 = vld [vmem:[%s5904_s27 + $0x5f0] sm:$0xff]  ;;  %v3706_v62 = vld [vmem:[%s5904_s27 + $0x5e0] sm:$0xff]  ;;  %v3695_v13 = vld [vmem:[%s5904_s27 + $0x588] sm:$0xff] }
 0x59b   :  { %1711 = vmatpush1.msra.mxu0 %v3674_v63  ;;  %v3705_v63 = vld [vmem:[%s5904_s27 + $0x5d8] sm:$0xff]  ;;  %v3684_v2 = vld [vmem:[%s5904_s27 + $0x530] sm:$0xff]  ;;  %v3679_v34 = vld [vmem:[%s5904_s27 + $0x508] sm:$0xff] }
 0x59c   :  { %1712 = vmatprep.subr.mxu0 %v3673_v14  ;;  %1487 = vmatmul.mubr.f32.gmra.mxu0 %v1395_v16  ;;  %v3704_v14 = vld [vmem:[%s5904_s27 + $0x5d0] sm:$0xff]  ;;  %v3702_v16 = vld [vmem:[%s5904_s27 + $0x5c0] sm:$0xff] }
 0x59d   :  { %1588 = vmatmul.mubr.f32.gmra.mxu1 %v1238_v53  ;;  %1713 = vmatpush1.msra.mxu0 %v3672_v12  ;;  %v3658_v53 = vld [vmem:[%s5904_s27 + $0x460] sm:$0xff]  ;;  %v3703_v12 = vld [vmem:[%s5904_s27 + $0x5c8] sm:$0xff] }
 0x59e   :  { %1492 = vmatprep.mubr.f32.mxu0 %v1401_v15  ;;  %1593 = vmatprep.mubr.f32.mxu1 %v4957_v51  ;;  %v3698_v15 = vld [vmem:[%s5904_s27 + $0x5a0] sm:$0xff] }
 0x59f   :  { %1714 = vmatprep.subr.mxu0 %v3671_v9  ;;  %v3699_v9 = vld [vmem:[%s5904_s27 + $0x5a8] sm:$0xff] }
 0x5a0   :  { %1715 = vmatpush1.msra.mxu0 %v3670_v8  ;;  %v3697_v8 = vld [vmem:[%s5904_s27 + $0x598] sm:$0xff] }
 0x5a1   :  { %1716 = vmatprep.subr.mxu0 %v3669_v44  ;;  %1493 = vmatmul.mubr.f32.gmra.mxu0 %v1399_v6  ;;  %v3696_v44 = vld [vmem:[%s5904_s27 + $0x590] sm:$0xff]  ;;  %v3691_v6 = vld [vmem:[%s5904_s27 + $0x568] sm:$0xff] }
 0x5a2   :  { %1594 = vmatmul.mubr.f32.gmra.mxu1 %v4951_v35  ;;  %1717 = vmatpush1.msra.mxu0 %v3668_v46  ;;  %v3692_v46 = vld [vmem:[%s5904_s27 + $0x570] sm:$0xff] }
 0x5a3   :  { %1498 = vmatprep.mubr.f32.mxu0 %v1405_v21  ;;  %1599 = vmatprep.mubr.f32.mxu1 %v1243_v5  ;;  %v3688_v21 = vld [vmem:[%s5904_s27 + $0x550] sm:$0xff]  ;;  %v3687_v5 = vld [vmem:[%s5904_s27 + $0x548] sm:$0xff] }
 0x5a4   :  { %1718 = vmatprep.subr.mxu0 %v3667_v50  ;;  %v3690_v50 = vld [vmem:[%s5904_s27 + $0x560] sm:$0xff] }
 0x5a5   :  { %1719 = vmatpush1.msra.mxu0 %v3666_v3  ;;  %v3686_v3 = vld [vmem:[%s5904_s27 + $0x540] sm:$0xff] }
 0x5a6   :  { %1720 = vmatprep.subr.mxu0 %v3665_v0  ;;  %1499 = vmatmul.mubr.f32.gmra.mxu0 %v1403_v7  ;;  %v3685_v0 = vld [vmem:[%s5904_s27 + $0x538] sm:$0xff]  ;;  %v3682_v7 = vld [vmem:[%s5904_s27 + $0x520] sm:$0xff] }
 0x5a7   :  { %1600 = vmatmul.mubr.f32.gmra.mxu1 %v1242_v29  ;;  %1721 = vmatpush1.msra.mxu0 %v3664_v4  ;;  %v3683_v4 = vld [vmem:[%s5904_s27 + $0x528] sm:$0xff]  ;;  %v3681_v29 = vld [vmem:[%s5904_s27 + $0x518] sm:$0xff] }
 0x5a8   :  { %1504 = vmatprep.mubr.f32.mxu0 %v1404_v45  ;;  %1722 = vmatprep.subr.mxu0 %v3663_v27  ;;  %v3694_v45 = vld [vmem:[%s5904_s27 + $0x580] sm:$0xff]  ;;  %v1606_v27 = vld [vmem:[#allocation2 + $0x30] sm:$0xfc] }
 0x5a9   :  { %1723 = vmatpush1.msra.mxu0 %v3662_v30  ;;  %1892 = vmatprep.mubr.f32.mxu1 %v4480_v24  ;;  %v3656_v24 = vld [vmem:[%s5904_s27 + $0x450] sm:$0xff] }
 0x5aa   :  { %1724 = vmatprep.subr.mxu0 %v3661_v40  ;;  %1505 = vmatmul.mubr.f32.gmra.mxu0 %v1402_v10  ;;  %v3689_v10 = vld [vmem:[%s5904_s27 + $0x558] sm:$0xff]  ;;  %v3680_v30 = vld [vmem:[%s5904_s27 + $0x510] sm:$0xff]  ;;  %v1680_v40 = vrot.slane %v1606_v27, 2 }
 0x5ab   :  { %1725 = vmatpush1.msra.mxu0 %v3660_v43  ;;  %1772 = vmatprep.mubr.f32.mxu0 %v1685_v52  ;;  %v3678_v43 = vld [vmem:[%s5904_s27 + $0x500] sm:$0xff]  ;;  %v1689_v52 = vsel %vm1679_vm5, %v1684_v42, %v1688_v22 }
 0x5ac   :  { %1726 = vmatprep.subr.mxu0 %v3659_v47  ;;  %v1682_v47 = vsel %vm1679_vm5, %v1680_v40, %v1681_v55  ;;  %v5211_v55 = vld [vmem:[#allocation3 + $0x8] sm:$0xff] }
 0x5ad   :  { %1727 = vmatpush1.msra.mxu0 %v3658_v53  ;;  %v1609_v53 = vld [vmem:[#allocation2 + $0x38] sm:$0xf] }
 0x5ae   :  { %1728 = vmatprep.subr.mxu0 %v3657_v56  ;;  %v1696_v56 = vrot.slane %v1609_v53, 2  ;;  %v5222_v40 = vld [vmem:[%s5856_s9 + $0xf8] sm:$0xff]  ;;  %v1814_v53 = vld [vmem:[%s5855_s8 + $0x8] sm:$0xff] }
 0x5af   :  { %1729 = vmatpush1.msra.mxu0 %v3656_v24  ;;  %v1608_v24 = vld [vmem:[#allocation2 + $0x40] sm:$0xf] }
 0x5b0   :  { %1730 = vmatprep.subr.mxu0 %v3655_v57  ;;  %v1694_v57 = vrot.slane %v1608_v24, 2  ;;  %v1697_v33 = vsel %vm1679_vm5, %v1692_v39, %v1696_v56  ;;  %v5255_v24 = vld [vmem:[%s5856_s9 + $0x68] sm:$0xff] }
 0x5b1   :  { %1731 = vmatpush1.msra.mxu0 %v3654_v58 }
 0x5b2   :  { %1732 = vmatprep.subr.mxu0 %v3653_v59  ;;  %v1695_v49 = vsel %vm1679_vm5, %v1690_v61, %v1694_v57 }
 0x5b3   :  { %1733 = vmatpush1.msra.mxu0 %v3652_v28 }
 0x5b4   :  { %1734 = vmatprep.subr.mxu0 %v3651_v26 }
 0x5b5   :  { %1735 = vmatpush1.msra.mxu0 %v3650_v31 }
 0x5b6   :  { %1736 = vmatprep.subr.mxu0 %v3649_v48 }
 0x5b7   :  { %1737 = vmatpush1.msra.mxu0 %v3648_v25 }
 0x5b8   :  { %1738 = vmatprep.subr.mxu0 %v3647_v37 }
 0x5b9   :  { %1739 = vmatpush1.msra.mxu0 %v3646_v38 }
 0x5ba   :  { %1740 = vmatprep.subr.mxu0 %v3709_v41 }
 0x5bb   :  { %1741 = vmatpush2.msra.mxu0 %v3708_v19 }
 0x5bc   :  { %1742 = vmatprep.subr.mxu0 %v3707_v1 }
 0x5bd   :  { %1743 = vmatpush2.msra.mxu0 %v3706_v62 }
 0x5be   :  { %1744 = vmatprep.subr.mxu0 %v3705_v63 }
 0x5bf   :  { %1745 = vmatpush2.msra.mxu0 %v3704_v14 }
 0x5c0   :  { %1746 = vmatprep.subr.mxu0 %v3703_v12 }
 0x5c1   :  { %1747 = vmatpush2.msra.mxu0 %v3702_v16 }
 0x5c2   :  { %1748 = vmatprep.subr.mxu0 %v3701_v11 }
 0x5c3   :  { %1749 = vmatpush2.msra.mxu0 %v3700_v17 }
 0x5c4   :  { %1750 = vmatprep.subr.mxu0 %v3699_v9 }
 0x5c5   :  { %1751 = vmatpush2.msra.mxu0 %v3698_v15 }
 0x5c6   :  { %1752 = vmatprep.subr.mxu0 %v3697_v8 }
 0x5c7   :  { %1753 = vmatpush2.msra.mxu0 %v3696_v44 }
 0x5c8   :  { %1754 = vmatprep.subr.mxu0 %v3695_v13 }
 0x5c9   :  { %1755 = vmatpush2.msra.mxu0 %v3694_v45 }
 0x5ca   :  { %1756 = vmatprep.subr.mxu0 %v3693_v18 }
 0x5cb   :  { %1757 = vmatpush2.msra.mxu0 %v3692_v46 }
 0x5cc   :  { %1758 = vmatprep.subr.mxu0 %v3691_v6 }
 0x5cd   :  { %1759 = vmatpush2.msra.mxu0 %v3690_v50 }
 0x5ce   :  { %1760 = vmatprep.subr.mxu0 %v3689_v10 }
 0x5cf   :  { %1761 = vmatpush2.msra.mxu0 %v3688_v21 }
 0x5d0   :  { %1762 = vmatprep.subr.mxu0 %v3687_v5 }
 0x5d1   :  { %1763 = vmatpush2.msra.mxu0 %v3686_v3 }
 0x5d2   :  { %1764 = vmatprep.subr.mxu0 %v3685_v0 }
 0x5d3   :  { %1765 = vmatpush2.msra.mxu0 %v3684_v2 }
 0x5d4   :  { %1766 = vmatprep.subr.mxu0 %v3683_v4 }
 0x5d5   :  { %1767 = vmatpush2.msra.mxu0 %v3682_v7 }
 0x5d6   :  { %1768 = vmatprep.subr.mxu0 %v3681_v29 }
 0x5d7   :  { %1769 = vmatpush2.msra.mxu0 %v3680_v30 }
 0x5d8   :  { %1770 = vmatprep.subr.mxu0 %v3679_v34  ;;  %v1813_v34 = vld [vmem:[%s5855_s8] sm:$0xff] }
 0x5d9   :  { %1771 = vmatpush2.msra.mxu0 %v3678_v43  ;;  %v5227_v43 = vld [vmem:[%s5856_s9 + $0x78] sm:$0xff] }
 0x5da   :  { %1773 = vmatmul.mubr.f32.vlgmr.msra.gmra.mxu0 %v1682_v47  ;;  %v5232_v47 = vld [vmem:[%s5856_s9 + $0xf0] sm:$0xff] }
 0x5db   :  { %1778 = vmatprep.mubr.f32.mxu0 %v1689_v52  ;;  %v5239_v52 = vld [vmem:[%s5856_s9 + $0x70] sm:$0xff] }
 0x5de   :  { %1779 = vmatmul.mubr.f32.gmra.mxu0 %v4968_v23 }
 0x5df   :  { %1784 = vmatprep.mubr.f32.mxu0 %v4989_v20 }
 0x5e2   :  { %1785 = vmatmul.mubr.f32.gmra.mxu0 %v4976_v36 }
 0x5e3   :  { %1790 = vmatprep.mubr.f32.mxu0 %v1697_v33  ;;  %v5268_v33 = vld [vmem:[%s5856_s9 + $0x60] sm:$0xff] }
 0x5e6   :  { %1791 = vmatmul.mubr.f32.gmra.mxu0 %v1695_v49  ;;  %v5274_v49 = vld [vmem:[%s5856_s9 + $0xd8] sm:$0xff] }
 0x5e7   :  { %1796 = vmatprep.mubr.f32.mxu0 %v1696_v56  ;;  %v5249_v56 = vld [vmem:[%s5856_s9 + $0xe8] sm:$0xff] }
 0x5ea   :  { %1797 = vmatmul.mubr.f32.gmra.mxu0 %v1694_v57  ;;  %v5261_v57 = vld [vmem:[%s5856_s9 + $0xe0] sm:$0xff] }
 0x5eb   :  { %2098 = vmatprep.mubr.f32.mxu0 %v5211_v55 }
 0x654   :  { %v1577_v51 = vpop.f32.mrf.mxu1 }
 0x656   :  { %v1579_v39 = vpop.f32.mrf.mxu1 }
 0x658   :  { %v1482_v60 = vpop.f32.mrf.mxu0  ;;  %v1583_v59 = vpop.f32.mrf.mxu1 }
 0x659   :  { %v1578_v7 = vadd.f32 %v1577_v51, %v1482_v60  ;;  %v5280_v60 = vld [vmem:[%s5856_s9 + $0x58] sm:$0xff]  ;;  %v5312_v51 = vld [vmem:[%s5856_s9 + $0xc0] sm:$0xff] }
 0x65a   :  { %v1484_v23 = vpop.f32.mrf.mxu0  ;;  %v1585_v28 = vpop.f32.mrf.mxu1 }
 0x65b   :  { %v1580_v2 = vadd.f32 %v1579_v39, %v1484_v23  ;;  %v5288_v23 = vld [vmem:[%s5856_s9 + $0xd0] sm:$0xff]  ;;  %v5324_v39 = vld [vmem:[%s5856_s9 + $0xb8] sm:$0xff] }
 0x65c   :  { %v1488_v22 = vpop.f32.mrf.mxu0 }
 0x65d   :  { %v1589_v26 = vpop.f32.mrf.mxu1  ;;  %v1584_v3 = vadd.f32 %v1583_v59, %v1488_v22  ;;  %v5293_v22 = vld [vmem:[%s5856_s9 + $0x50] sm:$0xff] }
 0x65e   :  { %v1490_v36 = vpop.f32.mrf.mxu0  ;;  %v5336_v59 = vld [vmem:[%s5856_s9 + $0xb0] sm:$0xff] }
 0x65f   :  { %v1591_v48 = vpop.f32.mrf.mxu1  ;;  %v1586_v21 = vadd.f32 %v1585_v28, %v1490_v36  ;;  %v5300_v36 = vld [vmem:[%s5856_s9 + $0xc8] sm:$0xff] }
 0x660   :  { %v5348_v28 = vld [vmem:[%s5856_s9 + $0xa8] sm:$0xff] }
 0x661   :  { %v1494_v20 = vpop.f32.mrf.mxu0 }
 0x662   :  { %v1595_v38 = vpop.f32.mrf.mxu1  ;;  %v1590_v50 = vadd.f32 %v1589_v26, %v1494_v20  ;;  %v5305_v20 = vld [vmem:[%s5856_s9 + $0x48] sm:$0xff]  ;;  %v5360_v26 = vld [vmem:[%s5856_s9 + $0xa0] sm:$0xff] }
 0x663   :  { %v1496_v42 = vpop.f32.mrf.mxu0 }
 0x664   :  { %v1597_v1 = vpop.f32.mrf.mxu1  ;;  %v1592_v46 = vadd.f32 %v1591_v48, %v1496_v42  ;;  %v5318_v42 = vld [vmem:[%s5856_s9 + $0x40] sm:$0xff]  ;;  %v1938_v48 = vld [vmem:[%s5856_s9 + $0x98] sm:$0xff] }
 0x666   :  { %v1500_v58 = vpop.f32.mrf.mxu0 }
 0x667   :  { %v1601_v14 = vpop.f32.mrf.mxu1  ;;  %v1596_v45 = vadd.f32 %v1595_v38, %v1500_v58  ;;  %v5330_v58 = vld [vmem:[%s5856_s9 + $0x38] sm:$0xff]  ;;  %v1921_v38 = vld [vmem:[%s5856_s9 + $0x10] sm:$0xff] }
 0x668   :  { %v1502_v35 = vpop.f32.mrf.mxu0 }
 0x669   :  { %v1603_v11 = vpop.f32.mrf.mxu1  ;;  %v1598_v44 = vadd.f32 %v1597_v1, %v1502_v35  ;;  %v5342_v35 = vld [vmem:[%s5856_s9 + $0x30] sm:$0xff]  ;;  %v1935_v1 = vld [vmem:[%s5856_s9 + $0x80] sm:$0xff] }
 0x66a   :  { %v1506_v61 = vpop.f32.mrf.mxu0 }
 0x66b   :  { %v1602_v15 = vadd.f32 %v1601_v14, %v1506_v61  ;;  %v5354_v61 = vld [vmem:[%s5856_s9 + $0x28] sm:$0xff] }
 0x66c   :  { %v1508_v31 = vpop.f32.mrf.mxu0 }
 0x66d   :  { %v1604_v9 = vadd.f32 %v1603_v11, %v1508_v31  ;;  %v1923_v31 = vld [vmem:[%s5856_s9 + $0x20] sm:$0xff] }
 0x69a   :  { %v1774_v25 = vpop.f32.mrf.mxu0 }
 0x69b   :  { %v1803_v30 = vadd.f32 %v1774_v25, %v1578_v7  ;;  %v1922_v25 = vld [vmem:[%s5856_s9 + $0x18] sm:$0xff]  ;;  %v2024_v7 = vld [vmem:[%s5857_s10 + $0x10] sm:$0xff] }
 0x69c   :  { %v1776_v37 = vpop.f32.mrf.mxu0 }
 0x69d   :  { %v1804_v29 = vadd.f32 %v1776_v37, %v1580_v2  ;;  %v1937_v37 = vld [vmem:[%s5856_s9 + $0x90] sm:$0xff]  ;;  %v2026_v2 = vld [vmem:[%s5857_s10 + $0x20] sm:$0xff] }
 0x69e   :  { %v1780_v41 = vpop.f32.mrf.mxu0 }
 0x69f   :  { %v1805_v27 = vadd.f32 %v1780_v41, %v1584_v3  ;;  %v1936_v41 = vld [vmem:[%s5856_s9 + $0x88] sm:$0xff]  ;;  %v2028_v3 = vld [vmem:[%s5857_s10 + $0x30] sm:$0xff] }
 0x6a0   :  { %v1782_v19 = vpop.f32.mrf.mxu0 }
 0x6a1   :  { %v1806_v4 = vadd.f32 %v1782_v19, %v1586_v21  ;;  %v1920_v19 = vld [vmem:[%s5856_s9 + $0x8] sm:$0xff] }
 0x6a2   :  { %v1786_v62 = vpop.f32.mrf.mxu0 }
 0x6a3   :  { %v1807_v0 = vadd.f32 %v1786_v62, %v1590_v50  ;;  %v1919_v62 = vld [vmem:[%s5856_s9] sm:$0xff] }
 0x6a4   :  { %v1788_v63 = vpop.f32.mrf.mxu0 }
 0x6a5   :  { %v1808_v5 = vadd.f32 %v1788_v63, %v1592_v46  ;;  %v5393_v63 = vld [vmem:[%s5857_s10 + $0x38] sm:$0xff] }
 0x6a6   :  { %v1792_v12 = vpop.f32.mrf.mxu0  ;;  %2058 = vmatprep.subr.mxu0 %v5393_v63 }
 0x6a7   :  { %v1809_v10 = vadd.f32 %v1792_v12, %v1596_v45  ;;  %2059 = vmatpush1.msra.mxu0 %v2028_v3 }
 0x6a8   :  { %v1794_v16 = vpop.f32.mrf.mxu0 }
 0x6a9   :  { %v1810_v6 = vadd.f32 %v1794_v16, %v1598_v44 }
 0x6aa   :  { %v1798_v17 = vpop.f32.mrf.mxu0 }
 0x6ab   :  { %v1811_v18 = vadd.f32 %v1798_v17, %v1602_v15 }
 0x6ac   :  { %v1800_v8 = vpop.f32.mrf.mxu0 }
 0x6ad   :  { %v1812_v13 = vadd.f32 %v1800_v8, %v1604_v9 }
 0x6af   :  { %3710 = vmatprep.subr.msk.mxu1 %vm621_vm0, %v1812_v13 }
 0x6b0   :  { %3711 = vmatpush1.msk.msra.mxu1 %vm621_vm0, %v1811_v18 }
 0x6b1   :  { %1852 = vmatprep.subr.mxu1 %v1810_v6 }
 0x6b2   :  { %1853 = vmatpush1.msra.mxu1 %v1809_v10 }
 0x6b3   :  { %1854 = vmatprep.subr.mxu1 %v1808_v5 }
 0x6b4   :  { %1855 = vmatpush1.msra.mxu1 %v1807_v0  ;;  %v2027_v0 = vld [vmem:[%s5857_s10 + $0x28] sm:$0xff] }
 0x6b5   :  { %1856 = vmatprep.subr.mxu1 %v1806_v4  ;;  %2060 = vmatprep.subr.mxu0 %v2027_v0  ;;  %v2025_v4 = vld [vmem:[%s5857_s10 + $0x18] sm:$0xff] }
 0x6b6   :  { %1857 = vmatpush1.msra.mxu1 %v1805_v27  ;;  %2061 = vmatpush1.msra.mxu0 %v2026_v2  ;;  %v2023_v27 = vld [vmem:[%s5857_s10 + $0x8] sm:$0xff] }
 0x6b7   :  { %1858 = vmatprep.subr.mxu1 %v1804_v29  ;;  %2062 = vmatprep.subr.mxu0 %v2025_v4  ;;  %v2022_v29 = vld [vmem:[%s5857_s10] sm:$0xff] }
 0x6b8   :  { %1859 = vmatpush1.msra.mxu1 %v1803_v30  ;;  %2063 = vmatpush1.msra.mxu0 %v2024_v7 }
 0x6b9   :  { %3712 = vmatmul.mubr.msk.f32.vlgmr.msra.gmra.mxu1 %vm1815_vm7, %v1813_v34  ;;  %3793 = vmatprep.subr.mxu1 %v5222_v40 }
 0x6ba   :  { %1898 = vmatprep.mubr.f32.mxu1 %v5211_v55  ;;  %3794 = vmatpush3.msra.mxu1 %v5227_v43 }
 0x6bb   :  { %3795 = vmatprep.subr.mxu1 %v5232_v47  ;;  %2064 = vmatprep.subr.mxu0 %v2023_v27 }
 0x6bc   :  { %3796 = vmatpush3.msra.mxu1 %v5239_v52  ;;  %2065 = vmatpush1.msra.mxu0 %v2022_v29 }
 0x6bd   :  { %3713 = vmatmul.mubr.msk.f32.gmra.mxu1 %vm1815_vm7, %v1814_v53  ;;  %3797 = vmatprep.subr.mxu1 %v5249_v56 }
 0x6be   :  { %3798 = vmatpush3.msra.mxu1 %v5255_v24  ;;  %2233 = vmatprep.subr.mxu0 %v5393_v63  ;;  %v2393_v63 = vld [vmem:[#allocation7 + $0xd8] sm:$0xff] }
 0x6bf   :  { %3799 = vmatprep.subr.mxu1 %v5261_v57 }
 0x6c0   :  { %3800 = vmatpush3.msra.mxu1 %v5268_v33 }
 0x6c1   :  { %3801 = vmatprep.subr.mxu1 %v5274_v49 }
 0x6c2   :  { %3802 = vmatpush3.msra.mxu1 %v5280_v60 }
 0x6c3   :  { %3803 = vmatprep.subr.mxu1 %v5288_v23 }
 0x6c4   :  { %3804 = vmatpush3.msra.mxu1 %v5293_v22 }
 0x6c5   :  { %3805 = vmatprep.subr.mxu1 %v5300_v36 }
 0x6c6   :  { %3806 = vmatpush3.msra.mxu1 %v5305_v20 }
 0x6c7   :  { %3807 = vmatprep.subr.mxu1 %v5312_v51 }
 0x6c8   :  { %3808 = vmatpush3.msra.mxu1 %v5318_v42 }
 0x6c9   :  { %3809 = vmatprep.subr.mxu1 %v5324_v39 }
 0x6ca   :  { %3810 = vmatpush3.msra.mxu1 %v5330_v58 }
 0x6cb   :  { %3811 = vmatprep.subr.mxu1 %v5336_v59 }
 0x6cc   :  { %3812 = vmatpush3.msra.mxu1 %v5342_v35 }
 0x6cd   :  { %3813 = vmatprep.subr.mxu1 %v5348_v28 }
 0x6ce   :  { %3814 = vmatpush3.msra.mxu1 %v5354_v61 }
 0x6cf   :  { %3815 = vmatprep.subr.mxu1 %v5360_v26 }
 0x6d0   :  { %3816 = vmatpush3.msra.mxu1 %v1923_v31 }
 0x6d1   :  { %3817 = vmatprep.subr.mxu1 %v1938_v48 }
 0x6d2   :  { %3818 = vmatpush3.msra.mxu1 %v1922_v25 }
 0x6d3   :  { %3819 = vmatprep.subr.mxu1 %v1937_v37 }
 0x6d4   :  { %3820 = vmatpush3.msra.mxu1 %v1921_v38 }
 0x6d5   :  { %3821 = vmatprep.subr.mxu1 %v1936_v41 }
 0x6d6   :  { %3822 = vmatpush3.msra.mxu1 %v1920_v19 }
 0x6d7   :  { %3823 = vmatprep.subr.mxu1 %v1935_v1 }
 0x6d8   :  { %3824 = vmatpush3.msra.mxu1 %v1919_v62 }
 0x6d9   :  { %3828 = vmatprep.subr.mxu1 %v5222_v40 }
 0x779   :  { %v5397_v14 = vpop.f32.mrf.mxu1 }
 0x77b   :  { %v5399_v12 = vpop.f32.mrf.mxu1 }
 0x77d   :  { %v5401_v16 = vpop.f32.mrf.mxu1 }
 0x77e   :  { %v1905_v11 = vadd.f32 %v5401_v16, %v5397_v14 }
 0x77f   :  { %v5405_v17 = vpop.f32.mrf.mxu1 }
 0x780   :  { %v1906_v9 = vrot.slane %v1905_v11, 4  ;;  %v1912_v15 = vadd.f32 %v5405_v17, %v5399_v12 }
 0x782   :  { %v1907_v8 = vadd.f32 %v1906_v9, %v1905_v11  ;;  %v1913_v44 = vrot.slane %v1912_v15, 4  ;;  %v2389_v11 = vld [vmem:[#allocation7 + $0xb8] sm:$0xff]  ;;  %v2387_v9 = vld [vmem:[#allocation7 + $0xa8] sm:$0xff] }
 0x784   :  { %v1908_v13 = vrot.slane %v1907_v8, 2  ;;  %v1914_v45 = vadd.f32 %v1913_v44, %v1912_v15  ;;  %v2386_v15 = vld [vmem:[#allocation7 + $0xa0] sm:$0xff]  ;;  %v2384_v44 = vld [vmem:[#allocation7 + $0x90] sm:$0xff] }
 0x786   :  { %v1909_v18 = vadd.f32 %v1908_v13, %v1907_v8  ;;  %v1915_v46 = vrot.slane %v1914_v45, 2  ;;  %v2385_v8 = vld [vmem:[#allocation7 + $0x98] sm:$0xff]  ;;  %v2383_v13 = vld [vmem:[#allocation7 + $0x88] sm:$0xff] }
 0x788   :  { %v1916_v6 = vadd.f32 %v1915_v46, %v1914_v45  ;;  %v1910_v50 = vrot.slane %v1909_v18, 1  ;;  %v2382_v45 = vld [vmem:[#allocation7 + $0x80] sm:$0xff]  ;;  %v2380_v46 = vld [vmem:[#allocation7 + $0x70] sm:$0xff] }
 0x78a   :  { %v1917_v10 = vrot.slane %v1916_v6, 1  ;;  %v1911_v5 = vadd.f32 %v1910_v50, %v1909_v18  ;;  %v2381_v18 = vld [vmem:[#allocation7 + $0x78] sm:$0xff]  ;;  %v2378_v50 = vld [vmem:[#allocation7 + $0x60] sm:$0xff] }
 0x78c   :  { %v1918_v21 = vadd.f32 %v1917_v10, %v1916_v6  ;;  %v2379_v6 = vld [vmem:[#allocation7 + $0x68] sm:$0xff]  ;;  %v2377_v10 = vld [vmem:[#allocation7 + $0x58] sm:$0xff] }
 0x78e   :  { %2015 = vmatprep.mubr.f32.mxu1 %v1918_v21  ;;  %v2376_v21 = vld [vmem:[#allocation7 + $0x50] sm:$0xff] }
 0x78f   :  { %2016 = vmatmul.mubr.f32.vlgmr.msra.gmra.mxu1 %v1911_v5 }
 0x790   :  { %3829 = vmatpush3.msra.mxu1 %v5227_v43 }
 0x791   :  { %3830 = vmatprep.subr.mxu1 %v5232_v47 }
 0x792   :  { %3831 = vmatpush3.msra.mxu1 %v5239_v52 }
 0x793   :  { %3832 = vmatprep.subr.mxu1 %v5249_v56 }
 0x794   :  { %3833 = vmatpush3.msra.mxu1 %v5255_v24 }
 0x795   :  { %3834 = vmatprep.subr.mxu1 %v5261_v57 }
 0x796   :  { %3835 = vmatpush3.msra.mxu1 %v5268_v33 }
 0x797   :  { %3836 = vmatprep.subr.mxu1 %v5274_v49 }
 0x798   :  { %3837 = vmatpush3.msra.mxu1 %v5280_v60 }
 0x799   :  { %3838 = vmatprep.subr.mxu1 %v5288_v23 }
 0x79a   :  { %3839 = vmatpush3.msra.mxu1 %v5293_v22 }
 0x79b   :  { %3840 = vmatprep.subr.mxu1 %v5300_v36 }
 0x79c   :  { %3841 = vmatpush3.msra.mxu1 %v5305_v20 }
 0x79d   :  { %3842 = vmatprep.subr.mxu1 %v5312_v51 }
 0x79e   :  { %3843 = vmatpush3.msra.mxu1 %v5318_v42 }
 0x79f   :  { %3844 = vmatprep.subr.mxu1 %v5324_v39 }
 0x7a0   :  { %3845 = vmatpush3.msra.mxu1 %v5330_v58 }
 0x7a1   :  { %3846 = vmatprep.subr.mxu1 %v5336_v59 }
 0x7a2   :  { %3847 = vmatpush3.msra.mxu1 %v5342_v35 }
 0x7a3   :  { %3848 = vmatprep.subr.mxu1 %v5348_v28 }
 0x7a4   :  { %3849 = vmatpush3.msra.mxu1 %v5354_v61 }
 0x7a5   :  { %3850 = vmatprep.subr.mxu1 %v5360_v26 }
 0x7a6   :  { %3851 = vmatpush3.msra.mxu1 %v1923_v31 }
 0x7a7   :  { %3852 = vmatprep.subr.mxu1 %v1938_v48 }
 0x7a8   :  { %3853 = vmatpush3.msra.mxu1 %v1922_v25 }
 0x7a9   :  { %3854 = vmatprep.subr.mxu1 %v1937_v37 }
 0x7aa   :  { %3855 = vmatpush3.msra.mxu1 %v1921_v38  ;;  %v2397_v38 = vld [vmem:[#allocation7 + $0xf8] sm:$0xff] }
 0x7ab   :  { %3856 = vmatprep.subr.mxu1 %v1936_v41  ;;  %v2396_v41 = vld [vmem:[#allocation7 + $0xf0] sm:$0xff] }
 0x7ac   :  { %3857 = vmatpush3.msra.mxu1 %v1920_v19  ;;  %v2466_v19 = vld [vmem:[#allocation7 + $0x2f8] sm:$0xff] }
 0x7ad   :  { %3858 = vmatprep.subr.mxu1 %v1935_v1  ;;  %v2395_v1 = vld [vmem:[#allocation7 + $0xe8] sm:$0xff] }
 0x7ae   :  { %3859 = vmatpush3.msra.mxu1 %v1919_v62  ;;  %v2394_v62 = vld [vmem:[#allocation7 + $0xe0] sm:$0xff] }
 0x7af   :  { %2604 = vmatprep.subr.mxu1 %v2397_v38  ;;  %v2370_v38 = vld [vmem:[#allocation7 + $0x20] sm:$0xff] }
 0x84f   :  { %v3825_v30 = vpop.f32.mrf.mxu1 }
 0x851   :  { %v3826_v34 = vpop.f32.mrf.mxu1 }
 0x852   :  { %v3827_v40 = vadd.f32 %v3826_v34, %v3825_v30  ;;  %v2461_v30 = vld [vmem:[#allocation7 + $0x2d0] sm:$0xff]  ;;  %v2460_v34 = vld [vmem:[#allocation7 + $0x2c8] sm:$0xff] }
 0x854   :  { %v2021_v43 = vmul.f32 0.0078125, %v3827_v40  ;;  %v2459_v40 = vld [vmem:[#allocation7 + $0x2c0] sm:$0xff] }
 0x856   :  { %3714 = vmatmul.mubr.msk.f32.vlgmr.msra.gmra.mxu0 %vm2030_vm8, %v2021_v43  ;;  %v2458_v43 = vld [vmem:[#allocation7 + $0x2b8] sm:$0xff] }
 0x857   :  { %2234 = vmatpush1.msra.mxu0 %v2028_v3  ;;  %2273 = vmatprep.mubr.f32.mxu0 %v5211_v55 }
 0x858   :  { %2235 = vmatprep.subr.mxu0 %v2027_v0 }
 0x859   :  { %2236 = vmatpush1.msra.mxu0 %v2026_v2 }
 0x85a   :  { %2237 = vmatprep.subr.mxu0 %v2025_v4  ;;  %v2465_v4 = vld [vmem:[#allocation7 + $0x2f0] sm:$0xff] }
 0x85b   :  { %2238 = vmatpush1.msra.mxu0 %v2024_v7  ;;  %v2464_v7 = vld [vmem:[#allocation7 + $0x2e8] sm:$0xff] }
 0x85c   :  { %2239 = vmatprep.subr.mxu0 %v2023_v27  ;;  %v2463_v27 = vld [vmem:[#allocation7 + $0x2e0] sm:$0xff] }
 0x85d   :  { %2240 = vmatpush1.msra.mxu0 %v2022_v29  ;;  %v2462_v29 = vld [vmem:[#allocation7 + $0x2d8] sm:$0xff] }
 0x85e   :  { %2521 = vmatprep.subr.mxu0 %v2466_v19  ;;  %v2369_v19 = vld [vmem:[#allocation7 + $0x18] sm:$0xff] }
 0x916   :  { %v2100_v47 = vpop.f32.mrf.mxu0 }
 0x917   :  { %v2108_v52 = vrot.slane %v2100_v47, %v4499_v32  ;;  %v2457_v47 = vld [vmem:[#allocation7 + $0x2b0] sm:$0xff] }
 0x918   :  { %v2102_v53 = vpop.f32.mrf.mxu0 }
 0x919   :  { %v5457_v56 = vsub.f32 %v5397_v14, %v2108_v52  ;;  %v5460_v24 = vsub.f32 %v5401_v16, %v2108_v52  ;;  %v2112_v57 = vrot.slane %v2102_v53, %v4499_v32  ;;  %v2392_v14 = vld [vmem:[#allocation7 + $0xd0] sm:$0xff]  ;;  %v2390_v16 = vld [vmem:[#allocation7 + $0xc0] sm:$0xff]  ;;  %v2456_v52 = vld [vmem:[#allocation7 + $0x2a8] sm:$0xff] }
 0x91a   :  { %v2455_v53 = vld [vmem:[#allocation7 + $0x2a0] sm:$0xff] }
 0x91b   :  { %v2117_v33 = vmul.f32 %v5457_v56, %v5457_v56  ;;  %v2119_v49 = vmul.f32 %v5460_v24, %v5460_v24  ;;  %v5468_v60 = vsub.f32 %v5399_v12, %v2112_v57  ;;  %v5471_v23 = vsub.f32 %v5405_v17, %v2112_v57  ;;  %v2391_v12 = vld [vmem:[#allocation7 + $0xc8] sm:$0xff]  ;;  %v2388_v17 = vld [vmem:[#allocation7 + $0xb0] sm:$0xff]  ;;  %v2454_v57 = vld [vmem:[#allocation7 + $0x298] sm:$0xff] }
 0x91d   :  { %v2121_v22 = vadd.f32 %v2119_v49, %v2117_v33  ;;  %v2118_v36 = vmul.f32 %v5468_v60, %v5468_v60  ;;  %v2120_v20 = vmul.f32 %v5471_v23, %v5471_v23  ;;  %v2453_v33 = vld [vmem:[#allocation7 + $0x290] sm:$0xff]  ;;  %v2452_v49 = vld [vmem:[#allocation7 + $0x288] sm:$0xff] }
 0x91f   :  { %v2122_v51 = vrot.slane %v2121_v22, 4  ;;  %v2128_v42 = vadd.f32 %v2120_v20, %v2118_v36  ;;  %v2450_v36 = vld [vmem:[#allocation7 + $0x278] sm:$0xff]  ;;  %v2449_v20 = vld [vmem:[#allocation7 + $0x270] sm:$0xff] }
 0x921   :  { %v2123_v39 = vadd.f32 %v2122_v51, %v2121_v22  ;;  %v2129_v58 = vrot.slane %v2128_v42, 4  ;;  %v2451_v22 = vld [vmem:[#allocation7 + $0x280] sm:$0xff]  ;;  %v2448_v51 = vld [vmem:[#allocation7 + $0x268] sm:$0xff] }
 0x923   :  { %v2124_v59 = vrot.slane %v2123_v39, 2  ;;  %v2130_v35 = vadd.f32 %v2129_v58, %v2128_v42  ;;  %v2447_v42 = vld [vmem:[#allocation7 + $0x260] sm:$0xff]  ;;  %v2375_v58 = vld [vmem:[#allocation7 + $0x48] sm:$0xff] }
 0x925   :  { %v2131_v28 = vrot.slane %v2130_v35, 2  ;;  %v2125_v61 = vadd.f32 %v2124_v59, %v2123_v39  ;;  %v2446_v39 = vld [vmem:[#allocation7 + $0x258] sm:$0xff]  ;;  %v2445_v59 = vld [vmem:[#allocation7 + $0x250] sm:$0xff] }
 0x927   :  { %v2132_v26 = vadd.f32 %v2131_v28, %v2130_v35  ;;  %v2126_v31 = vrot.slane %v2125_v61, 1  ;;  %v2374_v35 = vld [vmem:[#allocation7 + $0x40] sm:$0xff]  ;;  %v2444_v28 = vld [vmem:[#allocation7 + $0x248] sm:$0xff] }
 0x929   :  { %v2133_v48 = vrot.slane %v2132_v26, 1  ;;  %v2127_v37 = vadd.f32 %v2126_v31, %v2125_v61  ;;  %v2373_v61 = vld [vmem:[#allocation7 + $0x38] sm:$0xff]  ;;  %v2372_v31 = vld [vmem:[#allocation7 + $0x30] sm:$0xff] }
 0x92b   :  { %v2134_v25 = vadd.f32 %v2133_v48, %v2132_v26  ;;  %v2443_v26 = vld [vmem:[#allocation7 + $0x240] sm:$0xff]  ;;  %v2442_v48 = vld [vmem:[#allocation7 + $0x238] sm:$0xff] }
 0x92d   :  { %2199 = vmatprep.mubr.f32.mxu1 %v2134_v25  ;;  %v2371_v25 = vld [vmem:[#allocation7 + $0x28] sm:$0xff] }
 0x92e   :  { %2200 = vmatmul.mubr.f32.vlgmr.msra.gmra.mxu1 %v2127_v37  ;;  %v2441_v37 = vld [vmem:[#allocation7 + $0x230] sm:$0xff] }
 0x92f   :  { %2605 = vmatpush1.msra.mxu1 %v2396_v41  ;;  %v2440_v41 = vld [vmem:[#allocation7 + $0x228] sm:$0xff] }
 0x930   :  { %2606 = vmatprep.subr.mxu1 %v2395_v1  ;;  %v2439_v1 = vld [vmem:[#allocation7 + $0x220] sm:$0xff] }
 0x931   :  { %2607 = vmatpush1.msra.mxu1 %v2394_v62  ;;  %v2368_v62 = vld [vmem:[#allocation7 + $0x10] sm:$0xff] }
 0x932   :  { %2608 = vmatprep.subr.mxu1 %v2393_v63  ;;  %v2438_v63 = vld [vmem:[#allocation7 + $0x218] sm:$0xff] }
 0x933   :  { %2609 = vmatpush1.msra.mxu1 %v2392_v14  ;;  %v2367_v14 = vld [vmem:[#allocation7 + $0x8] sm:$0xff] }
 0x934   :  { %2610 = vmatprep.subr.mxu1 %v2391_v12  ;;  %v2437_v12 = vld [vmem:[#allocation7 + $0x210] sm:$0xff] }
 0x935   :  { %2611 = vmatpush1.msra.mxu1 %v2390_v16  ;;  %v2366_v16 = vld [vmem:[#allocation7] sm:$0xff] }
 0x936   :  { %2612 = vmatprep.subr.mxu1 %v2389_v11  ;;  %v2436_v11 = vld [vmem:[#allocation7 + $0x208] sm:$0xff] }
 0x937   :  { %2613 = vmatpush1.msra.mxu1 %v2388_v17  ;;  %v2429_v17 = vld [vmem:[#allocation7 + $0x1f8] sm:$0xff] }
 0x938   :  { %2614 = vmatprep.subr.mxu1 %v2387_v9  ;;  %v2435_v9 = vld [vmem:[#allocation7 + $0x200] sm:$0xff] }
 0x939   :  { %2615 = vmatpush1.msra.mxu1 %v2386_v15  ;;  %v2428_v15 = vld [vmem:[#allocation7 + $0x1f0] sm:$0xff] }
 0x93a   :  { %2616 = vmatprep.subr.mxu1 %v2385_v8  ;;  %v2498_v8 = vld [vmem:[#allocation7 + $0x3f8] sm:$0xff] }
 0x93b   :  { %2617 = vmatpush1.msra.mxu1 %v2384_v44  ;;  %v2427_v44 = vld [vmem:[#allocation7 + $0x1e8] sm:$0xff] }
 0x93c   :  { %2618 = vmatprep.subr.mxu1 %v2383_v13  ;;  %v2497_v13 = vld [vmem:[#allocation7 + $0x3f0] sm:$0xff] }
 0x93d   :  { %2619 = vmatpush1.msra.mxu1 %v2382_v45  ;;  %v2426_v45 = vld [vmem:[#allocation7 + $0x1e0] sm:$0xff] }
 0x93e   :  { %2620 = vmatprep.subr.mxu1 %v2381_v18  ;;  %v2496_v18 = vld [vmem:[#allocation7 + $0x3e8] sm:$0xff] }
 0x93f   :  { %2621 = vmatpush1.msra.mxu1 %v2380_v46  ;;  %v2425_v46 = vld [vmem:[#allocation7 + $0x1d8] sm:$0xff] }
 0x940   :  { %2622 = vmatprep.subr.mxu1 %v2379_v6  ;;  %v2495_v6 = vld [vmem:[#allocation7 + $0x3e0] sm:$0xff] }
 0x941   :  { %2623 = vmatpush1.msra.mxu1 %v2378_v50  ;;  %v2424_v50 = vld [vmem:[#allocation7 + $0x1d0] sm:$0xff] }
 0x942   :  { %2624 = vmatprep.subr.mxu1 %v2377_v10  ;;  %v2494_v10 = vld [vmem:[#allocation7 + $0x3d8] sm:$0xff] }
 0x943   :  { %2625 = vmatpush1.msra.mxu1 %v2376_v21  ;;  %v2423_v21 = vld [vmem:[#allocation7 + $0x1c8] sm:$0xff] }
 0x944   :  { %2626 = vmatprep.subr.mxu1 %v2375_v58  ;;  %v2481_v58 = vld [vmem:[#allocation7 + $0x370] sm:$0xff] }
 0x945   :  { %2627 = vmatpush1.msra.mxu1 %v2374_v35  ;;  %v2480_v35 = vld [vmem:[#allocation7 + $0x368] sm:$0xff] }
 0x946   :  { %2628 = vmatprep.subr.mxu1 %v2373_v61  ;;  %v2479_v61 = vld [vmem:[#allocation7 + $0x360] sm:$0xff] }
 0x947   :  { %2629 = vmatpush1.msra.mxu1 %v2372_v31  ;;  %v2478_v31 = vld [vmem:[#allocation7 + $0x358] sm:$0xff] }
 0x948   :  { %2630 = vmatprep.subr.mxu1 %v2371_v25  ;;  %v2477_v25 = vld [vmem:[#allocation7 + $0x350] sm:$0xff] }
 0x949   :  { %2631 = vmatpush1.msra.mxu1 %v2370_v38  ;;  %v2476_v38 = vld [vmem:[#allocation7 + $0x348] sm:$0xff] }
 0x94a   :  { %2632 = vmatprep.subr.mxu1 %v2369_v19  ;;  %v2475_v19 = vld [vmem:[#allocation7 + $0x340] sm:$0xff] }
 0x94b   :  { %2633 = vmatpush1.msra.mxu1 %v2368_v62  ;;  %v2474_v62 = vld [vmem:[#allocation7 + $0x338] sm:$0xff] }
 0x94c   :  { %2634 = vmatprep.subr.mxu1 %v2367_v14  ;;  %v2473_v14 = vld [vmem:[#allocation7 + $0x330] sm:$0xff] }
 0x94d   :  { %2635 = vmatpush1.msra.mxu1 %v2366_v16  ;;  %v2472_v16 = vld [vmem:[#allocation7 + $0x328] sm:$0xff] }
 0x94e   :  { %2636 = vmatprep.subr.mxu1 %v2429_v17  ;;  %v2471_v17 = vld [vmem:[#allocation7 + $0x320] sm:$0xff] }
 0x94f   :  { %2637 = vmatpush2.msra.mxu1 %v2428_v15  ;;  %v2470_v15 = vld [vmem:[#allocation7 + $0x318] sm:$0xff] }
 0x950   :  { %2638 = vmatprep.subr.mxu1 %v2427_v44  ;;  %v2469_v44 = vld [vmem:[#allocation7 + $0x310] sm:$0xff] }
 0x951   :  { %2639 = vmatpush2.msra.mxu1 %v2426_v45  ;;  %v2468_v45 = vld [vmem:[#allocation7 + $0x308] sm:$0xff] }
 0x952   :  { %2640 = vmatprep.subr.mxu1 %v2425_v46  ;;  %v2723_v46 = vld [vmem:[#allocation7 + $0x4f8] sm:$0xff] }
 0x953   :  { %2641 = vmatpush2.msra.mxu1 %v2424_v50 }
 0x954   :  { %2642 = vmatprep.subr.mxu1 %v2423_v21 }
 0x9ee   :  { %v3860_v5 = vpop.f32.mrf.mxu1 }
 0x9f0   :  { %v3861_v3 = vpop.f32.mrf.mxu1 }
 0x9f1   :  { %v3862_v0 = vadd.f32 %v3861_v3, %v3860_v5  ;;  %v2493_v5 = vld [vmem:[#allocation7 + $0x3d0] sm:$0xff]  ;;  %v2422_v3 = vld [vmem:[#allocation7 + $0x1c0] sm:$0xff] }
 0x9f2   :  { %2643 = vmatpush2.msra.mxu1 %v2422_v3  ;;  %v2310_v3 = vld [vmem:[%s5859_s12] sm:$0x3] }
 0x9f3   :  { %v2205_v2 = vmul.f32 0.0078125, %v3862_v0  ;;  %v2492_v0 = vld [vmem:[#allocation7 + $0x3c8] sm:$0xff] }
 0x9f5   :  { %3715 = vmatmul.mubr.msk.f32.vlgmr.msra.gmra.mxu0 %vm2030_vm8, %v2205_v2  ;;  %v2421_v2 = vld [vmem:[#allocation7 + $0x1b8] sm:$0xff] }
 0x9f6   :  { %2522 = vmatpush1.msra.mxu0 %v2465_v4  ;;  %2644 = vmatprep.subr.mxu1 %v2421_v2  ;;  %v2491_v4 = vld [vmem:[#allocation7 + $0x3c0] sm:$0xff] }
 0x9f7   :  { %2523 = vmatprep.subr.mxu0 %v2464_v7  ;;  %v2420_v7 = vld [vmem:[#allocation7 + $0x1b0] sm:$0xff] }
 0x9f8   :  { %2524 = vmatpush1.msra.mxu0 %v2463_v27  ;;  %2645 = vmatpush2.msra.mxu1 %v2420_v7  ;;  %v2490_v27 = vld [vmem:[#allocation7 + $0x3b8] sm:$0xff] }
 0x9f9   :  { %2525 = vmatprep.subr.mxu0 %v2462_v29  ;;  %v2419_v29 = vld [vmem:[#allocation7 + $0x1a8] sm:$0xff] }
 0x9fa   :  { %2526 = vmatpush1.msra.mxu0 %v2461_v30  ;;  %2646 = vmatprep.subr.mxu1 %v2419_v29  ;;  %v2489_v30 = vld [vmem:[#allocation7 + $0x3b0] sm:$0xff] }
 0x9fb   :  { %2527 = vmatprep.subr.mxu0 %v2460_v34  ;;  %v2418_v34 = vld [vmem:[#allocation7 + $0x1a0] sm:$0xff] }
 0x9fc   :  { %2528 = vmatpush1.msra.mxu0 %v2459_v40  ;;  %2647 = vmatpush2.msra.mxu1 %v2418_v34  ;;  %v2488_v40 = vld [vmem:[#allocation7 + $0x3a8] sm:$0xff] }
 0x9fd   :  { %2529 = vmatprep.subr.mxu0 %v2458_v43  ;;  %v2417_v43 = vld [vmem:[#allocation7 + $0x198] sm:$0xff] }
 0x9fe   :  { %2530 = vmatpush1.msra.mxu0 %v2457_v47  ;;  %2648 = vmatprep.subr.mxu1 %v2417_v43  ;;  %v2487_v47 = vld [vmem:[#allocation7 + $0x3a0] sm:$0xff]  ;;  %v2319_v43 = vrot.slane %v2310_v3, %v4931_v54 }
 0x9ff   :  { %2531 = vmatprep.subr.mxu0 %v2456_v52  ;;  %v2416_v52 = vld [vmem:[#allocation7 + $0x190] sm:$0xff] }
 0xa00   :  { %2532 = vmatpush1.msra.mxu0 %v2455_v53  ;;  %2649 = vmatpush2.msra.mxu1 %v2416_v52  ;;  %v2486_v53 = vld [vmem:[#allocation7 + $0x398] sm:$0xff] }
 0xa01   :  { %2533 = vmatprep.subr.mxu0 %v2454_v57  ;;  %v2415_v57 = vld [vmem:[#allocation7 + $0x188] sm:$0xff] }
 0xa02   :  { %2534 = vmatpush1.msra.mxu0 %v2453_v33  ;;  %2650 = vmatprep.subr.mxu1 %v2415_v57  ;;  %v2485_v33 = vld [vmem:[#allocation7 + $0x390] sm:$0xff] }
 0xa03   :  { %2535 = vmatprep.subr.mxu0 %v2452_v49  ;;  %v2414_v49 = vld [vmem:[#allocation7 + $0x180] sm:$0xff] }
 0xa04   :  { %2536 = vmatpush1.msra.mxu0 %v2451_v22  ;;  %2651 = vmatpush2.msra.mxu1 %v2414_v49  ;;  %v2484_v22 = vld [vmem:[#allocation7 + $0x388] sm:$0xff] }
 0xa05   :  { %2537 = vmatprep.subr.mxu0 %v2450_v36  ;;  %v2413_v36 = vld [vmem:[#allocation7 + $0x178] sm:$0xff] }
 0xa06   :  { %2538 = vmatpush1.msra.mxu0 %v2449_v20  ;;  %2652 = vmatprep.subr.mxu1 %v2413_v36  ;;  %v2483_v20 = vld [vmem:[#allocation7 + $0x380] sm:$0xff] }
 0xa07   :  { %2539 = vmatprep.subr.mxu0 %v2448_v51  ;;  %v2412_v51 = vld [vmem:[#allocation7 + $0x170] sm:$0xff] }
 0xa08   :  { %2540 = vmatpush1.msra.mxu0 %v2447_v42  ;;  %2653 = vmatpush2.msra.mxu1 %v2412_v51  ;;  %v2482_v42 = vld [vmem:[#allocation7 + $0x378] sm:$0xff] }
 0xa09   :  { %2541 = vmatprep.subr.mxu0 %v2446_v39  ;;  %v2411_v39 = vld [vmem:[#allocation7 + $0x168] sm:$0xff] }
 0xa0a   :  { %2542 = vmatpush1.msra.mxu0 %v2445_v59  ;;  %2654 = vmatprep.subr.mxu1 %v2411_v39  ;;  %v2410_v59 = vld [vmem:[#allocation7 + $0x160] sm:$0xff] }
 0xa0b   :  { %2543 = vmatprep.subr.mxu0 %v2444_v28  ;;  %2655 = vmatpush2.msra.mxu1 %v2410_v59  ;;  %v2409_v28 = vld [vmem:[#allocation7 + $0x158] sm:$0xff] }
 0xa0c   :  { %2544 = vmatpush1.msra.mxu0 %v2443_v26  ;;  %2656 = vmatprep.subr.mxu1 %v2409_v28  ;;  %v2408_v26 = vld [vmem:[#allocation7 + $0x150] sm:$0xff] }
 0xa0d   :  { %2545 = vmatprep.subr.mxu0 %v2442_v48  ;;  %2657 = vmatpush2.msra.mxu1 %v2408_v26  ;;  %v2407_v48 = vld [vmem:[#allocation7 + $0x148] sm:$0xff] }
 0xa0e   :  { %2546 = vmatpush1.msra.mxu0 %v2441_v37  ;;  %2658 = vmatprep.subr.mxu1 %v2407_v48  ;;  %v2406_v37 = vld [vmem:[#allocation7 + $0x140] sm:$0xff] }
 0xa0f   :  { %2547 = vmatprep.subr.mxu0 %v2440_v41  ;;  %v2405_v41 = vld [vmem:[#allocation7 + $0x138] sm:$0xff]  ;;  %2659 = vmatpush2.msra.mxu1 %v2406_v37 }
 0xa10   :  { %2548 = vmatpush1.msra.mxu0 %v2439_v1  ;;  %v2404_v1 = vld [vmem:[#allocation7 + $0x130] sm:$0xff]  ;;  %2660 = vmatprep.subr.mxu1 %v2405_v41 }
 0xa11   :  { %2549 = vmatprep.subr.mxu0 %v2438_v63  ;;  %v2403_v63 = vld [vmem:[#allocation7 + $0x128] sm:$0xff]  ;;  %2661 = vmatpush2.msra.mxu1 %v2404_v1 }
 0xa12   :  { %2550 = vmatpush1.msra.mxu0 %v2437_v12  ;;  %v2402_v12 = vld [vmem:[#allocation7 + $0x120] sm:$0xff]  ;;  %2662 = vmatprep.subr.mxu1 %v2403_v63 }
 0xa13   :  { %2551 = vmatprep.subr.mxu0 %v2436_v11  ;;  %v2401_v11 = vld [vmem:[#allocation7 + $0x118] sm:$0xff]  ;;  %2663 = vmatpush2.msra.mxu1 %v2402_v12 }
 0xa14   :  { %2552 = vmatpush1.msra.mxu0 %v2435_v9  ;;  %v2400_v9 = vld [vmem:[#allocation7 + $0x110] sm:$0xff]  ;;  %2664 = vmatprep.subr.mxu1 %v2401_v11 }
 0xa15   :  { %2553 = vmatprep.subr.mxu0 %v2498_v8  ;;  %v2399_v8 = vld [vmem:[#allocation7 + $0x108] sm:$0xff]  ;;  %2665 = vmatpush2.msra.mxu1 %v2400_v9 }
 0xa16   :  { %2554 = vmatpush2.msra.mxu0 %v2497_v13  ;;  %v2398_v13 = vld [vmem:[#allocation7 + $0x100] sm:$0xff]  ;;  %2666 = vmatprep.subr.mxu1 %v2399_v8 }
 0xa17   :  { %2555 = vmatprep.subr.mxu0 %v2496_v18  ;;  %v2467_v18 = vld [vmem:[#allocation7 + $0x300] sm:$0xff]  ;;  %2667 = vmatpush2.msra.mxu1 %v2398_v13 }
 0xa18   :  { %2556 = vmatpush2.msra.mxu0 %v2495_v6  ;;  %v2720_v13 = vld [vmem:[#allocation7 + $0x4e0] sm:$0xff] }
 0xa19   :  { %2557 = vmatprep.subr.mxu0 %v2494_v10 }
 0xa1a   :  { %2558 = vmatpush2.msra.mxu0 %v2493_v5  ;;  %v2294_v5 = vld [vmem:[%s5858_s11] sm:$0x3] }
 0xa1b   :  { %2559 = vmatprep.subr.mxu0 %v2492_v0 }
 0xa1c   :  { %2560 = vmatpush2.msra.mxu0 %v2491_v4  ;;  %v2299_v4 = vrot.slane %v2294_v5, %v4499_v32 }
 0xa1d   :  { %2561 = vmatprep.subr.mxu0 %v2490_v27  ;;  %v2315_v27 = vrot.slane %v2310_v3, %v4499_v32 }
 0xa1e   :  { %2562 = vmatpush2.msra.mxu0 %v2489_v30 }
 0xa1f   :  { %2563 = vmatprep.subr.mxu0 %v2488_v40  ;;  %v2303_v40 = vrot.slane %v2294_v5, %v4931_v54  ;;  %v2716_v5 = vld [vmem:[#allocation7 + $0x4c0] sm:$0xff] }
 0xa20   :  { %2564 = vmatpush2.msra.mxu0 %v2487_v47 }
 0xa21   :  { %2565 = vmatprep.subr.mxu0 %v2486_v53 }
 0xa22   :  { %2566 = vmatpush2.msra.mxu0 %v2485_v33 }
 0xa23   :  { %2567 = vmatprep.subr.mxu0 %v2484_v22 }
 0xa24   :  { %2568 = vmatpush2.msra.mxu0 %v2483_v20 }
 0xa25   :  { %2569 = vmatprep.subr.mxu0 %v2482_v42 }
 0xa26   :  { %2570 = vmatpush2.msra.mxu0 %v2481_v58 }
 0xa27   :  { %2571 = vmatprep.subr.mxu0 %v2480_v35 }
 0xa28   :  { %2572 = vmatpush2.msra.mxu0 %v2479_v61 }
 0xa29   :  { %2573 = vmatprep.subr.mxu0 %v2478_v31 }
 0xa2a   :  { %2574 = vmatpush2.msra.mxu0 %v2477_v25 }
 0xa2b   :  { %2575 = vmatprep.subr.mxu0 %v2476_v38 }
 0xa2c   :  { %2576 = vmatpush2.msra.mxu0 %v2475_v19 }
 0xa2d   :  { %2577 = vmatprep.subr.mxu0 %v2474_v62 }
 0xa2e   :  { %2578 = vmatpush2.msra.mxu0 %v2473_v14 }
 0xa2f   :  { %2579 = vmatprep.subr.mxu0 %v2472_v16 }
 0xa30   :  { %2580 = vmatpush2.msra.mxu0 %v2471_v17  ;;  %v2722_v17 = vld [vmem:[#allocation7 + $0x4f0] sm:$0xff] }
 0xa31   :  { %2581 = vmatprep.subr.mxu0 %v2470_v15  ;;  %v2721_v15 = vld [vmem:[#allocation7 + $0x4e8] sm:$0xff] }
 0xa32   :  { %2582 = vmatpush2.msra.mxu0 %v2469_v44 }
 0xa33   :  { %2583 = vmatprep.subr.mxu0 %v2468_v45  ;;  %v2719_v45 = vld [vmem:[#allocation7 + $0x4d8] sm:$0xff] }
 0xa34   :  { %2584 = vmatpush2.msra.mxu0 %v2467_v18 }
 0xa35   :  { %2776 = vmatprep.subr.mxu0 %v2723_v46 }
 0xab5   :  { %v2275_v6 = vpop.f32.mrf.mxu0 }
 0xab6   :  { %v2276_v50 = vadd.f32 1e-05, %v2275_v6  ;;  %v2718_v6 = vld [vmem:[#allocation7 + $0x4d0] sm:$0xff] }
 0xab7   :  { %v2277_v10 = vpop.f32.mrf.mxu0 }
 0xab8   :  { %3985 = vrsqrt.f32 %v2276_v50  ;;  %v2278_v21 = vadd.f32 1e-05, %v2277_v10  ;;  %v2717_v10 = vld [vmem:[#allocation7 + $0x4c8] sm:$0xff] }
 0xaba   :  { %3987 = vrsqrt.f32 %v2278_v21 }
 0xac5   :  { %v3986_v0 = vpop.eup %3985 }
 0xac6   :  { %v2285_v2 = vrot.slane %v3986_v0, %v4499_v32 }
 0xac7   :  { %v3988_v7 = vpop.eup %3987 }
 0xac8   :  { %v2290_v29 = vmul.f32 %v2285_v2, %v5457_v56  ;;  %v2292_v30 = vmul.f32 %v2285_v2, %v5460_v24  ;;  %v2289_v34 = vrot.slane %v3988_v7, %v4499_v32  ;;  %v2715_v2 = vld [vmem:[#allocation7 + $0x4b8] sm:$0xff]  ;;  %v2713_v7 = vld [vmem:[#allocation7 + $0x4a8] sm:$0xff] }
 0xaca   :  { %v2306_v47 = vmul.f32 %v2299_v4, %v2290_v29  ;;  %v2308_v52 = vmul.f32 %v2299_v4, %v2292_v30  ;;  %v2291_v53 = vmul.f32 %v2289_v34, %v5468_v60  ;;  %v2293_v57 = vmul.f32 %v2289_v34, %v5471_v23  ;;  %v2714_v4 = vld [vmem:[#allocation7 + $0x4b0] sm:$0xff]  ;;  %v2712_v29 = vld [vmem:[#allocation7 + $0x4a0] sm:$0xff]  ;;  %v2711_v30 = vld [vmem:[#allocation7 + $0x498] sm:$0xff] }
 0xacb   :  { %v2710_v34 = vld [vmem:[#allocation7 + $0x490] sm:$0xff] }
 0xacc   :  { %v2322_v33 = vadd.f32 %v2315_v27, %v2306_v47  ;;  %v2324_v49 = vadd.f32 %v2315_v27, %v2308_v52  ;;  %v2307_v22 = vmul.f32 %v2303_v40, %v2291_v53  ;;  %v2309_v36 = vmul.f32 %v2303_v40, %v2293_v57  ;;  %v2709_v40 = vld [vmem:[#allocation7 + $0x488] sm:$0xff]  ;;  %v2707_v47 = vld [vmem:[#allocation7 + $0x478] sm:$0xff]  ;;  %v2706_v52 = vld [vmem:[#allocation7 + $0x470] sm:$0xff] }
 0xacd   :  { %v2705_v53 = vld [vmem:[#allocation7 + $0x468] sm:$0xff]  ;;  %v2704_v57 = vld [vmem:[#allocation7 + $0x460] sm:$0xff] }
 0xace   :  { %v2326_v20 = vmul.f32 0.2, %v2322_v33  ;;  %v2328_v56 = vmul.f32 0.2, %v2324_v49  ;;  %v2323_v51 = vadd.f32 %v2319_v43, %v2307_v22  ;;  %v2325_v24 = vadd.f32 %v2319_v43, %v2309_v36  ;;  %v2708_v43 = vld [vmem:[#allocation7 + $0x480] sm:$0xff]  ;;  %v2701_v22 = vld [vmem:[#allocation7 + $0x448] sm:$0xff] }
 0xacf   :  { %v2700_v36 = vld [vmem:[#allocation7 + $0x440] sm:$0xff] }
 0xad0   :  { %v2330_v42 = vmax.f32 %v2322_v33, %v2326_v20  ;;  %v2332_v39 = vmax.f32 %v2324_v49, %v2328_v56  ;;  %v2327_v58 = vmul.f32 0.2, %v2323_v51  ;;  %v2329_v59 = vmul.f32 0.2, %v2325_v24  ;;  %v2703_v33 = vld [vmem:[#allocation7 + $0x458] sm:$0xff]  ;;  %v2702_v49 = vld [vmem:[#allocation7 + $0x450] sm:$0xff] }
 0xad1   :  { %v2699_v20 = vld [vmem:[#allocation7 + $0x438] sm:$0xff]  ;;  %v2698_v56 = vld [vmem:[#allocation7 + $0x430] sm:$0xff] }
 0xad2   :  { %v2342_v35 = vrot.slane %v2330_v42, 7  ;;  %v2352_v28 = vrot.slane %v2332_v39, 5  ;;  %v2331_v61 = vmax.f32 %v2323_v51, %v2327_v58  ;;  %v2333_v26 = vmax.f32 %v2325_v24, %v2329_v59  ;;  %v2697_v51 = vld [vmem:[#allocation7 + $0x428] sm:$0xff]  ;;  %v2696_v24 = vld [vmem:[#allocation7 + $0x420] sm:$0xff]  ;;  %v2695_v42 = vld [vmem:[#allocation7 + $0x418] sm:$0xff] }
 0xad3   :  { %v2694_v39 = vld [vmem:[#allocation7 + $0x410] sm:$0xff]  ;;  %v2693_v58 = vld [vmem:[#allocation7 + $0x408] sm:$0xff]  ;;  %v2692_v59 = vld [vmem:[#allocation7 + $0x400] sm:$0xff] }
 0xad4   :  { %2346 = vst [vmem:[#allocation3 + $0x8] sm:$0xfe] %v2342_v35  ;;  %2348 = vst [vmem:[#allocation3] sm:$0x1] %v2342_v35  ;;  %v2343_v60 = vrot.slane %v2331_v61, 7  ;;  %v2353_v23 = vrot.slane %v2333_v26, 5 }
 0xad5   :  { %2356 = vst [vmem:[#allocation3] sm:$0xf8] %v2352_v28  ;;  %2358 = vst [vmem:[#allocation3 + $0x28] sm:$0x7] %v2352_v28  ;;  %v2755_v35 = vld [vmem:[#allocation7 + $0x5f8] sm:$0xff]  ;;  %v2754_v28 = vld [vmem:[#allocation7 + $0x5f0] sm:$0xff] }
 0xad6   :  { %2347 = vst [vmem:[#allocation3 + $0x10] sm:$0xfe] %v2343_v60  ;;  %2349 = vst [vmem:[#allocation3 + $0x18] sm:$0x1] %v2343_v60  ;;  %v2753_v61 = vld [vmem:[#allocation7 + $0x5e8] sm:$0xff]  ;;  %v2752_v26 = vld [vmem:[#allocation7 + $0x5e0] sm:$0xff] }
 0xad7   :  { %2357 = vst [vmem:[#allocation3 + $0x18] sm:$0xf8] %v2353_v23  ;;  %2359 = vst [vmem:[#allocation3 + $0x20] sm:$0x7] %v2353_v23  ;;  %v2751_v60 = vld [vmem:[#allocation7 + $0x5d8] sm:$0xff]  ;;  %v2750_v23 = vld [vmem:[#allocation7 + $0x5d0] sm:$0xff] }
 0xadb   :  { %v2430_v48 = vld [vmem:[#allocation3 + $0x8] sm:$0xfe] }
 0xadc   :  { %v5494_v31 = vld [vmem:[#allocation3] sm:$0xff]  ;;  %v2360_v25 = vld [vmem:[#allocation3 + $0x8] sm:$0xff]  ;;  %v2505_v19 = vrot.slane %v2430_v48, 1 }
 0xadd   :  { %v2361_v37 = vld [vmem:[#allocation3 + $0x10] sm:$0xff]  ;;  %v2506_v1 = vrot.slane %v5494_v31, 1  ;;  %v2432_v12 = vld [vmem:[#allocation3 + $0x28] sm:$0x7]  ;;  %v2749_v48 = vld [vmem:[#allocation7 + $0x5c8] sm:$0xff] }
 0xade   :  { %v5496_v38 = vld [vmem:[#allocation3 + $0x18] sm:$0xff]  ;;  %v2431_v41 = vld [vmem:[#allocation3 + $0x10] sm:$0xfe]  ;;  %2668 = vmatprep.mubr.f32.mxu1 %v2361_v37  ;;  %v2433_v14 = vld [vmem:[#allocation3 + $0x20] sm:$0x7]  ;;  %v2511_v8 = vrot.slane %v2432_v12, 1 }
 0xadf   :  { %v2509_v62 = vrot.slane %v5496_v38, 1  ;;  %v2508_v63 = vrot.slane %v2431_v41, 1  ;;  %2669 = vmatmul.mubr.f32.vlgmr.msra.gmra.mxu1 %v2360_v25  ;;  %v2513_v16 = vrot.slane %v2433_v14, 1  ;;  %v2507_v9 = vsel %vm1387_vm6, %v2505_v19, %v2506_v1  ;;  %v2688_v18 = vld [vmem:[#allocation3 + $0x10] sm:$0xfc]  ;;  %v2747_v37 = vld [vmem:[#allocation7 + $0x5b8] sm:$0xff] }
 0xae0   :  { %2674 = vmatprep.mubr.f32.mxu1 %v5496_v38  ;;  %v2365_v46 = vld [vmem:[#allocation3 + $0x20] sm:$0x3]  ;;  %v2512_v50 = vsel %vm1387_vm6, %v2506_v1, %v2511_v8  ;;  %v2764_v21 = vrot.slane %v5496_v38, 2  ;;  %v2763_v3 = vrot.slane %v2688_v18, 2  ;;  %v2364_v0 = vld [vmem:[#allocation3 + $0x28] sm:$0x3] }
 0xae1   :  { %v2510_v11 = vsel %vm1387_vm6, %v2508_v63, %v2509_v62  ;;  %v2514_v44 = vsel %vm1387_vm6, %v2509_v62, %v2513_v16  ;;  %v2748_v25 = vld [vmem:[#allocation7 + $0x5c0] sm:$0xff]  ;;  %v2746_v41 = vld [vmem:[#allocation7 + $0x5b0] sm:$0xff]  ;;  %v2745_v19 = vld [vmem:[#allocation7 + $0x5a8] sm:$0xff] }
 0xae2   :  { %2585 = vmatprep.mubr.f32.mxu0 %v2510_v11  ;;  %v2765_v27 = vsel %vm1679_vm5, %v2763_v3, %v2764_v21  ;;  %v2744_v1 = vld [vmem:[#allocation7 + $0x5a0] sm:$0xff]  ;;  %v2743_v62 = vld [vmem:[#allocation7 + $0x598] sm:$0xff]  ;;  %v2742_v63 = vld [vmem:[#allocation7 + $0x590] sm:$0xff] }
 0xae3   :  { %2586 = vmatmul.mubr.f32.vlgmr.msra.gmra.mxu0 %v2507_v9  ;;  %2675 = vmatmul.mubr.f32.gmra.mxu1 %v5494_v31  ;;  %v2741_v14 = vld [vmem:[#allocation7 + $0x588] sm:$0xff]  ;;  %v2740_v12 = vld [vmem:[#allocation7 + $0x580] sm:$0xff]  ;;  %v2738_v11 = vld [vmem:[#allocation7 + $0x570] sm:$0xff] }
 0xae4   :  { %2777 = vmatpush1.msra.mxu0 %v2722_v17  ;;  %2591 = vmatprep.mubr.f32.mxu0 %v2514_v44  ;;  %v2737_v17 = vld [vmem:[#allocation7 + $0x568] sm:$0xff]  ;;  %v2736_v9 = vld [vmem:[#allocation7 + $0x560] sm:$0xff]  ;;  %v2730_v18 = vld [vmem:[#allocation7 + $0x530] sm:$0xff] }
 0xae5   :  { %2778 = vmatprep.subr.mxu0 %v2721_v15  ;;  %2680 = vmatprep.mubr.f32.mxu1 %v2365_v46  ;;  %v2735_v15 = vld [vmem:[#allocation7 + $0x558] sm:$0xff]  ;;  %v2733_v44 = vld [vmem:[#allocation7 + $0x548] sm:$0xff]  ;;  %v2726_v3 = vld [vmem:[#allocation7 + $0x510] sm:$0xff] }
 0xae6   :  { %2779 = vmatpush1.msra.mxu0 %v2720_v13  ;;  %v2732_v13 = vld [vmem:[#allocation7 + $0x540] sm:$0xff]  ;;  %v2729_v46 = vld [vmem:[#allocation7 + $0x528] sm:$0xff] }
 0xae7   :  { %2780 = vmatprep.subr.mxu0 %v2719_v45  ;;  %2592 = vmatmul.mubr.f32.gmra.mxu0 %v2512_v50  ;;  %v2731_v45 = vld [vmem:[#allocation7 + $0x538] sm:$0xff]  ;;  %v5531_v38 = vld [vmem:[%s5862_s15 + $0xf0] sm:$0xff] }
 0xae8   :  { %2781 = vmatpush1.msra.mxu0 %v2718_v6  ;;  %2597 = vmatprep.mubr.f32.mxu0 %v2513_v16  ;;  %v2739_v16 = vld [vmem:[#allocation7 + $0x578] sm:$0xff]  ;;  %v2728_v6 = vld [vmem:[#allocation7 + $0x520] sm:$0xff] }
 0xae9   :  { %2681 = vmatmul.mubr.f32.gmra.mxu1 %v2364_v0  ;;  %2782 = vmatprep.subr.mxu0 %v2717_v10  ;;  %v2687_v50 = vld [vmem:[#allocation3 + $0x8] sm:$0xfc]  ;;  %v2725_v0 = vld [vmem:[#allocation7 + $0x508] sm:$0xff] }
 0xaea   :  { %2783 = vmatpush1.msra.mxu0 %v2716_v5  ;;  %2940 = vmatprep.mubr.f32.mxu1 %v5211_v55  ;;  %v2727_v10 = vld [vmem:[#allocation7 + $0x518] sm:$0xff]  ;;  %v2690_v5 = vld [vmem:[#allocation3 + $0x20] sm:$0xf] }
 0xaeb   :  { %2784 = vmatprep.subr.mxu0 %v2715_v2  ;;  %2598 = vmatmul.mubr.f32.gmra.mxu0 %v2511_v8  ;;  %v2734_v8 = vld [vmem:[#allocation7 + $0x550] sm:$0xff]  ;;  %v2760_v2 = vrot.slane %v2687_v50, 2 }
 0xaec   :  { %2785 = vmatpush1.msra.mxu0 %v2714_v4  ;;  %2840 = vmatprep.mubr.f32.mxu0 %v2765_v27  ;;  %v2761_v4 = vrot.slane %v5494_v31, 2  ;;  %v2768_v27 = vrot.slane %v2690_v5, 2  ;;  %v5520_v31 = vld [vmem:[%s5862_s15 + $0xf8] sm:$0xff]  ;;  %v2981_v5 = vld [vmem:[%s5862_s15 + $0xb0] sm:$0xff] }
 0xaed   :  { %2786 = vmatprep.subr.mxu0 %v2713_v7  ;;  %v2724_v7 = vld [vmem:[#allocation7 + $0x500] sm:$0xff]  ;;  %v2982_v50 = vld [vmem:[%s5862_s15 + $0xb8] sm:$0xff] }
 0xaee   :  { %2787 = vmatpush1.msra.mxu0 %v2712_v29  ;;  %v2689_v29 = vld [vmem:[#allocation3 + $0x28] sm:$0xf] }
 0xaef   :  { %2788 = vmatprep.subr.mxu0 %v2711_v30  ;;  %v2762_v30 = vsel %vm1679_vm5, %v2760_v2, %v2761_v4  ;;  %v2964_v2 = vld [vmem:[%s5862_s15 + $0x28] sm:$0xff] }
 0xaf0   :  { %2789 = vmatpush1.msra.mxu0 %v2710_v34  ;;  %v2766_v34 = vrot.slane %v2689_v29, 2  ;;  %v2962_v29 = vld [vmem:[%s5862_s15 + $0x18] sm:$0xff] }
 0xaf1   :  { %2790 = vmatprep.subr.mxu0 %v2709_v40  ;;  %v2769_v40 = vsel %vm1679_vm5, %v2764_v21, %v2768_v27  ;;  %v5537_v21 = vld [vmem:[%s5862_s15 + $0x70] sm:$0xff] }
 0xaf2   :  { %2791 = vmatpush1.msra.mxu0 %v2708_v43  ;;  %v2767_v43 = vsel %vm1679_vm5, %v2761_v4, %v2766_v34  ;;  %v2979_v4 = vld [vmem:[%s5862_s15 + $0xa0] sm:$0xff] }
 0xaf3   :  { %2792 = vmatprep.subr.mxu0 %v2707_v47  ;;  %v5525_v47 = vld [vmem:[%s5862_s15 + $0x78] sm:$0xff] }
 0xaf4   :  { %2793 = vmatpush1.msra.mxu0 %v2706_v52  ;;  %v5543_v52 = vld [vmem:[%s5862_s15 + $0xe8] sm:$0xff] }
 0xaf5   :  { %2794 = vmatprep.subr.mxu0 %v2705_v53  ;;  %v5549_v53 = vld [vmem:[%s5862_s15 + $0x68] sm:$0xff] }
 0xaf6   :  { %2795 = vmatpush1.msra.mxu0 %v2704_v57  ;;  %v5555_v57 = vld [vmem:[%s5862_s15 + $0xe0] sm:$0xff] }
 0xaf7   :  { %2796 = vmatprep.subr.mxu0 %v2703_v33  ;;  %v5561_v33 = vld [vmem:[%s5862_s15 + $0x60] sm:$0xff] }
 0xaf8   :  { %2797 = vmatpush1.msra.mxu0 %v2702_v49  ;;  %v5567_v49 = vld [vmem:[%s5862_s15 + $0xd8] sm:$0xff] }
 0xaf9   :  { %2798 = vmatprep.subr.mxu0 %v2701_v22  ;;  %v2970_v22 = vld [vmem:[%s5862_s15 + $0x58] sm:$0xff] }
 0xafa   :  { %2799 = vmatpush1.msra.mxu0 %v2700_v36  ;;  %v2985_v36 = vld [vmem:[%s5862_s15 + $0xd0] sm:$0xff] }
 0xafb   :  { %2800 = vmatprep.subr.mxu0 %v2699_v20  ;;  %v2969_v20 = vld [vmem:[%s5862_s15 + $0x50] sm:$0xff] }
 0xafc   :  { %2801 = vmatpush1.msra.mxu0 %v2698_v56  ;;  %v2984_v56 = vld [vmem:[%s5862_s15 + $0xc8] sm:$0xff] }
 0xafd   :  { %2802 = vmatprep.subr.mxu0 %v2697_v51  ;;  %v2968_v51 = vld [vmem:[%s5862_s15 + $0x48] sm:$0xff] }
 0xafe   :  { %2803 = vmatpush1.msra.mxu0 %v2696_v24  ;;  %v2983_v24 = vld [vmem:[%s5862_s15 + $0xc0] sm:$0xff] }
 0xaff   :  { %2804 = vmatprep.subr.mxu0 %v2695_v42  ;;  %v2967_v42 = vld [vmem:[%s5862_s15 + $0x40] sm:$0xff] }
 0xb00   :  { %2805 = vmatpush1.msra.mxu0 %v2694_v39 }
 0xb01   :  { %2806 = vmatprep.subr.mxu0 %v2693_v58 }
 0xb02   :  { %2807 = vmatpush1.msra.mxu0 %v2692_v59 }
 0xb03   :  { %2808 = vmatprep.subr.mxu0 %v2755_v35 }
 0xb04   :  { %2809 = vmatpush2.msra.mxu0 %v2754_v28 }
 0xb05   :  { %2810 = vmatprep.subr.mxu0 %v2753_v61 }
 0xb06   :  { %2811 = vmatpush2.msra.mxu0 %v2752_v26 }
 0xb07   :  { %2812 = vmatprep.subr.mxu0 %v2751_v60 }
 0xb08   :  { %2813 = vmatpush2.msra.mxu0 %v2750_v23 }
 0xb09   :  { %2814 = vmatprep.subr.mxu0 %v2749_v48 }
 0xb0a   :  { %2815 = vmatpush2.msra.mxu0 %v2748_v25 }
 0xb0b   :  { %2816 = vmatprep.subr.mxu0 %v2747_v37 }
 0xb0c   :  { %2817 = vmatpush2.msra.mxu0 %v2746_v41 }
 0xb0d   :  { %2818 = vmatprep.subr.mxu0 %v2745_v19 }
 0xb0e   :  { %2819 = vmatpush2.msra.mxu0 %v2744_v1 }
 0xb0f   :  { %2820 = vmatprep.subr.mxu0 %v2743_v62 }
 0xb10   :  { %2821 = vmatpush2.msra.mxu0 %v2742_v63 }
 0xb11   :  { %2822 = vmatprep.subr.mxu0 %v2741_v14 }
 0xb12   :  { %2823 = vmatpush2.msra.mxu0 %v2740_v12 }
 0xb13   :  { %2824 = vmatprep.subr.mxu0 %v2739_v16 }
 0xb14   :  { %2825 = vmatpush2.msra.mxu0 %v2738_v11 }
 0xb15   :  { %2826 = vmatprep.subr.mxu0 %v2737_v17 }
 0xb16   :  { %2827 = vmatpush2.msra.mxu0 %v2736_v9 }
 0xb17   :  { %2828 = vmatprep.subr.mxu0 %v2735_v15 }
 0xb18   :  { %2829 = vmatpush2.msra.mxu0 %v2734_v8 }
 0xb19   :  { %2830 = vmatprep.subr.mxu0 %v2733_v44 }
 0xb1a   :  { %2831 = vmatpush2.msra.mxu0 %v2732_v13 }
 0xb1b   :  { %2832 = vmatprep.subr.mxu0 %v2731_v45 }
 0xb1c   :  { %2833 = vmatpush2.msra.mxu0 %v2730_v18 }
 0xb1d   :  { %2834 = vmatprep.subr.mxu0 %v2729_v46 }
 0xb1e   :  { %2835 = vmatpush2.msra.mxu0 %v2728_v6  ;;  %v2865_v6 = vld [vmem:[%s5861_s14] sm:$0xff] }
 0xb1f   :  { %2836 = vmatprep.subr.mxu0 %v2727_v10  ;;  %v2966_v10 = vld [vmem:[%s5862_s15 + $0x38] sm:$0xff] }
 0xb20   :  { %2837 = vmatpush2.msra.mxu0 %v2726_v3  ;;  %v2965_v3 = vld [vmem:[%s5862_s15 + $0x30] sm:$0xff] }
 0xb21   :  { %2838 = vmatprep.subr.mxu0 %v2725_v0  ;;  %v2980_v0 = vld [vmem:[%s5862_s15 + $0xa8] sm:$0xff] }
 0xb22   :  { %2839 = vmatpush2.msra.mxu0 %v2724_v7  ;;  %v2963_v7 = vld [vmem:[%s5862_s15 + $0x20] sm:$0xff] }
 0xb23   :  { %2841 = vmatmul.mubr.f32.vlgmr.msra.gmra.mxu0 %v2762_v30  ;;  %3898 = vmatprep.subr.mxu0 %v5520_v31  ;;  %v2977_v30 = vld [vmem:[%s5862_s15 + $0x90] sm:$0xff] }
 0xb24   :  { %2846 = vmatprep.mubr.f32.mxu0 %v2769_v40  ;;  %3899 = vmatpush3.msra.mxu0 %v5525_v47  ;;  %v2976_v40 = vld [vmem:[%s5862_s15 + $0x88] sm:$0xff] }
 0xb25   :  { %3900 = vmatprep.subr.mxu0 %v5531_v38 }
 0xb26   :  { %3901 = vmatpush3.msra.mxu0 %v5537_v21 }
 0xb27   :  { %2847 = vmatmul.mubr.f32.gmra.mxu0 %v2767_v43  ;;  %3902 = vmatprep.subr.mxu0 %v5543_v52  ;;  %v2960_v43 = vld [vmem:[%s5862_s15 + $0x8] sm:$0xff] }
 0xb28   :  { %2852 = vmatprep.mubr.f32.mxu0 %v2768_v27  ;;  %3903 = vmatpush3.msra.mxu0 %v5549_v53  ;;  %v2978_v27 = vld [vmem:[%s5862_s15 + $0x98] sm:$0xff] }
 0xb29   :  { %3904 = vmatprep.subr.mxu0 %v5555_v57 }
 0xb2a   :  { %3905 = vmatpush3.msra.mxu0 %v5561_v33 }
 0xb2b   :  { %2853 = vmatmul.mubr.f32.gmra.mxu0 %v2766_v34  ;;  %3906 = vmatprep.subr.mxu0 %v5567_v49  ;;  %v2961_v34 = vld [vmem:[%s5862_s15 + $0x10] sm:$0xff] }
 0xb2c   :  { %3907 = vmatpush3.msra.mxu0 %v2970_v22 }
 0xb2d   :  { %3908 = vmatprep.subr.mxu0 %v2985_v36 }
 0xb2e   :  { %3909 = vmatpush3.msra.mxu0 %v2969_v20 }
 0xb2f   :  { %3910 = vmatprep.subr.mxu0 %v2984_v56 }
 0xb30   :  { %3911 = vmatpush3.msra.mxu0 %v2968_v51 }
 0xb31   :  { %3912 = vmatprep.subr.mxu0 %v2983_v24 }
 0xb32   :  { %3913 = vmatpush3.msra.mxu0 %v2967_v42 }
 0xb33   :  { %3914 = vmatprep.subr.mxu0 %v2982_v50 }
 0xb34   :  { %3915 = vmatpush3.msra.mxu0 %v2966_v10 }
 0xb35   :  { %3916 = vmatprep.subr.mxu0 %v2981_v5 }
 0xb36   :  { %3917 = vmatpush3.msra.mxu0 %v2965_v3 }
 0xb37   :  { %3918 = vmatprep.subr.mxu0 %v2980_v0 }
 0xb38   :  { %3919 = vmatpush3.msra.mxu0 %v2964_v2 }
 0xb39   :  { %3920 = vmatprep.subr.mxu0 %v2979_v4 }
 0xb3a   :  { %3921 = vmatpush3.msra.mxu0 %v2963_v7 }
 0xb3b   :  { %3922 = vmatprep.subr.mxu0 %v2978_v27 }
 0xb3c   :  { %3923 = vmatpush3.msra.mxu0 %v2962_v29 }
 0xb3d   :  { %3924 = vmatprep.subr.mxu0 %v2977_v30 }
 0xb3e   :  { %3925 = vmatpush3.msra.mxu0 %v2961_v34 }
 0xb3f   :  { %3926 = vmatprep.subr.mxu0 %v2976_v40 }
 0xb40   :  { %3927 = vmatpush3.msra.mxu0 %v2960_v43 }
 0xb9f   :  { %v2670_v35 = vpop.f32.mrf.mxu1 }
 0xba1   :  { %v2672_v61 = vpop.f32.mrf.mxu1 }
 0xba3   :  { %v2587_v39 = vpop.f32.mrf.mxu0  ;;  %v2676_v60 = vpop.f32.mrf.mxu1 }
 0xba4   :  { %v2671_v13 = vadd.f32 %v2670_v35, %v2587_v39  ;;  %v3074_v35 = vld [vmem:[%s5863_s16 + $0x60] sm:$0xff] }
 0xba5   :  { %v2589_v58 = vpop.f32.mrf.mxu0  ;;  %v2678_v48 = vpop.f32.mrf.mxu1 }
 0xba6   :  { %v2673_v8 = vadd.f32 %v2672_v61, %v2589_v58  ;;  %v3076_v58 = vld [vmem:[%s5863_s16 + $0x70] sm:$0xff] }
 0xba7   :  { %v2593_v59 = vpop.f32.mrf.mxu0  ;;  %v3072_v61 = vld [vmem:[%s5863_s16 + $0x50] sm:$0xff] }
 0xba8   :  { %v2677_v9 = vadd.f32 %v2676_v60, %v2593_v59  ;;  %v3075_v59 = vld [vmem:[%s5863_s16 + $0x68] sm:$0xff]  ;;  %v3070_v60 = vld [vmem:[%s5863_s16 + $0x40] sm:$0xff] }
 0xba9   :  { %v2595_v28 = vpop.f32.mrf.mxu0  ;;  %v2682_v41 = vpop.f32.mrf.mxu1 }
 0xbaa   :  { %v2679_v11 = vadd.f32 %v2678_v48, %v2595_v28  ;;  %v3073_v28 = vld [vmem:[%s5863_s16 + $0x58] sm:$0xff]  ;;  %v3068_v48 = vld [vmem:[%s5863_s16 + $0x30] sm:$0xff] }
 0xbab   :  { %v2599_v26 = vpop.f32.mrf.mxu0  ;;  %v2684_v62 = vpop.f32.mrf.mxu1 }
 0xbac   :  { %v2683_v12 = vadd.f32 %v2682_v41, %v2599_v26  ;;  %v3071_v26 = vld [vmem:[%s5863_s16 + $0x48] sm:$0xff]  ;;  %v3065_v41 = vld [vmem:[%s5863_s16 + $0x18] sm:$0xff] }
 0xbad   :  { %v2601_v23 = vpop.f32.mrf.mxu0 }
 0xbae   :  { %v2685_v14 = vadd.f32 %v2684_v62, %v2601_v23  ;;  %v3069_v23 = vld [vmem:[%s5863_s16 + $0x38] sm:$0xff]  ;;  %v3062_v62 = vld [vmem:[%s5863_s16] sm:$0xff] }
 0xbe3   :  { %v2842_v25 = vpop.f32.mrf.mxu0 }
 0xbe4   :  { %v2859_v46 = vadd.f32 %v2842_v25, %v2671_v13  ;;  %v3067_v25 = vld [vmem:[%s5863_s16 + $0x28] sm:$0xff] }
 0xbe5   :  { %v2844_v37 = vpop.f32.mrf.mxu0 }
 0xbe6   :  { %v2860_v18 = vadd.f32 %v2844_v37, %v2673_v8  ;;  %v3066_v37 = vld [vmem:[%s5863_s16 + $0x20] sm:$0xff] }
 0xbe7   :  { %v2848_v19 = vpop.f32.mrf.mxu0 }
 0xbe8   :  { %v2861_v45 = vadd.f32 %v2848_v19, %v2677_v9  ;;  %v3064_v19 = vld [vmem:[%s5863_s16 + $0x10] sm:$0xff] }
 0xbe9   :  { %v2850_v1 = vpop.f32.mrf.mxu0 }
 0xbea   :  { %v2862_v44 = vadd.f32 %v2850_v1, %v2679_v11  ;;  %v3063_v1 = vld [vmem:[%s5863_s16 + $0x8] sm:$0xff] }
 0xbeb   :  { %v2854_v63 = vpop.f32.mrf.mxu0 }
 0xbec   :  { %v2863_v15 = vadd.f32 %v2854_v63, %v2683_v12 }
 0xbed   :  { %v2856_v16 = vpop.f32.mrf.mxu0 }
 0xbee   :  { %v2864_v17 = vadd.f32 %v2856_v16, %v2685_v14 }
 0xbf0   :  { %3716 = vmatprep.subr.msk.mxu1 %vm621_vm0, %v2864_v17 }
 0xbf1   :  { %3717 = vmatpush1.msk.msra.mxu1 %vm621_vm0, %v2863_v15 }
 0xbf2   :  { %2904 = vmatprep.subr.mxu1 %v2862_v44 }
 0xbf3   :  { %2905 = vmatpush1.msra.mxu1 %v2861_v45 }
 0xbf4   :  { %2906 = vmatprep.subr.mxu1 %v2860_v18 }
 0xbf5   :  { %2907 = vmatpush1.msra.mxu1 %v2859_v46 }
 0xbf6   :  { %3718 = vmatmul.mubr.msk.f32.vlgmr.msra.gmra.mxu1 %vm2866_vm9, %v2865_v6  ;;  %3863 = vmatprep.subr.mxu1 %v5520_v31  ;;  %v2975_v31 = vld [vmem:[%s5862_s15 + $0x80] sm:$0xff] }
 0xbf7   :  { %3864 = vmatpush3.msra.mxu1 %v5525_v47  ;;  %v2959_v47 = vld [vmem:[%s5862_s15] sm:$0xff]  ;;  %3928 = vmatprep.subr.mxu0 %v2975_v31 }
 0xbf8   :  { %3865 = vmatprep.subr.mxu1 %v5531_v38  ;;  %v3077_v38 = vld [vmem:[%s5863_s16 + $0x78] sm:$0xff]  ;;  %3929 = vmatpush3.msra.mxu0 %v2959_v47 }
 0xbf9   :  { %3866 = vmatpush3.msra.mxu1 %v5537_v21  ;;  %3970 = vmatprep.subr.mxu0 %v5211_v55 }
 0xbfa   :  { %3867 = vmatprep.subr.mxu1 %v5543_v52 }
 0xbfb   :  { %3868 = vmatpush3.msra.mxu1 %v5549_v53 }
 0xbfc   :  { %3869 = vmatprep.subr.mxu1 %v5555_v57 }
 0xbfd   :  { %3870 = vmatpush3.msra.mxu1 %v5561_v33 }
 0xbfe   :  { %3871 = vmatprep.subr.mxu1 %v5567_v49 }
 0xbff   :  { %3872 = vmatpush3.msra.mxu1 %v2970_v22 }
 0xc00   :  { %3873 = vmatprep.subr.mxu1 %v2985_v36 }
 0xc01   :  { %3874 = vmatpush3.msra.mxu1 %v2969_v20 }
 0xc02   :  { %3875 = vmatprep.subr.mxu1 %v2984_v56 }
 0xc03   :  { %3876 = vmatpush3.msra.mxu1 %v2968_v51 }
 0xc04   :  { %3877 = vmatprep.subr.mxu1 %v2983_v24 }
 0xc05   :  { %3878 = vmatpush3.msra.mxu1 %v2967_v42 }
 0xc06   :  { %3879 = vmatprep.subr.mxu1 %v2982_v50 }
 0xc07   :  { %3880 = vmatpush3.msra.mxu1 %v2966_v10 }
 0xc08   :  { %3881 = vmatprep.subr.mxu1 %v2981_v5 }
 0xc09   :  { %3882 = vmatpush3.msra.mxu1 %v2965_v3 }
 0xc0a   :  { %3883 = vmatprep.subr.mxu1 %v2980_v0 }
 0xc0b   :  { %3884 = vmatpush3.msra.mxu1 %v2964_v2 }
 0xc0c   :  { %3885 = vmatprep.subr.mxu1 %v2979_v4 }
 0xc0d   :  { %3886 = vmatpush3.msra.mxu1 %v2963_v7 }
 0xc0e   :  { %3887 = vmatprep.subr.mxu1 %v2978_v27 }
 0xc0f   :  { %3888 = vmatpush3.msra.mxu1 %v2962_v29 }
 0xc10   :  { %3889 = vmatprep.subr.mxu1 %v2977_v30 }
 0xc11   :  { %3890 = vmatpush3.msra.mxu1 %v2961_v34 }
 0xc12   :  { %3891 = vmatprep.subr.mxu1 %v2976_v40 }
 0xc13   :  { %3892 = vmatpush3.msra.mxu1 %v2960_v43  ;;  %v3397_v43 = vld [vmem:[%s5866_s19 + $0xf8] sm:$0xff] }
 0xc14   :  { %3893 = vmatprep.subr.mxu1 %v2975_v31  ;;  %v3381_v31 = vld [vmem:[%s5866_s19 + $0x78] sm:$0xff] }
 0xc15   :  { %3894 = vmatpush3.msra.mxu1 %v2959_v47  ;;  %v3396_v47 = vld [vmem:[%s5866_s19 + $0xf0] sm:$0xff] }
 0xc16   :  { %3098 = vmatprep.subr.mxu1 %v3077_v38 }
 0xcb6   :  { %v5658_v21 = vpop.f32.mrf.mxu1 }
 0xcb7   :  { %v2947_v52 = vrot.slane %v5658_v21, 4 }
 0xcb8   :  { %v5661_v53 = vpop.f32.mrf.mxu1 }
 0xcb9   :  { %v2948_v57 = vadd.f32 %v2947_v52, %v5658_v21  ;;  %v2953_v33 = vrot.slane %v5661_v53, 4  ;;  %v3379_v52 = vld [vmem:[%s5866_s19 + $0x68] sm:$0xff] }
 0xcbb   :  { %v2949_v49 = vrot.slane %v2948_v57, 2  ;;  %v2954_v22 = vadd.f32 %v2953_v33, %v5661_v53  ;;  %v3393_v33 = vld [vmem:[%s5866_s19 + $0xd8] sm:$0xff] }
 0xcbd   :  { %v2950_v36 = vadd.f32 %v2949_v49, %v2948_v57  ;;  %v2955_v20 = vrot.slane %v2954_v22, 2  ;;  %v3378_v57 = vld [vmem:[%s5866_s19 + $0x60] sm:$0xff]  ;;  %v3377_v49 = vld [vmem:[%s5866_s19 + $0x58] sm:$0xff] }
 0xcbf   :  { %v2956_v56 = vadd.f32 %v2955_v20, %v2954_v22  ;;  %v2951_v51 = vrot.slane %v2950_v36, 1  ;;  %v3392_v22 = vld [vmem:[%s5866_s19 + $0xd0] sm:$0xff]  ;;  %v3391_v20 = vld [vmem:[%s5866_s19 + $0xc8] sm:$0xff] }
 0xcc1   :  { %v2957_v24 = vrot.slane %v2956_v56, 1  ;;  %v2952_v39 = vadd.f32 %v2951_v51, %v2950_v36  ;;  %v3376_v36 = vld [vmem:[%s5866_s19 + $0x50] sm:$0xff]  ;;  %v3390_v51 = vld [vmem:[%s5866_s19 + $0xc0] sm:$0xff] }
 0xcc3   :  { %v2958_v42 = vadd.f32 %v2957_v24, %v2956_v56  ;;  %v3375_v56 = vld [vmem:[%s5866_s19 + $0x48] sm:$0xff]  ;;  %v3374_v24 = vld [vmem:[%s5866_s19 + $0x40] sm:$0xff] }
 0xcc5   :  { %3055 = vmatprep.mubr.f32.mxu1 %v2958_v42  ;;  %v3389_v42 = vld [vmem:[%s5866_s19 + $0xb8] sm:$0xff] }
 0xcc6   :  { %3056 = vmatmul.mubr.f32.vlgmr.msra.gmra.mxu1 %v2952_v39  ;;  %v3373_v39 = vld [vmem:[%s5866_s19 + $0x38] sm:$0xff] }
 0xcc7   :  { %3099 = vmatpush1.msra.mxu1 %v3076_v58  ;;  %3146 = vmatprep.mubr.f32.mxu1 %v5211_v55 }
 0xcc8   :  { %3100 = vmatprep.subr.mxu1 %v3075_v59 }
 0xcc9   :  { %3101 = vmatpush1.msra.mxu1 %v3074_v35 }
 0xcca   :  { %3102 = vmatprep.subr.mxu1 %v3073_v28 }
 0xccb   :  { %3103 = vmatpush1.msra.mxu1 %v3072_v61 }
 0xccc   :  { %3104 = vmatprep.subr.mxu1 %v3071_v26 }
 0xccd   :  { %3105 = vmatpush1.msra.mxu1 %v3070_v60 }
 0xcce   :  { %3106 = vmatprep.subr.mxu1 %v3069_v23 }
 0xccf   :  { %3107 = vmatpush1.msra.mxu1 %v3068_v48 }
 0xcd0   :  { %3108 = vmatprep.subr.mxu1 %v3067_v25 }
 0xcd1   :  { %3109 = vmatpush1.msra.mxu1 %v3066_v37 }
 0xcd2   :  { %3110 = vmatprep.subr.mxu1 %v3065_v41 }
 0xcd3   :  { %3111 = vmatpush1.msra.mxu1 %v3064_v19 }
 0xcd4   :  { %3112 = vmatprep.subr.mxu1 %v3063_v1 }
 0xcd5   :  { %3113 = vmatpush1.msra.mxu1 %v3062_v62 }
 0xcd6   :  { %3267 = vmatprep.subr.mxu1 %v3077_v38  ;;  %v3380_v38 = vld [vmem:[%s5866_s19 + $0x70] sm:$0xff] }
 0xd86   :  { %v3895_v63 = vpop.f32.mrf.mxu1 }
 0xd88   :  { %v3896_v14 = vpop.f32.mrf.mxu1 }
 0xd89   :  { %v3897_v12 = vadd.f32 %v3896_v14, %v3895_v63 }
 0xd8b   :  { %v3061_v16 = vmul.f32 0.03125, %v3897_v12 }
 0xd8d   :  { %3719 = vmatmul.mubr.msk.f32.vlgmr.msra.gmra.mxu1 %vm3078_vm10, %v3061_v16  ;;  %v3334_v16 = vld [vmem:[%s5864_s17] sm:$0x3] }
 0xd8e   :  { %3268 = vmatpush1.msra.mxu1 %v3076_v58  ;;  %3315 = vmatprep.mubr.f32.mxu1 %v5211_v55  ;;  %v3388_v58 = vld [vmem:[%s5866_s19 + $0xb0] sm:$0xff] }
 0xd8f   :  { %3269 = vmatprep.subr.mxu1 %v3075_v59  ;;  %v3372_v59 = vld [vmem:[%s5866_s19 + $0x30] sm:$0xff] }
 0xd90   :  { %3270 = vmatpush1.msra.mxu1 %v3074_v35  ;;  %v3387_v35 = vld [vmem:[%s5866_s19 + $0xa8] sm:$0xff] }
 0xd91   :  { %3271 = vmatprep.subr.mxu1 %v3073_v28  ;;  %v3371_v28 = vld [vmem:[%s5866_s19 + $0x28] sm:$0xff] }
 0xd92   :  { %3272 = vmatpush1.msra.mxu1 %v3072_v61  ;;  %v3386_v61 = vld [vmem:[%s5866_s19 + $0xa0] sm:$0xff] }
 0xd93   :  { %3273 = vmatprep.subr.mxu1 %v3071_v26  ;;  %v3370_v26 = vld [vmem:[%s5866_s19 + $0x20] sm:$0xff] }
 0xd94   :  { %3274 = vmatpush1.msra.mxu1 %v3070_v60  ;;  %v3385_v60 = vld [vmem:[%s5866_s19 + $0x98] sm:$0xff] }
 0xd95   :  { %3275 = vmatprep.subr.mxu1 %v3069_v23  ;;  %v3369_v23 = vld [vmem:[%s5866_s19 + $0x18] sm:$0xff] }
 0xd96   :  { %3276 = vmatpush1.msra.mxu1 %v3068_v48  ;;  %v3384_v48 = vld [vmem:[%s5866_s19 + $0x90] sm:$0xff] }
 0xd97   :  { %3277 = vmatprep.subr.mxu1 %v3067_v25  ;;  %v3368_v25 = vld [vmem:[%s5866_s19 + $0x10] sm:$0xff] }
 0xd98   :  { %3278 = vmatpush1.msra.mxu1 %v3066_v37  ;;  %v3383_v37 = vld [vmem:[%s5866_s19 + $0x88] sm:$0xff] }
 0xd99   :  { %3279 = vmatprep.subr.mxu1 %v3065_v41  ;;  %v3367_v41 = vld [vmem:[%s5866_s19 + $0x8] sm:$0xff] }
 0xd9a   :  { %3280 = vmatpush1.msra.mxu1 %v3064_v19  ;;  %v3382_v19 = vld [vmem:[%s5866_s19 + $0x80] sm:$0xff] }
 0xd9b   :  { %3281 = vmatprep.subr.mxu1 %v3063_v1  ;;  %v3366_v1 = vld [vmem:[%s5866_s19] sm:$0xff] }
 0xd9c   :  { %3282 = vmatpush1.msra.mxu1 %v3062_v62 }
 0xd9d   :  { %3933 = vmatprep.subr.mxu1 %v3397_v43 }
 0xe4d   :  { %v3148_v11 = vpop.f32.mrf.mxu1 }
 0xe4e   :  { %v3156_v17 = vrot.slane %v3148_v11, %v4499_v32 }
 0xe4f   :  { %v3150_v9 = vpop.f32.mrf.mxu1 }
 0xe50   :  { %v5716_v15 = vsub.f32 %v5658_v21, %v3156_v17  ;;  %v3160_v8 = vrot.slane %v3150_v9, %v4499_v32  ;;  %v3395_v21 = vld [vmem:[%s5866_s19 + $0xe8] sm:$0xff]  ;;  %v3348_v17 = vld [vmem:[%s5865_s18] sm:$0x3] }
 0xe52   :  { %v3163_v44 = vmul.f32 %v5716_v15, %v5716_v15  ;;  %v5722_v13 = vsub.f32 %v5661_v53, %v3160_v8  ;;  %v3394_v53 = vld [vmem:[%s5866_s19 + $0xe0] sm:$0xff]  ;;  %v3339_v8 = vrot.slane %v3334_v16, %v4499_v32 }
 0xe54   :  { %v3165_v45 = vrot.slane %v3163_v44, 4  ;;  %v3164_v18 = vmul.f32 %v5722_v13, %v5722_v13 }
 0xe56   :  { %v3166_v46 = vadd.f32 %v3165_v45, %v3163_v44  ;;  %v3171_v6 = vrot.slane %v3164_v18, 4 }
 0xe58   :  { %v3167_v50 = vrot.slane %v3166_v46, 2  ;;  %v3172_v10 = vadd.f32 %v3171_v6, %v3164_v18  ;;  %v3343_v18 = vrot.slane %v3334_v16, %v4931_v54 }
 0xe5a   :  { %v3168_v5 = vadd.f32 %v3167_v50, %v3166_v46  ;;  %v3173_v3 = vrot.slane %v3172_v10, 2  ;;  %v3353_v46 = vrot.slane %v3348_v17, %v4499_v32 }
 0xe5c   :  { %v3174_v0 = vadd.f32 %v3173_v3, %v3172_v10  ;;  %v3169_v2 = vrot.slane %v3168_v5, 1  ;;  %v3357_v10 = vrot.slane %v3348_v17, %v4931_v54 }
 0xe5e   :  { %v3175_v4 = vrot.slane %v3174_v0, 1  ;;  %v3170_v27 = vadd.f32 %v3169_v2, %v3168_v5 }
 0xe60   :  { %v3176_v7 = vadd.f32 %v3175_v4, %v3174_v0 }
 0xe62   :  { %3241 = vmatprep.mubr.f32.mxu0 %v3176_v7 }
 0xe63   :  { %3242 = vmatmul.mubr.f32.vlgmr.msra.gmra.mxu0 %v3170_v27 }
 0xe64   :  { %3972 = vmatprep.mubr.msk.f32.mxu0 %vm4048_vm12, %v5211_v55 }
 0xf23   :  { %v3930_v29 = vpop.f32.mrf.mxu0 }
 0xf25   :  { %v3931_v30 = vpop.f32.mrf.mxu0 }
 0xf26   :  { %v3932_v34 = vadd.f32 %v3931_v30, %v3930_v29 }
 0xf28   :  { %v3247_v40 = vmul.f32 0.03125, %v3932_v34 }
 0xf2a   :  { %3720 = vmatmul.mubr.msk.f32.vlgmr.msra.gmra.mxu1 %vm3078_vm10, %v3247_v40  ;;  %v3474_v40 = vld [vmem:[%s5868_s21] sm:$0x3] }
 0xf2b   :  { %3934 = vmatpush3.msra.mxu1 %v3381_v31  ;;  %v3721_v31 = vld [vmem:[#allocation4] ss:$0 sm:$0xff] }
 0xf2c   :  { %3935 = vmatprep.subr.mxu1 %v3396_v47 }
 0xf2d   :  { %3936 = vmatpush3.msra.mxu1 %v3380_v38 }
 0xf2e   :  { %3937 = vmatprep.subr.mxu1 %v3395_v21 }
 0xf2f   :  { %3938 = vmatpush3.msra.mxu1 %v3379_v52 }
 0xf30   :  { %3939 = vmatprep.subr.mxu1 %v3394_v53 }
 0xf31   :  { %3940 = vmatpush3.msra.mxu1 %v3378_v57 }
 0xf32   :  { %3941 = vmatprep.subr.mxu1 %v3393_v33 }
 0xf33   :  { %3942 = vmatpush3.msra.mxu1 %v3377_v49 }
 0xf34   :  { %3943 = vmatprep.subr.mxu1 %v3392_v22 }
 0xf35   :  { %3944 = vmatpush3.msra.mxu1 %v3376_v36 }
 0xf36   :  { %3945 = vmatprep.subr.mxu1 %v3391_v20 }
 0xf37   :  { %3946 = vmatpush3.msra.mxu1 %v3375_v56 }
 0xf38   :  { %3947 = vmatprep.subr.mxu1 %v3390_v51 }
 0xf39   :  { %3948 = vmatpush3.msra.mxu1 %v3374_v24 }
 0xf3a   :  { %3949 = vmatprep.subr.mxu1 %v3389_v42 }
 0xf3b   :  { %3950 = vmatpush3.msra.mxu1 %v3373_v39 }
 0xf3c   :  { %3951 = vmatprep.subr.mxu1 %v3388_v58 }
 0xf3d   :  { %3952 = vmatpush3.msra.mxu1 %v3372_v59 }
 0xf3e   :  { %3953 = vmatprep.subr.mxu1 %v3387_v35 }
 0xf3f   :  { %3954 = vmatpush3.msra.mxu1 %v3371_v28 }
 0xf40   :  { %3955 = vmatprep.subr.mxu1 %v3386_v61 }
 0xf41   :  { %3956 = vmatpush3.msra.mxu1 %v3370_v26 }
 0xf42   :  { %3957 = vmatprep.subr.mxu1 %v3385_v60 }
 0xf43   :  { %3958 = vmatpush3.msra.mxu1 %v3369_v23 }
 0xf44   :  { %3959 = vmatprep.subr.mxu1 %v3384_v48 }
 0xf45   :  { %3960 = vmatpush3.msra.mxu1 %v3368_v25 }
 0xf46   :  { %3961 = vmatprep.subr.mxu1 %v3383_v37 }
 0xf47   :  { %3962 = vmatpush3.msra.mxu1 %v3367_v41 }
 0xf48   :  { %3963 = vmatprep.subr.mxu1 %v3382_v19 }
 0xf49   :  { %3964 = vmatpush3.msra.mxu1 %v3366_v1 }
 0xfea   :  { %v3317_v62 = vpop.f32.mrf.mxu1 }
 0xfeb   :  { %v3318_v63 = vadd.f32 1e-05, %v3317_v62 }
 0xfec   :  { %v3319_v14 = vpop.f32.mrf.mxu1 }
 0xfed   :  { %3989 = vrsqrt.f32 %v3318_v63  ;;  %v3320_v12 = vadd.f32 1e-05, %v3319_v14 }
 0xfef   :  { %3991 = vrsqrt.f32 %v3320_v12 }
 0xffa   :  { %v3990_v11 = vpop.eup %3989 }
 0xffb   :  { %v3327_v9 = vrot.slane %v3990_v11, %v4499_v32 }
 0xffc   :  { %v3992_v44 = vpop.eup %3991 }
 0xffd   :  { %v3331_v45 = vrot.slane %v3992_v44, %v4499_v32  ;;  %v3332_v6 = vmul.f32 %v3327_v9, %v5716_v15  ;;  %v3468_v32 = vld [vmem:[%s5867_s20] sm:$0xff] }
 0xfff   :  { %v3333_v50 = vmul.f32 %v3331_v45, %v5722_v13  ;;  %v3346_v5 = vmul.f32 %v3339_v8, %v3332_v6 }
0x1001   :  { %v3347_v3 = vmul.f32 %v3343_v18, %v3333_v50  ;;  %v3360_v0 = vadd.f32 %v3353_v46, %v3346_v5 }
0x1003   :  { %v3361_v2 = vadd.f32 %v3357_v10, %v3347_v3  ;;  %v3362_v4 = vmul.f32 0.2, %v3360_v0 }
0x1005   :  { %v3363_v7 = vmul.f32 0.2, %v3361_v2  ;;  %v3364_v29 = vmax.f32 %v3360_v0, %v3362_v4 }
0x1007   :  { %v3365_v27 = vmax.f32 %v3361_v2, %v3363_v7 }
0x1009   :  { %3462 = vmatprep.mubr.f32.mxu1 %v3365_v27 }
0x100a   :  { %3463 = vmatmul.mubr.f32.vlgmr.msra.gmra.mxu1 %v3364_v29 }
0x10ca   :  { %v3965_v30 = vpop.f32.mrf.mxu1 }
0x10cc   :  { %v3966_v34 = vpop.f32.mrf.mxu1 }
0x10cd   :  { %v3967_v15 = vadd.f32 %v3966_v34, %v3965_v30 }
0x10cf   :  { %v3469_v13 = vmul.f32 %v3967_v15, %v3468_v32 }
0x10d1   :  { %v3471_v54 = vsel %vm3470_vm11, %v3469_v13, 0.0 }
0x10d2   :  { %3472 = vadd.xlane.f32.xlu0 %v3471_v54 }
0x115b   :  { %v3473_v43 = vpop.xlane.xlu0 %3472 }
0x115c   :  { %3971 = vmatpush3.msra.mxu0 %v3473_v43 }
0x115d   :  { %3973 = vmatmul.mubr.msk.f32.vlgmr.msra.gmra.mxu0 %vm3482_vm13, %v3474_v40 }
0x121d   :  { %v3552_v47 = vpop.f32.mrf.mxu0 }
0x121e   :  { %v3553_v38 = vadd.f32 %v3721_v31, %v3552_v47 }
0x121f   :  { %v3974_v21 = vpop.f32.mrf.mxu0 }
0x1220   :  { %v3556_v52 = vand.u32 2147483647, %v3553_v38  ;;  %vm3560_vm15 = vcmp.ge.f32.partialorder %v3553_v38, 0.0 }
0x1222   :  { %v3557_v53 = vsub.f32 0.0, %v3556_v52 }
0x1224   :  { %v3558_v57 = vmul.f32 1.442695, %v3557_v53 }
0x1226   :  { %3993 = vpow2.f32 %v3558_v57 }
0x1233   :  { %v3994_v33 = vpop.eup %3993 }
0x1234   :  { %v3561_v49 = vadd.f32 1.0, %v3994_v33 }
0x1236   :  { %3995 = vrcp.f32 %v3561_v49 }
0x1243   :  { %v3996_v55 = vpop.eup %3995 }
0x1244   :  { %v3564_v22 = vmul.f32 %v3996_v55, %v3994_v33 }
0x1246   :  { %v3565_v36 = vsel %vm3560_vm15, %v3996_v55, %v3564_v22 }
0x1247   :  { %3567 = vst.msk [vmem:[%s5870_s23] sm:$0x3] %vm3566_vm14, %v3565_v36 }
0x1248   :  { %3572 = vsyncpa [#allocation6], 1 }
0x1249   :  { %3573 = vsyncpa [#allocation8], 1 }

</bundles_post_ra>
